<compile_context>
chip_gen: v7x
topology: tpu7x:2x2x1
jax: 0.10.0
libtpu: 0.0.40
codegen_flags: <defaults>
</compile_context>

<pallas_src>
import math

import numpy as np
import jax
import jax.numpy as jnp
from jax.experimental import pallas as pl
from jax.experimental.pallas import tpu as pltpu

T_SAMPLES = 216          # heartbeat length in ecg_pytorch
H_STEP = 1.0 / 216.0     # Euler step size
A_BASE = 0.005           # baseline wander amplitude
F2_BASE = 0.25           # baseline wander frequency
X0 = -0.417750770388669  # initial oscillator state (typical beat)
Y0 = -0.9085616622823985
TWO_PI = 2.0 * math.pi
OMEGA = 2.0 * math.pi    # constant angular velocity (see TODO above)
TILE_MIN = 128           # lane-dense minimum batch tile
TILE_MAX = 1024          # cap on the adaptive batch tile


def _precompute_phase():
    """Parameter-independent oscillator trajectory theta(t), z0(t), t = 0..T-2 (f64)."""
    x_t, y_t, t = X0, Y0, 0.0
    thetas, z0s = [], []
    for _ in range(T_SAMPLES - 1):
        thetas.append(math.atan2(y_t, x_t))
        z0s.append(A_BASE * math.sin(TWO_PI * F2_BASE * t))
        alpha = 1.0 - math.sqrt(x_t * x_t + y_t * y_t)
        f_x = alpha * x_t - OMEGA * y_t
        f_y = alpha * y_t + OMEGA * x_t
        x_t = x_t + H_STEP * f_x
        y_t = y_t + H_STEP * f_y
        t = t + H_STEP
    return np.asarray(thetas, np.float64), np.asarray(z0s, np.float64)


def _precompute_constants():
    """theta padded to T rows, plus the augmented Euler propagator and its constant offset.

    z_k = (1-h)^k v0 + sum_{n<k} (1-h)^(k-1-n) * h * (z0_n - G_n)
        = c0[k] + (M_aug @ [ -G ; v0_block ])[k]
    """
    theta_np, z0_np = _precompute_phase()                       # (T-1,), (T-1,)
    tm1 = T_SAMPLES - 1
    one_mh = 1.0 - H_STEP
    k = np.arange(T_SAMPLES, dtype=np.float64)[:, None]         # (T, 1)
    n = np.arange(tm1, dtype=np.float64)[None, :]               # (1, T-1)
    m1 = np.where(n < k, one_mh ** (k - 1.0 - n), 0.0)          # (T, T-1)
    m1h = H_STEP * m1                                           # (T, T-1)
    pvec = one_mh ** k                                          # (T, 1)
    c0 = m1h @ z0_np[:, None]                                   # (T, 1)

    # theta padded to 216 rows (row 215 unused: its M_aug column is zero).
    theta_pad = np.zeros((T_SAMPLES, 1), np.float32)
    theta_pad[:tm1, 0] = theta_np.astype(np.float32)

    # M_aug columns: 0..214 -> h*M1 (real Gaussian rows), 215 -> 0 (pad Gaussian row),
    #                216    -> (1-h)^k (multiplies v0),     217..223 -> 0 (v0 block pad).
    maug = np.zeros((T_SAMPLES, T_SAMPLES + 8), np.float64)
    maug[:, 0:tm1] = m1h
    maug[:, T_SAMPLES] = pvec[:, 0]
    return theta_pad, c0.astype(np.float32), maug.astype(np.float32)


_THETA_NP, _C0_NP, _MAUG_NP = _precompute_constants()   # (T,1), (T,1), (T,T+8)


def _learn_params_kernel(theta_ref, maug_ref, c0_ref, xT_ref, w_ref, b_ref, v0_ref, out_ref):
    """theta_ref: (T,1)  maug_ref: (T,T+8)  c0_ref: (T,1)
       xT_ref: (15,TB)  w_ref: (24,15)  b_ref: (24,1)  v0_ref: (8,TB)
       out_ref: (T,TB) -- TB = lane-dense batch tile."""
    t_steps, tb = out_ref.shape

    # Linear(15,15), zero-padded to 24 sublane-aligned output rows:
    # a_i -> rows 0-4, b_i -> rows 8-12, theta_i -> rows 16-20 (each in its own 8-row tile).
    params_t = jnp.dot(w_ref[...], xT_ref[...],
                       preferred_element_type=jnp.float32) + b_ref[...]
    a_p = params_t[0:5, :]         # (5, TB) amplitudes a_i
    b_p = params_t[8:13, :]        # (5, TB) widths     b_i
    th_p = params_t[16:21, :]      # (5, TB) angles     theta_i

    # Hoist the long-latency reciprocal out of the time axis (b_i == 0 -> inf/NaN, as in PyTorch).
    neg_inv_2b2 = -0.5 / (b_p * b_p)          # (5, TB)

    two_pi = jnp.float32(TWO_PI)
    inv_two_pi = jnp.float32(1.0 / TWO_PI)

    # Gaussian sum -G(t): time on sublanes (216 rows, last one is an ignored pad),
    # batch on lanes. Broadcast hoisted out of the term loop.
    theta_tb = jnp.broadcast_to(theta_ref[...], (t_steps, tb))   # (T, TB)

    neg_g = None
    for i in range(5):             # 5 Gaussian terms, unrolled at trace time
        d = theta_tb - th_p[i:i + 1, :]                          # (T, TB)
        # torch.fmod(d, 2*pi): remainder with truncation toward zero.
        # int32 round-trip = 2 VPU ops (vs floor/ceil/select).
        d = d - two_pi * (d * inv_two_pi).astype(jnp.int32).astype(jnp.float32)
        term = a_p[i:i + 1, :] * d * jnp.exp(d * d * neg_inv_2b2[i:i + 1, :])
        neg_g = -term if neg_g is None else neg_g - term         # (T, TB)

    # Whole Euler trajectory in ONE augmented MXU matmul (K = 224, 8-aligned):
    #   z = c0 + M_aug @ [ -G(t) ; v0_block ]
    # Concat offsets 0 and 216 are sublane-tile aligned.
    rhs = jnp.concatenate([neg_g, v0_ref[...]], axis=0)          # (T+8, TB)
    out_ref[...] = c0_ref[...] + jnp.dot(maug_ref[...], rhs,
                                         preferred_element_type=jnp.float32)


def _choose_batch_tiling(b):
    """Lane-dense batch padding + adaptive tile (up to 1024 lanes); keeps >= 2 grid
    steps when the batch allows so the "parallel" axis can shard across v7x's 2 TCs."""
    bp = max(TILE_MIN, ((b + TILE_MIN - 1) // TILE_MIN) * TILE_MIN)
    if bp == TILE_MIN:
        return bp, TILE_MIN
    for tile in (1024, 512, 256, 128):
        if tile <= TILE_MAX and tile <= bp // 2 and bp % tile == 0:
            return bp, tile
    return bp, TILE_MIN


@jax.jit
def learn_params_forward(x, v0, w, bias):
    """x: (B, 15), v0: (B,) initial z, w: (15, 15) (out, in), bias: (15,).
       Returns the generated ECG z-signal, shape (B, 216)."""
    B = x.shape[0]
    Bp, tile_b = _choose_batch_tiling(B)

    def pad_batch(a):
        if a.shape[0] == Bp:
            return a
        # Replicate row 0 so padded lanes stay finite (they are sliced off below).
        fill = jnp.broadcast_to(a[0:1], (Bp - a.shape[0],) + a.shape[1:])
        return jnp.concatenate([a, fill], axis=0)

    x_p = pad_batch(x.astype(jnp.float32))          # (Bp, 15)
    v0_p = pad_batch(v0.astype(jnp.float32))        # (Bp,)

    xT = jnp.transpose(x_p)                         # (15, Bp)
    # v0 block: 8 sublane rows (row 0 = v0, rows 1-7 = 0) so the in-kernel concat with
    # the 216-row Gaussian block is sublane-tile aligned; M_aug cols 217-223 are zero.
    v0_blk = jnp.concatenate([v0_p.reshape(1, Bp),
                              jnp.zeros((7, Bp), jnp.float32)], axis=0)   # (8, Bp)

    # Zero-pad Linear(15,15) to 24 output rows: groups at rows 0-4 / 8-12 / 16-20.
    w_f = w.astype(jnp.float32)
    b_f = bias.astype(jnp.float32)
    w24 = jnp.zeros((24, 15), jnp.float32)
    w24 = w24.at[0:5].set(w_f[0:5]).at[8:13].set(w_f[5:10]).at[16:21].set(w_f[10:15])
    b24 = jnp.zeros((24, 1), jnp.float32)
    b24 = b24.at[0:5, 0].set(b_f[0:5]).at[8:13, 0].set(b_f[5:10]).at[16:21, 0].set(b_f[10:15])

    theta = jnp.asarray(_THETA_NP)                  # (T, 1)    constant
    maug = jnp.asarray(_MAUG_NP)                    # (T, T+8)  constant
    c0 = jnp.asarray(_C0_NP)                        # (T, 1)    constant

    grid = (Bp // tile_b,)

    out_tb = pl.pallas_call(
        _learn_params_kernel,
        out_shape=jax.ShapeDtypeStruct((T_SAMPLES, Bp), jnp.float32),
        grid=grid,
        in_specs=[
            pl.BlockSpec((T_SAMPLES, 1), lambda b: (0, 0)),              # theta(t)
            pl.BlockSpec((T_SAMPLES, T_SAMPLES + 8), lambda b: (0, 0)),  # augmented propagator
            pl.BlockSpec((T_SAMPLES, 1), lambda b: (0, 0)),              # c0 = h*M1 @ z0
            pl.BlockSpec((15, tile_b), lambda b: (0, b)),                # x^T batch tile
            pl.BlockSpec((24, 15), lambda b: (0, 0)),                    # W (row-padded)
            pl.BlockSpec((24, 1), lambda b: (0, 0)),                     # bias (row-padded)
            pl.BlockSpec((8, tile_b), lambda b: (0, b)),                 # v0 block batch tile
        ],
        out_specs=pl.BlockSpec((T_SAMPLES, tile_b), lambda b: (0, b)),
        compiler_params=pltpu.CompilerParams(
            dimension_semantics=("parallel",)),      # batch tiles shard across v7x's 2 TCs
    )(theta, maug, c0, xT, w24, b24, v0_blk)

    # Module contract is (B, 216); this wrapper transpose is one extra XLA HBM pass.
    # Keep (T, Bp) inside the kernel for lane-dense unmasked stores.
    return jnp.transpose(out_tb[:, :B])


if __name__ == "__main__":
    key = jax.random.PRNGKey(0)
    k_x, k_v0, k_w, k_b = jax.random.split(key, 4)

    B = 4
    # Deterministic example inputs (small shapes implied by the module: features = 15).
    x = 0.1 * jax.random.normal(k_x, (B, 15), jnp.float32)
    v0 = 0.01 * jax.random.normal(k_v0, (B,), jnp.float32)

    # nn.Linear(15, 15) default-style init, deterministic from the PRNG key.
    bound = 1.0 / math.sqrt(15.0)
    w = jax.random.uniform(k_w, (15, 15), jnp.float32, -bound, bound)
    bias = jax.random.uniform(k_b, (15,), jnp.float32, -bound, bound)

    out = learn_params_forward(x, v0, w, bias)
    out = jax.block_until_ready(out)
    assert out.shape == (B, T_SAMPLES)
    assert bool(jnp.all(jnp.isfinite(out)))

    # Pure-numpy sequential-Euler reference (same math as the original PyTorch loop)
    # to validate the augmented-propagator-matmul reformulation.
    theta_ref_np, z0_ref_np = _precompute_phase()
    p = np.asarray(w) @ np.asarray(x).T + np.asarray(bias)[:, None]   # (15, B)
    a_np, b_np, th_np = p[0:5], p[5:10], p[10:15]
    z = np.asarray(v0).astype(np.float64).copy()
    ref_rows = [z.copy()]
    for n in range(T_SAMPLES - 1):
        d = theta_ref_np[n] - th_np
        d = d - TWO_PI * np.trunc(d / TWO_PI)          # torch.fmod semantics
        g = np.sum(a_np * d * np.exp(-(d * d) / (2.0 * b_np * b_np)), axis=0)
        z = (1.0 - H_STEP) * z + H_STEP * (z0_ref_np[n] - g)
        ref_rows.append(z.copy())
    ref = np.stack(ref_rows, axis=1)                   # (B, T)
    assert np.allclose(np.asarray(out), ref, atol=1e-4, rtol=1e-4)

    print("KERNEL_OK")
</pallas_src>

<mosaic_0001>
module attributes {stable_mosaic.version = 11 : i64} {
  func.func @_learn_params_kernel(%arg0: i32, %arg1: memref<216x1xf32, #tpu.memory_space<vmem>>, %arg2: memref<216x224xf32, #tpu.memory_space<vmem>>, %arg3: memref<216x1xf32, #tpu.memory_space<vmem>>, %arg4: memref<15x128xf32, #tpu.memory_space<vmem>>, %arg5: memref<24x15xf32, #tpu.memory_space<vmem>>, %arg6: memref<24x1xf32, #tpu.memory_space<vmem>>, %arg7: memref<8x128xf32, #tpu.memory_space<vmem>>, %arg8: memref<216x128xf32, #tpu.memory_space<vmem>>) attributes {dimension_semantics = [#tpu.dimension_semantics<parallel>], iteration_bounds = array<i64: 1>, scalar_prefetch = 0 : i64, scratch_operands = 0 : i64, tpu.core_type = #tpu.core_type<tc>, window_params = [{pipeline_mode = #tpu.pipeline_mode<synchronous>, transform_indices = @transform_0, window_bounds = array<i64: 216, 1>}, {pipeline_mode = #tpu.pipeline_mode<synchronous>, transform_indices = @transform_1, window_bounds = array<i64: 216, 224>}, {pipeline_mode = #tpu.pipeline_mode<synchronous>, transform_indices = @transform_2, window_bounds = array<i64: 216, 1>}, {transform_indices = @transform_3, window_bounds = array<i64: 15, 128>}, {pipeline_mode = #tpu.pipeline_mode<synchronous>, transform_indices = @transform_4, window_bounds = array<i64: 24, 15>}, {pipeline_mode = #tpu.pipeline_mode<synchronous>, transform_indices = @transform_5, window_bounds = array<i64: 24, 1>}, {transform_indices = @transform_6, window_bounds = array<i64: 8, 128>}, {transform_indices = @transform_7, window_bounds = array<i64: 216, 128>}]} {
    %c0 = arith.constant 0 : index
    %c0_0 = arith.constant 0 : index
    %0 = vector.load %arg5[%c0, %c0_0] : memref<24x15xf32, #tpu.memory_space<vmem>>, vector<24x15xf32>
    %c0_1 = arith.constant 0 : index
    %c0_2 = arith.constant 0 : index
    %1 = vector.load %arg4[%c0_1, %c0_2] : memref<15x128xf32, #tpu.memory_space<vmem>>, vector<15x128xf32>
    %cst = arith.constant dense<0.000000e+00> : vector<24x128xf32>
    %2 = tpu.matmul %0, %1, %cst {dimension_numbers = #tpu.dot_dimension_numbers<[1], [0], [0], [1], [0, 0, 1, 1], [], []>} : vector<24x15xf32>, vector<15x128xf32>, vector<24x128xf32> -> vector<24x128xf32>
    %c0_3 = arith.constant 0 : index
    %c0_4 = arith.constant 0 : index
    %3 = vector.load %arg6[%c0_3, %c0_4] : memref<24x1xf32, #tpu.memory_space<vmem>>, vector<24x1xf32>
    %4 = vector.broadcast %3 : vector<24x1xf32> to vector<24x128xf32>
    %5 = arith.addf %2, %4 : vector<24x128xf32>
    %6 = vector.extract_strided_slice %5 {offsets = [0, 0], sizes = [5, 128], strides = [1, 1]} : vector<24x128xf32> to vector<5x128xf32>
    %7 = vector.extract_strided_slice %5 {offsets = [8, 0], sizes = [5, 128], strides = [1, 1]} : vector<24x128xf32> to vector<5x128xf32>
    %8 = vector.extract_strided_slice %5 {offsets = [16, 0], sizes = [5, 128], strides = [1, 1]} : vector<24x128xf32> to vector<5x128xf32>
    %9 = arith.mulf %7, %7 : vector<5x128xf32>
    %cst_5 = arith.constant -5.000000e-01 : f32
    %10 = vector.broadcast %cst_5 : f32 to vector<5x128xf32>
    %11 = arith.divf %10, %9 : vector<5x128xf32>
    %c0_6 = arith.constant 0 : index
    %c0_7 = arith.constant 0 : index
    %12 = vector.load %arg1[%c0_6, %c0_7] : memref<216x1xf32, #tpu.memory_space<vmem>>, vector<216x1xf32>
    %13 = vector.shape_cast %12 : vector<216x1xf32> to vector<216x1xf32>
    %14 = vector.broadcast %13 : vector<216x1xf32> to vector<216x128xf32>
    %15 = vector.extract_strided_slice %8 {offsets = [0, 0], sizes = [1, 128], strides = [1, 1]} : vector<5x128xf32> to vector<1x128xf32>
    %16 = vector.broadcast %15 : vector<1x128xf32> to vector<216x128xf32>
    %17 = arith.subf %14, %16 : vector<216x128xf32>
    %cst_8 = arith.constant 0.159154937 : f32
    %18 = vector.broadcast %cst_8 : f32 to vector<216x128xf32>
    %19 = arith.mulf %17, %18 : vector<216x128xf32>
    %20 = arith.fptosi %19 : vector<216x128xf32> to vector<216x128xi32>
    %21 = arith.sitofp %20 : vector<216x128xi32> to vector<216x128xf32>
    %cst_9 = arith.constant 6.28318548 : f32
    %22 = vector.broadcast %cst_9 : f32 to vector<216x128xf32>
    %23 = arith.mulf %22, %21 : vector<216x128xf32>
    %24 = arith.subf %17, %23 : vector<216x128xf32>
    %25 = vector.extract_strided_slice %6 {offsets = [0, 0], sizes = [1, 128], strides = [1, 1]} : vector<5x128xf32> to vector<1x128xf32>
    %26 = vector.broadcast %25 : vector<1x128xf32> to vector<216x128xf32>
    %27 = arith.mulf %26, %24 : vector<216x128xf32>
    %28 = arith.mulf %24, %24 : vector<216x128xf32>
    %29 = vector.extract_strided_slice %11 {offsets = [0, 0], sizes = [1, 128], strides = [1, 1]} : vector<5x128xf32> to vector<1x128xf32>
    %30 = vector.broadcast %29 : vector<1x128xf32> to vector<216x128xf32>
    %31 = arith.mulf %28, %30 : vector<216x128xf32>
    %32 = math.exp %31 : vector<216x128xf32>
    %33 = arith.mulf %27, %32 : vector<216x128xf32>
    %cst_10 = arith.constant 0.000000e+00 : f32
    %34 = vector.broadcast %cst_10 : f32 to vector<216x128xf32>
    %35 = arith.subf %34, %33 : vector<216x128xf32>
    %36 = vector.extract_strided_slice %8 {offsets = [1, 0], sizes = [1, 128], strides = [1, 1]} : vector<5x128xf32> to vector<1x128xf32>
    %37 = vector.broadcast %36 : vector<1x128xf32> to vector<216x128xf32>
    %38 = arith.subf %14, %37 : vector<216x128xf32>
    %cst_11 = arith.constant 0.159154937 : f32
    %39 = vector.broadcast %cst_11 : f32 to vector<216x128xf32>
    %40 = arith.mulf %38, %39 : vector<216x128xf32>
    %41 = arith.fptosi %40 : vector<216x128xf32> to vector<216x128xi32>
    %42 = arith.sitofp %41 : vector<216x128xi32> to vector<216x128xf32>
    %cst_12 = arith.constant 6.28318548 : f32
    %43 = vector.broadcast %cst_12 : f32 to vector<216x128xf32>
    %44 = arith.mulf %43, %42 : vector<216x128xf32>
    %45 = arith.subf %38, %44 : vector<216x128xf32>
    %46 = vector.extract_strided_slice %6 {offsets = [1, 0], sizes = [1, 128], strides = [1, 1]} : vector<5x128xf32> to vector<1x128xf32>
    %47 = vector.broadcast %46 : vector<1x128xf32> to vector<216x128xf32>
    %48 = arith.mulf %47, %45 : vector<216x128xf32>
    %49 = arith.mulf %45, %45 : vector<216x128xf32>
    %50 = vector.extract_strided_slice %11 {offsets = [1, 0], sizes = [1, 128], strides = [1, 1]} : vector<5x128xf32> to vector<1x128xf32>
    %51 = vector.broadcast %50 : vector<1x128xf32> to vector<216x128xf32>
    %52 = arith.mulf %49, %51 : vector<216x128xf32>
    %53 = math.exp %52 : vector<216x128xf32>
    %54 = arith.mulf %48, %53 : vector<216x128xf32>
    %55 = arith.subf %35, %54 : vector<216x128xf32>
    %56 = vector.extract_strided_slice %8 {offsets = [2, 0], sizes = [1, 128], strides = [1, 1]} : vector<5x128xf32> to vector<1x128xf32>
    %57 = vector.broadcast %56 : vector<1x128xf32> to vector<216x128xf32>
    %58 = arith.subf %14, %57 : vector<216x128xf32>
    %cst_13 = arith.constant 0.159154937 : f32
    %59 = vector.broadcast %cst_13 : f32 to vector<216x128xf32>
    %60 = arith.mulf %58, %59 : vector<216x128xf32>
    %61 = arith.fptosi %60 : vector<216x128xf32> to vector<216x128xi32>
    %62 = arith.sitofp %61 : vector<216x128xi32> to vector<216x128xf32>
    %cst_14 = arith.constant 6.28318548 : f32
    %63 = vector.broadcast %cst_14 : f32 to vector<216x128xf32>
    %64 = arith.mulf %63, %62 : vector<216x128xf32>
    %65 = arith.subf %58, %64 : vector<216x128xf32>
    %66 = vector.extract_strided_slice %6 {offsets = [2, 0], sizes = [1, 128], strides = [1, 1]} : vector<5x128xf32> to vector<1x128xf32>
    %67 = vector.broadcast %66 : vector<1x128xf32> to vector<216x128xf32>
    %68 = arith.mulf %67, %65 : vector<216x128xf32>
    %69 = arith.mulf %65, %65 : vector<216x128xf32>
    %70 = vector.extract_strided_slice %11 {offsets = [2, 0], sizes = [1, 128], strides = [1, 1]} : vector<5x128xf32> to vector<1x128xf32>
    %71 = vector.broadcast %70 : vector<1x128xf32> to vector<216x128xf32>
    %72 = arith.mulf %69, %71 : vector<216x128xf32>
    %73 = math.exp %72 : vector<216x128xf32>
    %74 = arith.mulf %68, %73 : vector<216x128xf32>
    %75 = arith.subf %55, %74 : vector<216x128xf32>
    %76 = vector.extract_strided_slice %8 {offsets = [3, 0], sizes = [1, 128], strides = [1, 1]} : vector<5x128xf32> to vector<1x128xf32>
    %77 = vector.broadcast %76 : vector<1x128xf32> to vector<216x128xf32>
    %78 = arith.subf %14, %77 : vector<216x128xf32>
    %cst_15 = arith.constant 0.159154937 : f32
    %79 = vector.broadcast %cst_15 : f32 to vector<216x128xf32>
    %80 = arith.mulf %78, %79 : vector<216x128xf32>
    %81 = arith.fptosi %80 : vector<216x128xf32> to vector<216x128xi32>
    %82 = arith.sitofp %81 : vector<216x128xi32> to vector<216x128xf32>
    %cst_16 = arith.constant 6.28318548 : f32
    %83 = vector.broadcast %cst_16 : f32 to vector<216x128xf32>
    %84 = arith.mulf %83, %82 : vector<216x128xf32>
    %85 = arith.subf %78, %84 : vector<216x128xf32>
    %86 = vector.extract_strided_slice %6 {offsets = [3, 0], sizes = [1, 128], strides = [1, 1]} : vector<5x128xf32> to vector<1x128xf32>
    %87 = vector.broadcast %86 : vector<1x128xf32> to vector<216x128xf32>
    %88 = arith.mulf %87, %85 : vector<216x128xf32>
    %89 = arith.mulf %85, %85 : vector<216x128xf32>
    %90 = vector.extract_strided_slice %11 {offsets = [3, 0], sizes = [1, 128], strides = [1, 1]} : vector<5x128xf32> to vector<1x128xf32>
    %91 = vector.broadcast %90 : vector<1x128xf32> to vector<216x128xf32>
    %92 = arith.mulf %89, %91 : vector<216x128xf32>
    %93 = math.exp %92 : vector<216x128xf32>
    %94 = arith.mulf %88, %93 : vector<216x128xf32>
    %95 = arith.subf %75, %94 : vector<216x128xf32>
    %96 = vector.extract_strided_slice %8 {offsets = [4, 0], sizes = [1, 128], strides = [1, 1]} : vector<5x128xf32> to vector<1x128xf32>
    %97 = vector.broadcast %96 : vector<1x128xf32> to vector<216x128xf32>
    %98 = arith.subf %14, %97 : vector<216x128xf32>
    %cst_17 = arith.constant 0.159154937 : f32
    %99 = vector.broadcast %cst_17 : f32 to vector<216x128xf32>
    %100 = arith.mulf %98, %99 : vector<216x128xf32>
    %101 = arith.fptosi %100 : vector<216x128xf32> to vector<216x128xi32>
    %102 = arith.sitofp %101 : vector<216x128xi32> to vector<216x128xf32>
    %cst_18 = arith.constant 6.28318548 : f32
    %103 = vector.broadcast %cst_18 : f32 to vector<216x128xf32>
    %104 = arith.mulf %103, %102 : vector<216x128xf32>
    %105 = arith.subf %98, %104 : vector<216x128xf32>
    %106 = vector.extract_strided_slice %6 {offsets = [4, 0], sizes = [1, 128], strides = [1, 1]} : vector<5x128xf32> to vector<1x128xf32>
    %107 = vector.broadcast %106 : vector<1x128xf32> to vector<216x128xf32>
    %108 = arith.mulf %107, %105 : vector<216x128xf32>
    %109 = arith.mulf %105, %105 : vector<216x128xf32>
    %110 = vector.extract_strided_slice %11 {offsets = [4, 0], sizes = [1, 128], strides = [1, 1]} : vector<5x128xf32> to vector<1x128xf32>
    %111 = vector.broadcast %110 : vector<1x128xf32> to vector<216x128xf32>
    %112 = arith.mulf %109, %111 : vector<216x128xf32>
    %113 = math.exp %112 : vector<216x128xf32>
    %114 = arith.mulf %108, %113 : vector<216x128xf32>
    %115 = arith.subf %95, %114 : vector<216x128xf32>
    %c0_19 = arith.constant 0 : index
    %c0_20 = arith.constant 0 : index
    %116 = vector.load %arg7[%c0_19, %c0_20] : memref<8x128xf32, #tpu.memory_space<vmem>>, vector<8x128xf32>
    %117 = tpu.concatenate %115, %116 in 0 : vector<216x128xf32>, vector<8x128xf32> -> vector<224x128xf32>
    %c0_21 = arith.constant 0 : index
    %c0_22 = arith.constant 0 : index
    %118 = vector.load %arg3[%c0_21, %c0_22] : memref<216x1xf32, #tpu.memory_space<vmem>>, vector<216x1xf32>
    %c0_23 = arith.constant 0 : index
    %c0_24 = arith.constant 0 : index
    %119 = vector.load %arg2[%c0_23, %c0_24] : memref<216x224xf32, #tpu.memory_space<vmem>>, vector<216x224xf32>
    %cst_25 = arith.constant dense<0.000000e+00> : vector<216x128xf32>
    %120 = tpu.matmul %119, %117, %cst_25 {dimension_numbers = #tpu.dot_dimension_numbers<[1], [0], [0], [1], [0, 0, 1, 1], [], []>} : vector<216x224xf32>, vector<224x128xf32>, vector<216x128xf32> -> vector<216x128xf32>
    %121 = vector.broadcast %118 : vector<216x1xf32> to vector<216x128xf32>
    %122 = arith.addf %121, %120 : vector<216x128xf32>
    %c0_26 = arith.constant 0 : index
    %c0_27 = arith.constant 0 : index
    %123 = vector.load %arg8[%c0_26, %c0_27] : memref<216x128xf32, #tpu.memory_space<vmem>>, vector<216x128xf32>
    tpu.vector_store %arg8[%c0_26, %c0_27], %122 {strides = array<i32>} : memref<216x128xf32, #tpu.memory_space<vmem>>, vector<216x128xf32>,
    return
  }
  func.func @transform_0(%arg0: i32) -> (i32, i32) {
    %c0_i32 = arith.constant 0 : i32
    %c0_i32_0 = arith.constant 0 : i32
    %c0_i32_1 = arith.constant 0 : i32
    return %c0_i32, %c0_i32_0 : i32, i32
  }
  func.func @transform_1(%arg0: i32) -> (i32, i32) {
    %c0_i32 = arith.constant 0 : i32
    %c0_i32_0 = arith.constant 0 : i32
    %c0_i32_1 = arith.constant 0 : i32
    return %c0_i32, %c0_i32_0 : i32, i32
  }
  func.func @transform_2(%arg0: i32) -> (i32, i32) {
    %c0_i32 = arith.constant 0 : i32
    %c0_i32_0 = arith.constant 0 : i32
    %c0_i32_1 = arith.constant 0 : i32
    return %c0_i32, %c0_i32_0 : i32, i32
  }
  func.func @transform_3(%arg0: i32) -> (i32, i32) {
    %c0_i32 = arith.constant 0 : i32
    %c0_i32_0 = arith.constant 0 : i32
    return %c0_i32, %arg0 : i32, i32
  }
  func.func @transform_4(%arg0: i32) -> (i32, i32) {
    %c0_i32 = arith.constant 0 : i32
    %c0_i32_0 = arith.constant 0 : i32
    %c0_i32_1 = arith.constant 0 : i32
    return %c0_i32, %c0_i32_0 : i32, i32
  }
  func.func @transform_5(%arg0: i32) -> (i32, i32) {
    %c0_i32 = arith.constant 0 : i32
    %c0_i32_0 = arith.constant 0 : i32
    %c0_i32_1 = arith.constant 0 : i32
    return %c0_i32, %c0_i32_0 : i32, i32
  }
  func.func @transform_6(%arg0: i32) -> (i32, i32) {
    %c0_i32 = arith.constant 0 : i32
    %c0_i32_0 = arith.constant 0 : i32
    return %c0_i32, %arg0 : i32, i32
  }
  func.func @transform_7(%arg0: i32) -> (i32, i32) {
    %c0_i32 = arith.constant 0 : i32
    %c0_i32_0 = arith.constant 0 : i32
    return %c0_i32, %arg0 : i32, i32
  }
}

</mosaic_0001>

<bundles_post_ra>
// kernel: learn_params_forward.1
= control target key start
LH: loop header
LB: loop body
LE: loop exit
PB: predicated region body
PF: predicated region fallthrough
CT: control target
= control target key end

     0   :  { %12 = vsyncpa [#allocation3], 0  ;;  %s4871_s0 = inlined_call_operand.hbm [shape: f32[216,1], index: 0, kind: input, shape index: {}]   ;;  %s4872_s1 = inlined_call_operand.hbm [shape: f32[216,224], index: 1, kind: input, shape index: {}]   ;;  %s4873_s2 = inlined_call_operand.vmem [shape: f32[216,1], index: 2, kind: input, shape index: {}]   ;;  %s4874_s3 = inlined_call_operand.vmem [shape: f32[15,128], index: 3, kind: input, shape index: {}]   ;;  %s4875_s4 = inlined_call_operand.vmem [shape: f32[24,15], index: 4, kind: input, shape index: {}]   ;;  %s4876_s5 = inlined_call_operand.vmem [shape: f32[24,1], index: 5, kind: input, shape index: {}]   ;;  %s4877_s6 = inlined_call_operand.vmem [shape: f32[8,128], index: 6, kind: input, shape index: {}]   ;;  %s4878_s7 = inlined_call_operand.vmem [shape: f32[216,128], index: 7, kind: output, shape index: {}]  }
   0x1   :  { %13 = vsyncpa [#allocation5], 0  ;;  %s3436_s24 = smov [#allocation2]   ;;  %s3388_s28 = scalar_lea.hbm %s4871_s0, 3456 }
   0x2   :  { %s19_s25 = sshll.u32 %s3436_s24, 4  ;;  %p3389_p0 = scmp.ne.s32.totalorder %s4871_s0, %s3388_s28  ;;  %s20_s25 = int_to_ptr.vmem [resolvable:$true] %s19_s25 }
   0x3   :  { %p3392_p1 = scmp.lt.u32.totalorder %s3388_s28, %s4871_s0 }
   0x5   :  { %p3394_p2 = pnand %p3392_p1, %p3389_p0 }
   0x7   :  { %3397 = shalt.err (!%p3394_p2)
}
   0x8   :  { %s3398_s10 = scalar_lea.vmem %s20_s25, 3456  ;;  %p3403_p4 = scmp.lt.s32.totalorder %s20_s25, %s20_s25 }
   0x9   :  { %p3399_p3 = scmp.ne.s32.totalorder %s20_s25, %s3398_s10  ;;  %p3404_p5 = scmp.lt.s32.totalorder %s3398_s10, %s3398_s10 }
   0xb   :  { %p3405_p6 = por %p3404_p5, %p3403_p4 }
   0xd   :  { %p3406_p7 = pnand %p3405_p6, %p3399_p3 }
   0xf   :  { %3409 = shalt.err (!%p3406_p7)
}
  0x10   :  { %s3437_s11 = smov 128   ;;  %s3438_s12 = smov 8  }
  0x11   :  { %25 = dma.hbm_to_vmem [thread:$0]  %s4871_s0, 3456, %s20_s25, [#allocation3], %s3437_s11, %s3437_s11, %s3438_s12  }
  0x12   :  { %s3439_s15 = smov [#allocation4]   ;;  %s3410_s19 = scalar_lea.hbm %s4872_s1, 6912 }
  0x13   :  { %s31_s16 = sshll.u32 %s3439_s15, 4  ;;  %p3411_p8 = scmp.ne.s32.totalorder %s4872_s1, %s3410_s19  ;;  %s32_s16 = int_to_ptr.vmem [resolvable:$true] %s31_s16 }
  0x14   :  { %p3414_p9 = scmp.lt.u32.totalorder %s3410_s19, %s4872_s1 }
  0x16   :  { %p3416_p10 = pnand %p3414_p9, %p3411_p8 }
  0x18   :  { %3419 = shalt.err (!%p3416_p10)
}
  0x19   :  { %s3420_s24 = scalar_lea.vmem %s32_s16, 6912  ;;  %p3425_p12 = scmp.lt.s32.totalorder %s32_s16, %s32_s16 }
  0x1a   :  { %p3421_p11 = scmp.ne.s32.totalorder %s32_s16, %s3420_s24  ;;  %p3426_p13 = scmp.lt.s32.totalorder %s3420_s24, %s3420_s24 }
  0x1c   :  { %p3427_p0 = por %p3426_p13, %p3425_p12 }
  0x1e   :  { %p3428_p1 = pnand %p3427_p0, %p3421_p11 }
  0x20   :  { %3431 = shalt.err (!%p3428_p1)
}
  0x21   :  { %s3440_s0 = smov 256   ;;  %s3441_s25 = smov 16  }
  0x22   :  { %37 = dma.hbm_to_vmem [thread:$0]  %s4872_s1, 6912, %s32_s16, [#allocation5], %s3440_s0, %s3440_s0, %s3441_s25  }
  0x23   :  { %3432 = dma.done.wait [#allocation3], 3456  }
  0x24   :  { %3433 = vsyncadd [#allocation3], 4294963840 }
  0x25   :  { %3434 = dma.done.wait [#allocation5], 6912  }
  0x26   :  { %3435 = vsyncadd [#allocation5], 4294960384  ;;  %v3442_v0 = vmov 0   ;;  %v3443_v1 = vmov 0.0|0.0   ;;  %vm3444_vm0 = vmmov 0   ;;  %v3445_v2 = vmov 0.0  }
  0x27   :  { %3115 = vset.pattern.permute.xlu1 %v3442_v0  ;;  %3114 = vset.pattern.permute.xlu0 %v3442_v0  ;;  %vm87_vm1 = vcmask 1046528   ;;  %v174_v3 = vld [vmem:[#allocation2] sm:$0xff]  ;;  %v61_v4 = vld [vmem:[%s4876_s5 + $0x10] sm:$0xff]  ;;  %v58_v6 = vld [vmem:[%s4874_s3 + $0x8] sm:$0x7f]  ;;  %vm3446_vm2 = vmmov 1  }
  0x28   :  { %2759 = vmatprep.subr.bf16.mxu0 %v3443_v1  ;;  %2750 = vmatprep.mubr.msk.f32.mxu0 %vm3444_vm0, %v3445_v2  ;;  %v57_v5 = vld [vmem:[%s4874_s3] sm:$0xff]  ;;  %vm2761_vm3 = vmpackc.low %vm87_vm1, %vm3446_vm2  ;;  %v175_v8 = vld [vmem:[#allocation2 + $0x8] sm:$0xff]  ;;  %vm77_vm4 = vcmask 121856   ;;  %vm2233_vm5 = vcmask 785408  }
  0x29   :  { %2805 = vmatprep.subr.bf16.mxu1 %v3443_v1  ;;  %203 = vperm.xlu1 %3115, %v174_v3   ;;  %v2760_v7 = vpack.c.bf16 %v58_v6, %v57_v5  ;;  %v60_v9 = vld [vmem:[%s4876_s5 + $0x8] sm:$0xff]  ;;  %v54_v10 = vld [vmem:[%s4875_s4] sm:$0xff]  ;;  %v177_v11 = vld [vmem:[#allocation2 + $0x18] sm:$0xff] }
  0x2a   :  { %74 = vperm.xlu0 %3114, %v61_v4   ;;  %v176_v12 = vld [vmem:[#allocation2 + $0x10] sm:$0xff]  ;;  %v55_v13 = vld [vmem:[%s4875_s4 + $0x8] sm:$0xff]  ;;  %v178_v15 = vld [vmem:[#allocation2 + $0x20] sm:$0xff] }
  0x2b   :  { %2762 = vmatpush3.bf16.msk.msra.mxu0 %vm2761_vm3, %v2760_v7  ;;  %v179_v14 = vld [vmem:[#allocation2 + $0x28] sm:$0xff]  ;;  %v56_v16 = vld [vmem:[%s4875_s4 + $0x10] sm:$0xff]  ;;  %v181_v17 = vld [vmem:[#allocation2 + $0x38] sm:$0xff] }
  0x2c   :  { %2763 = vmatprep.subr.bf16.mxu0 %v3443_v1  ;;  %v180_v18 = vld [vmem:[#allocation2 + $0x30] sm:$0xff]  ;;  %v183_v19 = vld [vmem:[#allocation2 + $0x48] sm:$0xff]  ;;  %v182_v20 = vld [vmem:[#allocation2 + $0x40] sm:$0xff] }
  0x2d   :  { %208 = vperm.xlu1 %3115, %v175_v8   ;;  %v185_v21 = vld [vmem:[#allocation2 + $0x58] sm:$0xff]  ;;  %v184_v22 = vld [vmem:[#allocation2 + $0x50] sm:$0xff]  ;;  %v187_v23 = vld [vmem:[#allocation2 + $0x68] sm:$0xff] }
  0x2e   :  { %69 = vperm.xlu0 %3114, %v60_v9   ;;  %2751 = vmatmul.mubr.msk.f32.vlgmr.msra.gmra.mrb[0].mxu0 %vm77_vm4, %v54_v10  ;;  %v186_v24 = vld [vmem:[#allocation2 + $0x60] sm:$0xff]  ;;  %v188_v25 = vld [vmem:[#allocation2 + $0x70] sm:$0xff]  ;;  %v189_v28 = vld [vmem:[#allocation2 + $0x78] sm:$0xff] }
  0x2f   :  { %2753 = vmatprep.mubr.msk.f32.mxu0 %vm3444_vm0, %v3445_v2  ;;  %v59_v26 = vld [vmem:[%s4876_s5] sm:$0xff]  ;;  %v192_v29 = vld [vmem:[#allocation2 + $0x90] sm:$0xff]  ;;  %v191_v30 = vld [vmem:[#allocation2 + $0x88] sm:$0xff] }
  0x30   :  { %v190_v27 = vld [vmem:[#allocation2 + $0x80] sm:$0xff]  ;;  %v193_v32 = vld [vmem:[#allocation2 + $0x98] sm:$0xff]  ;;  %v196_v33 = vld [vmem:[#allocation2 + $0xb0] sm:$0xff] }
  0x31   :  { %218 = vperm.xlu1 %3115, %v177_v11   ;;  %v194_v31 = vld [vmem:[#allocation2 + $0xa0] sm:$0xff]  ;;  %v195_v34 = vld [vmem:[#allocation2 + $0xa8] sm:$0xff]  ;;  %v197_v36 = vld [vmem:[#allocation2 + $0xb8] sm:$0xff]  ;;  %v336_v11 = vlaneseq }
  0x32   :  { %213 = vperm.xlu0 %3114, %v176_v12   ;;  %2754 = vmatmul.mubr.msk.f32.gmra.mrb[2].mxu0 %vm77_vm4, %v55_v13  ;;  %v198_v35 = vld [vmem:[#allocation2 + $0xc0] sm:$0xff]  ;;  %v200_v37 = vld [vmem:[#allocation2 + $0xd0] sm:$0xff]  ;;  %v199_v38 = vld [vmem:[#allocation2 + $0xc8] sm:$0xff] }
  0x33   :  { %2756 = vmatprep.mubr.msk.f32.mxu0 %vm3444_vm0, %v3445_v2  ;;  %v2153_v39 = vld [vmem:[%s4873_s2 + $0x8] sm:$0xff]  ;;  %v2152_v40 = vld [vmem:[%s4873_s2] sm:$0xff]  ;;  %v2155_v41 = vld [vmem:[%s4873_s2 + $0x18] sm:$0xff] }
  0x34   :  { %v2154_v42 = vld [vmem:[%s4873_s2 + $0x10] sm:$0xff]  ;;  %v2157_v43 = vld [vmem:[%s4873_s2 + $0x28] sm:$0xff]  ;;  %v2156_v44 = vld [vmem:[%s4873_s2 + $0x20] sm:$0xff] }
  0x35   :  { %228 = vperm.xlu1 %3115, %v179_v14   ;;  %v2159_v45 = vld [vmem:[%s4873_s2 + $0x38] sm:$0xff]  ;;  %v2158_v46 = vld [vmem:[%s4873_s2 + $0x30] sm:$0xff]  ;;  %v2161_v47 = vld [vmem:[%s4873_s2 + $0x48] sm:$0xff]  ;;  %v337_v14 = vshrl.u32 %v336_v11, 7 }
  0x36   :  { %223 = vperm.xlu0 %3114, %v178_v15   ;;  %2757 = vmatmul.mubr.msk.f32.gmra.mrb[4].mxu0 %vm77_vm4, %v56_v16  ;;  %v2160_v48 = vld [vmem:[%s4873_s2 + $0x40] sm:$0xff]  ;;  %v2163_v49 = vld [vmem:[%s4873_s2 + $0x58] sm:$0xff]  ;;  %v2162_v50 = vld [vmem:[%s4873_s2 + $0x50] sm:$0xff] }
  0x37   :  { %v2165_v51 = vld [vmem:[%s4873_s2 + $0x68] sm:$0xff]  ;;  %v2164_v52 = vld [vmem:[%s4873_s2 + $0x60] sm:$0xff]  ;;  %v2167_v53 = vld [vmem:[%s4873_s2 + $0x78] sm:$0xff] }
  0x38   :  { %v2166_v54 = vld [vmem:[%s4873_s2 + $0x70] sm:$0xff]  ;;  %v2169_v55 = vld [vmem:[%s4873_s2 + $0x88] sm:$0xff]  ;;  %v2168_v56 = vld [vmem:[%s4873_s2 + $0x80] sm:$0xff] }
  0x39   :  { %238 = vperm.xlu1 %3115, %v181_v17   ;;  %v2171_v57 = vld [vmem:[%s4873_s2 + $0x98] sm:$0xff]  ;;  %v2170_v58 = vld [vmem:[%s4873_s2 + $0x90] sm:$0xff]  ;;  %v2173_v59 = vld [vmem:[%s4873_s2 + $0xa8] sm:$0xff] }
  0x3a   :  { %233 = vperm.xlu0 %3114, %v180_v18   ;;  %v2172_v60 = vld [vmem:[%s4873_s2 + $0xa0] sm:$0xff]  ;;  %v2175_v61 = vld [vmem:[%s4873_s2 + $0xb8] sm:$0xff]  ;;  %v2174_v62 = vld [vmem:[%s4873_s2 + $0xb0] sm:$0xff] }
  0x3b   :  { %v2177_v63 = vld [vmem:[%s4873_s2 + $0xc8] sm:$0xff]  ;;  %v2176_v0 = vld [vmem:[%s4873_s2 + $0xc0] sm:$0xff]  ;;  %v2178_v2 = vld [vmem:[%s4873_s2 + $0xd0] sm:$0xff] }
  0x3d   :  { %248 = vperm.xlu1 %3115, %v183_v19  }
  0x3e   :  { %243 = vperm.xlu0 %3114, %v182_v20  }
  0x41   :  { %258 = vperm.xlu1 %3115, %v185_v21  }
  0x42   :  { %253 = vperm.xlu0 %3114, %v184_v22   ;;  %v338_v22 = vsub.s32 0, %v337_v14 }
  0x45   :  { %268 = vperm.xlu1 %3115, %v187_v23   ;;  %v701_v23 = vsub.s32 1, %v337_v14 }
  0x46   :  { %263 = vperm.xlu0 %3114, %v186_v24   ;;  %v3637_v24 = vsub.s32 2, %v337_v14 }
  0x49   :  { %273 = vperm.xlu1 %3115, %v188_v25  }
  0x4a   :  { %64 = vperm.xlu0 %3114, %v59_v26   ;;  %v3639_v26 = vsub.s32 3, %v337_v14 }
  0x4d   :  { %283 = vperm.xlu1 %3115, %v190_v27  }
  0x4e   :  { %278 = vperm.xlu0 %3114, %v189_v28  }
  0x51   :  { %293 = vperm.xlu1 %3115, %v192_v29  }
  0x52   :  { %288 = vperm.xlu0 %3114, %v191_v30  }
  0x55   :  { %303 = vperm.xlu1 %3115, %v194_v31  }
  0x56   :  { %298 = vperm.xlu0 %3114, %v193_v32  }
  0x59   :  { %313 = vperm.xlu1 %3115, %v196_v33  }
  0x5a   :  { %308 = vperm.xlu0 %3114, %v195_v34  }
  0x5d   :  { %323 = vperm.xlu1 %3115, %v198_v35  }
  0x5e   :  { %318 = vperm.xlu0 %3114, %v197_v36  }
  0x61   :  { %333 = vperm.xlu1 %3115, %v200_v37   ;;  %v1790_v37 = vsub.s32 4, %v337_v14 }
  0x62   :  { %328 = vperm.xlu0 %3114, %v199_v38  }
  0x65   :  { %2522 = vperm.xlu1 %3115, %v2153_v39  }
  0x66   :  { %2517 = vperm.xlu0 %3114, %v2152_v40  }
  0x69   :  { %2532 = vperm.xlu1 %3115, %v2155_v41  }
  0x6a   :  { %2527 = vperm.xlu0 %3114, %v2154_v42  }
  0x6d   :  { %2542 = vperm.xlu1 %3115, %v2157_v43  }
  0x6e   :  { %2537 = vperm.xlu0 %3114, %v2156_v44  }
  0x71   :  { %2552 = vperm.xlu1 %3115, %v2159_v45  }
  0x72   :  { %2547 = vperm.xlu0 %3114, %v2158_v46  }
  0x75   :  { %2562 = vperm.xlu1 %3115, %v2161_v47  }
  0x76   :  { %2557 = vperm.xlu0 %3114, %v2160_v48  }
  0x79   :  { %2572 = vperm.xlu1 %3115, %v2163_v49  }
  0x7a   :  { %2567 = vperm.xlu0 %3114, %v2162_v50  }
  0x7d   :  { %2582 = vperm.xlu1 %3115, %v2165_v51  }
  0x7e   :  { %2577 = vperm.xlu0 %3114, %v2164_v52  }
  0x81   :  { %2592 = vperm.xlu1 %3115, %v2167_v53  }
  0x82   :  { %2587 = vperm.xlu0 %3114, %v2166_v54  }
  0x85   :  { %2602 = vperm.xlu1 %3115, %v2169_v55  }
  0x86   :  { %2597 = vperm.xlu0 %3114, %v2168_v56  }
  0x89   :  { %2612 = vperm.xlu1 %3115, %v2171_v57  }
  0x8a   :  { %2607 = vperm.xlu0 %3114, %v2170_v58  }
  0x8d   :  { %2622 = vperm.xlu1 %3115, %v2173_v59  }
  0x8e   :  { %2617 = vperm.xlu0 %3114, %v2172_v60  }
  0x91   :  { %2632 = vperm.xlu1 %3115, %v2175_v61  }
  0x92   :  { %2627 = vperm.xlu0 %3114, %v2174_v62  }
  0x95   :  { %2642 = vperm.xlu1 %3115, %v2177_v63  }
  0x96   :  { %2637 = vperm.xlu0 %3114, %v2176_v0  }
  0x9a   :  { %2647 = vperm.xlu0 %3114, %v2178_v2  }
  0xa8   :  { %v204_v18 = vpop.permute.xlu1 %203 }
  0xa9   :  { %v75_v3 = vpop.permute.xlu0 %74 }
  0xac   :  { %v209_v33 = vpop.permute.xlu1 %208 }
  0xad   :  { %v70_v4 = vpop.permute.xlu0 %69 }
  0xb1   :  { %v3625_v5 = vpop.permute.xlu0 %213 }
  0xb5   :  { %v3627_v6 = vpop.permute.xlu0 %223 }
  0xb9   :  { %v3629_v7 = vpop.permute.xlu0 %233 }
  0xbd   :  { %v3631_v8 = vpop.permute.xlu0 %243 }
  0xc1   :  { %v3633_v9 = vpop.permute.xlu0 %253 }
  0xc5   :  { %v3635_v12 = vpop.permute.xlu0 %263 }
  0xc9   :  { %v65_v19 = vpop.permute.xlu0 %64 }
 0x101   :  { %v157_v10 = vpop.f32.mrb[0].mxu0 }
 0x102   :  { %v2752_v13 = vpop.f32.mrb[1].mxu0  ;;  %v158_v21 = vadd.f32 %v157_v10, %v65_v19 }
 0x104   :  { %v3651_v34 = vrot.slane %v158_v21, %v338_v22  ;;  %v3653_v35 = vrot.slane %v158_v21, %v701_v23  ;;  %v3656_v36 = vrot.slane %v158_v21, %v3637_v24  ;;  %v3671_v46 = vrot.slane %v158_v21, %v3639_v26 }
 0x105   :  { %v162_v15 = vpop.f32.mrb[2].mxu0  ;;  %v3677_v14 = vrot.slane %v158_v21, %v1790_v37 }
 0x106   :  { %v163_v16 = vadd.f32 %v162_v15, %v70_v4  ;;  %v2755_v17 = vpop.f32.mrb[3].mxu0 }
 0x108   :  { %v171_v20 = vmul.f32 %v163_v16, %v163_v16 }
 0x109   :  { %v167_v25 = vpop.f32.mrb[4].mxu0 }
 0x10a   :  { %3116 = vrcp.f32 %v171_v20  ;;  %v168_v27 = vadd.f32 %v167_v25, %v75_v3  ;;  %v2758_v28 = vpop.f32.mrb[5].mxu0 }
 0x10c   :  { %v3641_v29 = vrot.slane %v168_v27, %v338_v22  ;;  %v3643_v30 = vrot.slane %v168_v27, %v701_v23  ;;  %v3646_v31 = vrot.slane %v168_v27, %v3637_v24  ;;  %v3649_v32 = vrot.slane %v168_v27, %v3639_v26 }
 0x10d   :  { %v3673_v50 = vrot.slane %v168_v27, %v1790_v37 }
 0x10e   :  { %v340_v38 = vsub.f32 %v204_v18, %v3641_v29  ;;  %v341_v39 = vsub.f32 %v209_v33, %v3641_v29  ;;  %v703_v40 = vsub.f32 %v204_v18, %v3643_v30  ;;  %v704_v41 = vsub.f32 %v209_v33, %v3643_v30 }
 0x10f   :  { %v1066_v42 = vsub.f32 %v204_v18, %v3646_v31  ;;  %v1067_v43 = vsub.f32 %v209_v33, %v3646_v31  ;;  %v3665_v44 = vsub.f32 %v204_v18, %v3649_v32  ;;  %v3668_v45 = vsub.f32 %v209_v33, %v3649_v32 }
 0x110   :  { %v367_v47 = vmul.f32 0.15915494, %v340_v38  ;;  %v368_v48 = vmul.f32 0.15915494, %v341_v39  ;;  %v730_v49 = vmul.f32 0.15915494, %v703_v40  ;;  %v3682_v25 = vsub.f32 %v204_v18, %v3673_v50 }
 0x111   :  { %v731_v51 = vmul.f32 0.15915494, %v704_v41  ;;  %v1093_v52 = vmul.f32 0.15915494, %v1066_v42  ;;  %v1094_v53 = vmul.f32 0.15915494, %v1067_v43  ;;  %v3685_v27 = vsub.f32 %v209_v33, %v3673_v50 }
 0x112   :  { %v2833_v54 = vtrunc.f32 %v367_v47  ;;  %v2835_v55 = vtrunc.f32 %v368_v48  ;;  %v2887_v56 = vtrunc.f32 %v730_v49  ;;  %v1456_v57 = vmul.f32 0.15915494, %v3665_v44 }
 0x113   :  { %v2889_v58 = vtrunc.f32 %v731_v51  ;;  %v2941_v59 = vtrunc.f32 %v1093_v52  ;;  %v2943_v60 = vtrunc.f32 %v1094_v53  ;;  %v1457_v61 = vmul.f32 0.15915494, %v3668_v45 }
 0x114   :  { %v3117_v62 = vpop.eup %3116  ;;  %v2834_v63 = vcvt.f32.s32 %v2833_v54  ;;  %v2836_v0 = vcvt.f32.s32 %v2835_v55  ;;  %v2888_v2 = vcvt.f32.s32 %v2887_v56  ;;  %v2995_v3 = vtrunc.f32 %v1456_v57 }
 0x115   :  { %v173_v4 = vmul.f32 -0.5, %v3117_v62  ;;  %v2890_v10 = vcvt.f32.s32 %v2889_v58  ;;  %v2942_v11 = vcvt.f32.s32 %v2941_v59  ;;  %v2944_v13 = vcvt.f32.s32 %v2943_v60 }
 0x116   :  { %v421_v15 = vcvt.s32.f32 %v2834_v63  ;;  %v422_v16 = vcvt.s32.f32 %v2836_v0  ;;  %v784_v17 = vcvt.s32.f32 %v2888_v2  ;;  %v2996_v20 = vcvt.f32.s32 %v2995_v3 }
 0x117   :  { %v3679_v19 = vrot.slane %v173_v4, %v338_v22  ;;  %v3687_v28 = vrot.slane %v173_v4, %v701_v23  ;;  %v785_v49 = vcvt.s32.f32 %v2890_v10  ;;  %v1147_v21 = vcvt.s32.f32 %v2942_v11 }
 0x118   :  { %v448_v47 = vmul.f32 6.2831855, %v421_v15  ;;  %v449_v48 = vmul.f32 6.2831855, %v422_v16  ;;  %v811_v51 = vmul.f32 6.2831855, %v784_v17  ;;  %v1148_v52 = vcvt.s32.f32 %v2944_v13 }
 0x119   :  { %v2997_v53 = vtrunc.f32 %v1457_v61  ;;  %v3690_v54 = vrot.slane %v173_v4, %v3637_v24  ;;  %v812_v56 = vmul.f32 6.2831855, %v785_v49  ;;  %v1174_v57 = vmul.f32 6.2831855, %v1147_v21 }
 0x11a   :  { %v475_v22 = vsub.f32 %v340_v38, %v448_v47  ;;  %v476_v55 = vsub.f32 %v341_v39, %v449_v48  ;;  %v838_v18 = vsub.f32 %v703_v40, %v811_v51  ;;  %v1175_v58 = vmul.f32 6.2831855, %v1148_v52 }
 0x11b   :  { %v2998_v33 = vcvt.f32.s32 %v2997_v53  ;;  %v3693_v23 = vrot.slane %v173_v4, %v3639_v26  ;;  %v3695_v59 = vrot.slane %v173_v4, %v1790_v37  ;;  %v839_v63 = vsub.f32 %v704_v41, %v812_v56 }
 0x11c   :  { %v533_v60 = vmul.f32 %v475_v22, %v475_v22  ;;  %v534_v62 = vmul.f32 %v476_v55, %v476_v55  ;;  %v896_v0 = vmul.f32 %v838_v18, %v838_v18  ;;  %v1201_v61 = vsub.f32 %v1066_v42, %v1174_v57 }
 0x11d   :  { %v1510_v2 = vcvt.s32.f32 %v2996_v20  ;;  %v1202_v39 = vsub.f32 %v1067_v43, %v1175_v58  ;;  %v1511_v40 = vcvt.s32.f32 %v2998_v33  ;;  %v506_v3 = vmul.f32 %v3651_v34, %v475_v22  ;;  %v3716_v33 = vpop.permute.xlu1 %218 }
 0x11e   :  { %v564_v24 = vmul.f32 %v3679_v19, %v533_v60  ;;  %v565_v38 = vmul.f32 %v3679_v19, %v534_v62  ;;  %v3701_v10 = vmul.f32 %v3651_v34, %v476_v55  ;;  %v897_v26 = vmul.f32 %v839_v63, %v839_v63 }
 0x11f   :  { %v927_v37 = vmul.f32 %v3687_v28, %v896_v0  ;;  %v3705_v41 = vmul.f32 %v3653_v35, %v838_v18  ;;  %v1259_v42 = vmul.f32 %v1201_v61, %v1201_v61  ;;  %v1260_v16 = vmul.f32 %v1202_v39, %v1202_v39 }
 0x120   :  { %v591_v4 = vmul.f32 1.442695, %v564_v24  ;;  %v593_v11 = vmul.f32 1.442695, %v565_v38  ;;  %v928_v13 = vmul.f32 %v3687_v28, %v897_v26  ;;  %v1537_v43 = vmul.f32 6.2831855, %v1510_v2 }
 0x121   :  { %v954_v15 = vmul.f32 1.442695, %v927_v37  ;;  %v1290_v17 = vmul.f32 %v3690_v54, %v1259_v42  ;;  %v1538_v20 = vmul.f32 6.2831855, %v1511_v40  ;;  %v1819_v47 = vmul.f32 0.15915494, %v3682_v25 }
 0x122   :  { %3118 = vpow2.f32 %v591_v4  ;;  %v956_v48 = vmul.f32 1.442695, %v928_v13  ;;  %v1291_v49 = vmul.f32 %v3690_v54, %v1260_v16  ;;  %v1564_v51 = vsub.f32 %v3665_v44, %v1537_v43 }
 0x123   :  { %3120 = vpow2.f32 %v593_v11  ;;  %v1317_v21 = vmul.f32 1.442695, %v1290_v17  ;;  %v1565_v52 = vsub.f32 %v3668_v45, %v1538_v20  ;;  %v1820_v53 = vmul.f32 0.15915494, %v3685_v27 }
 0x124   :  { %3122 = vpow2.f32 %v954_v15  ;;  %v870_v22 = vmul.f32 %v3653_v35, %v839_v63  ;;  %v1319_v55 = vmul.f32 1.442695, %v1291_v49  ;;  %v1622_v56 = vmul.f32 %v1564_v51, %v1564_v51 }
 0x125   :  { %3124 = vpow2.f32 %v956_v48  ;;  %v1232_v18 = vmul.f32 %v3656_v36, %v1201_v61  ;;  %v1623_v57 = vmul.f32 %v1565_v52, %v1565_v52  ;;  %v3049_v58 = vtrunc.f32 %v1819_v47 }
 0x126   :  { %3126 = vpow2.f32 %v1317_v21  ;;  %v1653_v44 = vmul.f32 %v3693_v23, %v1622_v56  ;;  %v3051_v60 = vtrunc.f32 %v1820_v53  ;;  %v342_v45 = vsub.f32 %v3625_v5, %v3641_v29 }
 0x127   :  { %3128 = vpow2.f32 %v1319_v55  ;;  %v1654_v62 = vmul.f32 %v3693_v23, %v1623_v57  ;;  %v3050_v63 = vcvt.f32.s32 %v3049_v58  ;;  %v3724_v0 = vsub.f32 %v3716_v33, %v3641_v29 }
 0x128   :  { %v3728_v61 = vsub.f32 %v3625_v5, %v3643_v30  ;;  %v1680_v2 = vmul.f32 1.442695, %v1653_v44  ;;  %v3052_v24 = vcvt.f32.s32 %v3051_v60  ;;  %v369_v38 = vmul.f32 0.15915494, %v342_v45 }
 0x129   :  { %v3732_v40 = vsub.f32 %v3716_v33, %v3643_v30  ;;  %v1682_v26 = vmul.f32 1.442695, %v1654_v62  ;;  %v1873_v37 = vcvt.s32.f32 %v3050_v63  ;;  %v370_v4 = vmul.f32 0.15915494, %v3724_v0 }
 0x12a   :  { %v732_v11 = vmul.f32 0.15915494, %v3728_v61  ;;  %3130 = vpow2.f32 %v1680_v2  ;;  %v1874_v42 = vcvt.s32.f32 %v3052_v24  ;;  %v2837_v13 = vtrunc.f32 %v369_v38 }
 0x12b   :  { %v733_v15 = vmul.f32 0.15915494, %v3732_v40  ;;  %3132 = vpow2.f32 %v1682_v26  ;;  %v1900_v43 = vmul.f32 6.2831855, %v1873_v37  ;;  %v2839_v17 = vtrunc.f32 %v370_v4 }
 0x12c   :  { %v3119_v16 = vpop.eup %3118  ;;  %v2891_v20 = vtrunc.f32 %v732_v11  ;;  %v1233_v49 = vmul.f32 %v3656_v36, %v1202_v39  ;;  %v1901_v21 = vmul.f32 6.2831855, %v1874_v42  ;;  %v2838_v53 = vcvt.f32.s32 %v2837_v13 }
 0x12d   :  { %v3121_v47 = vpop.eup %3120  ;;  %v645_v48 = vmul.f32 %v3119_v16, %v506_v3  ;;  %v1595_v57 = vmul.f32 %v3671_v46, %v1564_v51  ;;  %v1927_v58 = vsub.f32 %v3682_v25, %v1900_v43  ;;  %v2840_v44 = vcvt.f32.s32 %v2839_v17 }
 0x12e   :  { %v3123_v55 = vpop.eup %3122  ;;  %v646_v56 = vmul.f32 %v3121_v47, %v3701_v10  ;;  %v1928_v63 = vsub.f32 %v3685_v27, %v1901_v21  ;;  %v423_v2 = vcvt.s32.f32 %v2838_v53  ;;  %v2893_v24 = vtrunc.f32 %v733_v15 }
 0x12f   :  { %v3125_v60 = vpop.eup %3124  ;;  %v672_v62 = vsub.f32 0.0, %v645_v48  ;;  %v1008_v39 = vmul.f32 %v3123_v55, %v3705_v41  ;;  %v1985_v26 = vmul.f32 %v1927_v58, %v1927_v58  ;;  %v2892_v37 = vcvt.f32.s32 %v2891_v20 }
 0x130   :  { %v3127_v38 = vpop.eup %3126  ;;  %v673_v3 = vsub.f32 0.0, %v646_v56  ;;  %v1009_v11 = vmul.f32 %v3125_v60, %v870_v22  ;;  %v1596_v10 = vmul.f32 %v3671_v46, %v1565_v52  ;;  %v3745_v51 = vmul.f32 %v3677_v14, %v1927_v58 }
 0x131   :  { %v3129_v4 = vpop.eup %3128  ;;  %v1986_v25 = vmul.f32 %v1928_v63, %v1928_v63  ;;  %v1035_v42 = vsub.f32 %v672_v62, %v1008_v39  ;;  %v1371_v13 = vmul.f32 %v3127_v38, %v1232_v18  ;;  %v2016_v27 = vmul.f32 %v3695_v59, %v1985_v26 }
 0x132   :  { %v424_v16 = vcvt.s32.f32 %v2840_v44  ;;  %v1036_v15 = vsub.f32 %v673_v3, %v1009_v11  ;;  %v450_v17 = vmul.f32 6.2831855, %v423_v2  ;;  %v2894_v41 = vcvt.f32.s32 %v2893_v24 }
 0x133   :  { %v2017_v43 = vmul.f32 %v3695_v59, %v1986_v25  ;;  %v1959_v20 = vmul.f32 %v3677_v14, %v1928_v63  ;;  %v2043_v47 = vmul.f32 1.442695, %v2016_v27  ;;  %v786_v48 = vcvt.s32.f32 %v2892_v37 }
 0x134   :  { %v451_v22 = vmul.f32 6.2831855, %v424_v16  ;;  %v3131_v52 = vpop.eup %3130  ;;  %v1372_v21 = vmul.f32 %v3129_v4, %v1233_v49  ;;  %v477_v55 = vsub.f32 %v342_v45, %v450_v17  ;;  %v787_v56 = vcvt.s32.f32 %v2894_v41 }
 0x135   :  { %v2045_v53 = vmul.f32 1.442695, %v2017_v43  ;;  %v3133_v58 = vpop.eup %3132  ;;  %3134 = vpow2.f32 %v2043_v47  ;;  %v813_v44 = vmul.f32 6.2831855, %v786_v48  ;;  %v1068_v60 = vsub.f32 %v3625_v5, %v3646_v31 }
 0x136   :  { %v478_v18 = vsub.f32 %v3724_v0, %v451_v22  ;;  %v1398_v62 = vsub.f32 %v1035_v42, %v1371_v13  ;;  %v1399_v2 = vsub.f32 %v1036_v15, %v1372_v21  ;;  %v535_v63 = vmul.f32 %v477_v55, %v477_v55 }
 0x137   :  { %3136 = vpow2.f32 %v2045_v53  ;;  %v1734_v24 = vmul.f32 %v3131_v52, %v1595_v57  ;;  %v1735_v38 = vmul.f32 %v3133_v58, %v1596_v10  ;;  %v814_v39 = vmul.f32 6.2831855, %v787_v56 }
 0x138   :  { %v536_v3 = vmul.f32 %v478_v18, %v478_v18  ;;  %v3754_v49 = vmul.f32 %v3651_v34, %v477_v55  ;;  %v566_v45 = vmul.f32 %v3679_v19, %v535_v63  ;;  %v840_v26 = vsub.f32 %v3728_v61, %v813_v44 }
 0x139   :  { %v1069_v0 = vsub.f32 %v3716_v33, %v3646_v31  ;;  %v841_v4 = vsub.f32 %v3732_v40, %v814_v39  ;;  %v1095_v11 = vmul.f32 0.15915494, %v1068_v60  ;;  %v1431_v57 = vsub.f32 %v3625_v5, %v3649_v32 }
 0x13a   :  { %v567_v37 = vmul.f32 %v3679_v19, %v536_v3  ;;  %v1761_v10 = vsub.f32 %v1398_v62, %v1734_v24  ;;  %v595_v25 = vmul.f32 1.442695, %v566_v45  ;;  %v898_v42 = vmul.f32 %v840_v26, %v840_v26 }
 0x13b   :  { %v1096_v13 = vmul.f32 0.15915494, %v1069_v0  ;;  %v1762_v27 = vsub.f32 %v1399_v2, %v1735_v38  ;;  %v899_v15 = vmul.f32 %v841_v4, %v841_v4  ;;  %v2945_v43 = vtrunc.f32 %v1095_v11 }
 0x13c   :  { %v597_v16 = vmul.f32 1.442695, %v567_v37  ;;  %3138 = vpow2.f32 %v595_v25  ;;  %v929_v61 = vmul.f32 %v3687_v28, %v898_v42  ;;  %v1432_v41 = vsub.f32 %v3716_v33, %v3649_v32 }
 0x13d   :  { %v2947_v17 = vtrunc.f32 %v1096_v13  ;;  %v930_v40 = vmul.f32 %v3687_v28, %v899_v15  ;;  %v2946_v47 = vcvt.f32.s32 %v2945_v43  ;;  %v1458_v22 = vmul.f32 0.15915494, %v1431_v57 }
 0x13e   :  { %3140 = vpow2.f32 %v597_v16  ;;  %v958_v48 = vmul.f32 1.442695, %v929_v61  ;;  %v1459_v21 = vmul.f32 0.15915494, %v1432_v41  ;;  %v3770_v53 = vsub.f32 %v3625_v5, %v3673_v50 }
 0x13f   :  { %v2948_v52 = vcvt.f32.s32 %v2947_v17  ;;  %v3135_v55 = vpop.eup %3134  ;;  %v960_v56 = vmul.f32 1.442695, %v930_v40  ;;  %v1149_v58 = vcvt.s32.f32 %v2946_v47  ;;  %v2999_v44 = vtrunc.f32 %v1458_v22 }
 0x140   :  { %v3774_v62 = vsub.f32 %v3716_v33, %v3673_v50  ;;  %v2097_v63 = vmul.f32 %v3135_v55, %v3745_v51  ;;  %3142 = vpow2.f32 %v958_v48  ;;  %v3001_v38 = vtrunc.f32 %v1459_v21 }
 0x141   :  { %v3137_v2 = vpop.eup %3136  ;;  %v1150_v24 = vcvt.s32.f32 %v2948_v52  ;;  %3144 = vpow2.f32 %v960_v56  ;;  %v1176_v39 = vmul.f32 6.2831855, %v1149_v58  ;;  %v3000_v45 = vcvt.f32.s32 %v2999_v44 }
 0x142   :  { %v2098_v3 = vmul.f32 %v3137_v2, %v1959_v20  ;;  %v2124_v5 = vsub.f32 %v1761_v10, %v2097_v63  ;;  %v3002_v11 = vcvt.f32.s32 %v3001_v38  ;;  %v1821_v25 = vmul.f32 0.15915494, %v3770_v53 }
 0x143   :  { %v1177_v37 = vmul.f32 6.2831855, %v1150_v24  ;;  %v1203_v13 = vsub.f32 %v1068_v60, %v1176_v39  ;;  %v1512_v16 = vcvt.s32.f32 %v3000_v45  ;;  %v1822_v33 = vmul.f32 0.15915494, %v3774_v62 }
 0x144   :  { %v2125_v42 = vsub.f32 %v1762_v27, %v2098_v3  ;;  %v509_v15 = vmul.f32 %v3651_v34, %v478_v18  ;;  %v1513_v43 = vcvt.s32.f32 %v3002_v11  ;;  %v3053_v61 = vtrunc.f32 %v1821_v25  ;;  %v3801_v11 = vpop.permute.xlu1 %228 }
 0x145   :  { %v1204_v51 = vsub.f32 %v1069_v0, %v1177_v37  ;;  %v871_v20 = vmul.f32 %v3653_v35, %v840_v26  ;;  %v1261_v40 = vmul.f32 %v1203_v13, %v1203_v13  ;;  %v1539_v47 = vmul.f32 6.2831855, %v1512_v16 }
 0x146   :  { %v2764_v17 = vpack.c.bf16 %v2125_v42, %v2124_v5  ;;  %v3139_v10 = vpop.eup %3138  ;;  %v872_v22 = vmul.f32 %v3653_v35, %v841_v4  ;;  %v1540_v52 = vmul.f32 6.2831855, %v1513_v43  ;;  %v3054_v27 = vcvt.f32.s32 %v3053_v61 }
 0x147   :  { %v1262_v48 = vmul.f32 %v1204_v51, %v1204_v51  ;;  %v647_v21 = vmul.f32 %v3139_v10, %v3754_v49  ;;  %v1292_v18 = vmul.f32 %v3690_v54, %v1261_v40  ;;  %v1566_v0 = vsub.f32 %v1431_v57, %v1539_v47 }
 0x148   :  { %v3141_v60 = vpop.eup %3140  ;;  %2765 = vmatpush1.bf16.msra.mxu0 %v2764_v17  ;;  %2819 = vmatpush1.bf16.msra.mxu1 %v2764_v17  ;;  %v3055_v55 = vtrunc.f32 %v1822_v33  ;;  %v1567_v4 = vsub.f32 %v1432_v41, %v1540_v52  ;;  %v1875_v58 = vcvt.s32.f32 %v3054_v27  ;;  %v3788_v44 = vmul.f32 %v3656_v36, %v1203_v13 }
 0x149   :  { %2766 = vmatprep.subr.bf16.mxu0 %v3443_v1  ;;  %2806 = vmatprep.subr.bf16.mxu1 %v3443_v1  ;;  %v648_v26 = vmul.f32 %v3141_v60, %v509_v15  ;;  %v1293_v56 = vmul.f32 %v3690_v54, %v1262_v48  ;;  %v1321_v2 = vmul.f32 1.442695, %v1292_v18  ;;  %v1624_v63 = vmul.f32 %v1566_v0, %v1566_v0 }
 0x14a   :  { %v3792_v49 = vsub.f32 %v3627_v6, %v3641_v29  ;;  %v3143_v57 = vpop.eup %3142  ;;  %v674_v24 = vsub.f32 0.0, %v647_v21  ;;  %v3795_v38 = vmul.f32 %v3656_v36, %v1204_v51  ;;  %v1625_v39 = vmul.f32 %v1567_v4, %v1567_v4 }
 0x14b   :  { %v1323_v3 = vmul.f32 1.442695, %v1293_v56  ;;  %v3145_v45 = vpop.eup %3144  ;;  %3146 = vpow2.f32 %v1321_v2  ;;  %v3798_v41 = vmul.f32 %v3671_v46, %v1566_v0  ;;  %v1655_v5 = vmul.f32 %v3693_v23, %v1624_v63 }
 0x14c   :  { %v3056_v37 = vcvt.f32.s32 %v3055_v55  ;;  %v675_v25 = vsub.f32 0.0, %v648_v26  ;;  %v1656_v42 = vmul.f32 %v3693_v23, %v1625_v39  ;;  %v1902_v13 = vmul.f32 6.2831855, %v1875_v58 }
 0x14d   :  { %3148 = vpow2.f32 %v1323_v3  ;;  %v3805_v16 = vmul.f32 %v3671_v46, %v1567_v4  ;;  %v1684_v33 = vmul.f32 1.442695, %v1655_v5  ;;  %v345_v51 = vsub.f32 %v3801_v11, %v3641_v29 }
 0x14e   :  { %v1876_v15 = vcvt.s32.f32 %v3056_v37  ;;  %v1010_v43 = vmul.f32 %v3143_v57, %v871_v20  ;;  %v1686_v61 = vmul.f32 1.442695, %v1656_v42  ;;  %v1929_v17 = vsub.f32 %v3770_v53, %v1902_v13 }
 0x14f   :  { %v371_v40 = vmul.f32 0.15915494, %v3792_v49  ;;  %3150 = vpow2.f32 %v1684_v33  ;;  %v372_v10 = vmul.f32 0.15915494, %v345_v51  ;;  %v707_v48 = vsub.f32 %v3627_v6, %v3643_v30 }
 0x150   :  { %v1903_v47 = vmul.f32 6.2831855, %v1876_v15  ;;  %v1011_v52 = vmul.f32 %v3145_v45, %v872_v22  ;;  %3152 = vpow2.f32 %v1686_v61  ;;  %v1987_v27 = vmul.f32 %v1929_v17, %v1929_v17 }
 0x151   :  { %v2841_v60 = vtrunc.f32 %v371_v40  ;;  %v2843_v18 = vtrunc.f32 %v372_v10  ;;  %v708_v20 = vsub.f32 %v3801_v11, %v3643_v30  ;;  %v734_v0 = vmul.f32 0.15915494, %v707_v48 }
 0x152   :  { %v1930_v21 = vsub.f32 %v3774_v62, %v1903_v47  ;;  %v1037_v53 = vsub.f32 %v674_v24, %v1010_v43  ;;  %v2018_v55 = vmul.f32 %v3695_v59, %v1987_v27  ;;  %v3819_v56 = vsub.f32 %v3627_v6, %v3646_v31 }
 0x153   :  { %v2842_v26 = vcvt.f32.s32 %v2841_v60  ;;  %v2844_v22 = vcvt.f32.s32 %v2843_v18  ;;  %v735_v58 = vmul.f32 0.15915494, %v708_v20  ;;  %v3823_v2 = vsub.f32 %v3801_v11, %v3646_v31 }
 0x154   :  { %v1988_v4 = vmul.f32 %v1930_v21, %v1930_v21  ;;  %v2047_v62 = vmul.f32 1.442695, %v2018_v55  ;;  %v2895_v57 = vtrunc.f32 %v734_v0  ;;  %v1097_v3 = vmul.f32 0.15915494, %v3819_v56 }
 0x155   :  { %v425_v63 = vcvt.s32.f32 %v2842_v26  ;;  %v3147_v24 = vpop.eup %3146  ;;  %v1038_v39 = vsub.f32 %v675_v25, %v1011_v52  ;;  %v426_v5 = vcvt.s32.f32 %v2844_v22  ;;  %v2897_v37 = vtrunc.f32 %v735_v58 }
 0x156   :  { %v2019_v45 = vmul.f32 %v3695_v59, %v1988_v4  ;;  %v1960_v13 = vmul.f32 %v3677_v14, %v1929_v17  ;;  %3154 = vpow2.f32 %v2047_v62  ;;  %v2896_v15 = vcvt.f32.s32 %v2895_v57 }
 0x157   :  { %v3149_v42 = vpop.eup %3148  ;;  %v452_v33 = vmul.f32 6.2831855, %v425_v63  ;;  %v453_v61 = vmul.f32 6.2831855, %v426_v5  ;;  %v2898_v40 = vcvt.f32.s32 %v2897_v37  ;;  %v1098_v47 = vmul.f32 0.15915494, %v3823_v2 }
 0x158   :  { %v2049_v43 = vmul.f32 1.442695, %v2019_v45  ;;  %v1373_v10 = vmul.f32 %v3147_v24, %v3788_v44  ;;  %v788_v25 = vcvt.s32.f32 %v2896_v15  ;;  %v2949_v52 = vtrunc.f32 %v1097_v3 }
 0x159   :  { %v479_v27 = vsub.f32 %v3792_v49, %v452_v33  ;;  %v3151_v60 = vpop.eup %3150  ;;  %v1374_v18 = vmul.f32 %v3149_v42, %v3795_v38  ;;  %v480_v0 = vsub.f32 %v345_v51, %v453_v61  ;;  %v789_v17 = vcvt.s32.f32 %v2898_v40 }
 0x15a   :  { %3156 = vpow2.f32 %v2049_v43  ;;  %v3153_v55 = vpop.eup %3152  ;;  %v1400_v26 = vsub.f32 %v1037_v53, %v1373_v10  ;;  %v1961_v4 = vmul.f32 %v3677_v14, %v1930_v21  ;;  %v815_v58 = vmul.f32 6.2831855, %v788_v25 }
 0x15b   :  { %v537_v22 = vmul.f32 %v479_v27, %v479_v27  ;;  %v1401_v62 = vsub.f32 %v1038_v39, %v1374_v18  ;;  %v1736_v63 = vmul.f32 %v3151_v60, %v3798_v41  ;;  %v538_v44 = vmul.f32 %v480_v0, %v480_v0 }
 0x15c   :  { %v816_v57 = vmul.f32 6.2831855, %v789_v17  ;;  %v3835_v49 = vmul.f32 %v3651_v34, %v479_v27  ;;  %v842_v38 = vsub.f32 %v707_v48, %v815_v58  ;;  %v2950_v24 = vcvt.f32.s32 %v2949_v52 }
 0x15d   :  { %v568_v3 = vmul.f32 %v3679_v19, %v537_v22  ;;  %v1737_v51 = vmul.f32 %v3153_v55, %v3805_v16  ;;  %v569_v53 = vmul.f32 %v3679_v19, %v538_v44  ;;  %v2951_v21 = vtrunc.f32 %v1098_v47 }
 0x15e   :  { %v843_v45 = vsub.f32 %v708_v20, %v816_v57  ;;  %v1763_v5 = vsub.f32 %v1400_v26, %v1736_v63  ;;  %v900_v39 = vmul.f32 %v842_v38, %v842_v38  ;;  %v1151_v42 = vcvt.s32.f32 %v2950_v24 }
 0x15f   :  { %v599_v37 = vmul.f32 1.442695, %v568_v3  ;;  %v1764_v41 = vsub.f32 %v1401_v62, %v1737_v51  ;;  %v601_v33 = vmul.f32 1.442695, %v569_v53  ;;  %v2952_v43 = vcvt.f32.s32 %v2951_v21 }
 0x160   :  { %v901_v15 = vmul.f32 %v843_v45, %v843_v45  ;;  %v3155_v61 = vpop.eup %3154  ;;  %v931_v40 = vmul.f32 %v3687_v28, %v900_v39  ;;  %v1178_v48 = vmul.f32 6.2831855, %v1151_v42  ;;  %v1433_v16 = vsub.f32 %v3627_v6, %v3649_v32  ;;  %v3855_v42 = vpop.permute.xlu1 %238 }
 0x161   :  { %3158 = vpow2.f32 %v599_v37  ;;  %v2099_v10 = vmul.f32 %v3155_v61, %v1960_v13  ;;  %v1152_v47 = vcvt.s32.f32 %v2952_v43  ;;  %v1434_v52 = vsub.f32 %v3801_v11, %v3649_v32 }
 0x162   :  { %3160 = vpow2.f32 %v601_v33  ;;  %v932_v20 = vmul.f32 %v3687_v28, %v901_v15  ;;  %v962_v27 = vmul.f32 1.442695, %v931_v40  ;;  %v1205_v25 = vsub.f32 %v3819_v56, %v1178_v48 }
 0x163   :  { %v1460_v60 = vmul.f32 0.15915494, %v1433_v16  ;;  %v511_v17 = vmul.f32 %v3651_v34, %v480_v0  ;;  %v1179_v26 = vmul.f32 6.2831855, %v1152_v47  ;;  %v1796_v22 = vsub.f32 %v3627_v6, %v3673_v50 }
 0x164   :  { %v3157_v18 = vpop.eup %3156  ;;  %v964_v55 = vmul.f32 1.442695, %v932_v20  ;;  %v2126_v58 = vsub.f32 %v1763_v5, %v2099_v10  ;;  %3162 = vpow2.f32 %v962_v27  ;;  %v1263_v62 = vmul.f32 %v1205_v25, %v1205_v25 }
 0x165   :  { %v2100_v13 = vmul.f32 %v3157_v18, %v1961_v4  ;;  %v1206_v63 = vsub.f32 %v3823_v2, %v1179_v26  ;;  %v1461_v56 = vmul.f32 0.15915494, %v1434_v52  ;;  %v3003_v44 = vtrunc.f32 %v1460_v60 }
 0x166   :  { %3164 = vpow2.f32 %v964_v55  ;;  %v1294_v3 = vmul.f32 %v3690_v54, %v1263_v62  ;;  %v1797_v0 = vsub.f32 %v3801_v11, %v3673_v50  ;;  %v1823_v24 = vmul.f32 0.15915494, %v1796_v22 }
 0x167   :  { %v2127_v57 = vsub.f32 %v1764_v41, %v2100_v13  ;;  %v873_v51 = vmul.f32 %v3653_v35, %v842_v38  ;;  %v1264_v53 = vmul.f32 %v1206_v63, %v1206_v63  ;;  %v3004_v6 = vcvt.f32.s32 %v3003_v44 }
 0x168   :  { %v3005_v4 = vtrunc.f32 %v1461_v56  ;;  %v1325_v5 = vmul.f32 1.442695, %v1294_v3  ;;  %v1824_v37 = vmul.f32 0.15915494, %v1797_v0  ;;  %v3057_v39 = vtrunc.f32 %v1823_v24 }
 0x169   :  { %v2767_v21 = vpack.c.bf16 %v2127_v57, %v2126_v58  ;;  %v1295_v2 = vmul.f32 %v3690_v54, %v1264_v53  ;;  %v1514_v33 = vcvt.s32.f32 %v3004_v6  ;;  %v3860_v15 = vsub.f32 %v3629_v7, %v3641_v29 }
 0x16a   :  { %v3006_v41 = vcvt.f32.s32 %v3005_v4  ;;  %v874_v38 = vmul.f32 %v3653_v35, %v843_v45  ;;  %v3058_v43 = vcvt.f32.s32 %v3057_v39  ;;  %v3059_v61 = vtrunc.f32 %v1824_v37 }
 0x16b   :  { %v3159_v11 = vpop.eup %3158  ;;  %2768 = vmatpush1.bf16.msra.mxu0 %v2767_v21  ;;  %2820 = vmatpush1.bf16.msra.mxu1 %v2767_v21  ;;  %v3865_v40 = vsub.f32 %v3855_v42, %v3641_v29  ;;  %v1327_v20 = vmul.f32 1.442695, %v1295_v2  ;;  %v1541_v27 = vmul.f32 6.2831855, %v1514_v33  ;;  %v1236_v60 = vmul.f32 %v3656_v36, %v1205_v25 }
 0x16c   :  { %v3161_v48 = vpop.eup %3160  ;;  %2769 = vmatprep.subr.bf16.mxu0 %v3443_v1  ;;  %2807 = vmatprep.subr.bf16.mxu1 %v3443_v1  ;;  %v649_v10 = vmul.f32 %v3159_v11, %v3835_v49  ;;  %v1515_v47 = vcvt.s32.f32 %v3006_v41  ;;  %v3060_v18 = vcvt.f32.s32 %v3059_v61  ;;  %v1877_v45 = vcvt.s32.f32 %v3058_v43 }
 0x16d   :  { %v373_v55 = vmul.f32 0.15915494, %v3860_v15  ;;  %v650_v26 = vmul.f32 %v3161_v48, %v511_v17  ;;  %3166 = vpow2.f32 %v1325_v5  ;;  %v1568_v58 = vsub.f32 %v1433_v16, %v1541_v27 }
 0x16e   :  { %v1542_v13 = vmul.f32 6.2831855, %v1515_v47  ;;  %v3163_v62 = vpop.eup %3162  ;;  %v676_v56 = vsub.f32 0.0, %v649_v10  ;;  %v1237_v44 = vmul.f32 %v3656_v36, %v1206_v63  ;;  %v1878_v57 = vcvt.s32.f32 %v3060_v18 }
 0x16f   :  { %v1904_v3 = vmul.f32 6.2831855, %v1877_v45  ;;  %3168 = vpow2.f32 %v1327_v20  ;;  %v1626_v53 = vmul.f32 %v1568_v58, %v1568_v58  ;;  %v374_v25 = vmul.f32 0.15915494, %v3865_v40 }
 0x170   :  { %v3165_v49 = vpop.eup %3164  ;;  %v1569_v24 = vsub.f32 %v1434_v52, %v1542_v13  ;;  %v1012_v6 = vmul.f32 %v3163_v62, %v873_v51  ;;  %v1905_v4 = vmul.f32 6.2831855, %v1878_v57  ;;  %v2845_v37 = vtrunc.f32 %v373_v55 }
 0x171   :  { %v1931_v21 = vsub.f32 %v1796_v22, %v1904_v3  ;;  %v677_v17 = vsub.f32 0.0, %v650_v26  ;;  %v1599_v5 = vmul.f32 %v3671_v46, %v1568_v58  ;;  %v1657_v39 = vmul.f32 %v3693_v23, %v1626_v53 }
 0x172   :  { %v1627_v16 = vmul.f32 %v1569_v24, %v1569_v24  ;;  %v1013_v2 = vmul.f32 %v3165_v49, %v874_v38  ;;  %v3876_v63 = vsub.f32 %v676_v56, %v1012_v6  ;;  %v1932_v41 = vsub.f32 %v1797_v0, %v1905_v4 }
 0x173   :  { %v1989_v33 = vmul.f32 %v1931_v21, %v1931_v21  ;;  %v1688_v11 = vmul.f32 1.442695, %v1657_v39  ;;  %v2846_v43 = vcvt.f32.s32 %v2845_v37  ;;  %v2847_v61 = vtrunc.f32 %v374_v25 }
 0x174   :  { %v1658_v52 = vmul.f32 %v3693_v23, %v1627_v16  ;;  %v1600_v51 = vmul.f32 %v3671_v46, %v1569_v24  ;;  %v1990_v22 = vmul.f32 %v1932_v41, %v1932_v41  ;;  %v709_v10 = vsub.f32 %v3629_v7, %v3643_v30 }
 0x175   :  { %v2020_v48 = vmul.f32 %v3695_v59, %v1989_v33  ;;  %v3883_v20 = vsub.f32 %v677_v17, %v1013_v2  ;;  %3170 = vpow2.f32 %v1688_v11  ;;  %v2848_v47 = vcvt.f32.s32 %v2847_v61 }
 0x176   :  { %v1690_v38 = vmul.f32 1.442695, %v1658_v52  ;;  %v2021_v0 = vmul.f32 %v3695_v59, %v1990_v22  ;;  %v427_v18 = vcvt.s32.f32 %v2846_v43  ;;  %v710_v45 = vsub.f32 %v3855_v42, %v3643_v30 }
 0x177   :  { %v2051_v27 = vmul.f32 1.442695, %v2020_v48  ;;  %v3167_v55 = vpop.eup %3166  ;;  %v1962_v26 = vmul.f32 %v3677_v14, %v1931_v21  ;;  %v428_v13 = vcvt.s32.f32 %v2848_v47  ;;  %v736_v58 = vmul.f32 0.15915494, %v709_v10 }
 0x178   :  { %3172 = vpow2.f32 %v1690_v38  ;;  %v1963_v62 = vmul.f32 %v3677_v14, %v1932_v41  ;;  %v2053_v56 = vmul.f32 1.442695, %v2021_v0  ;;  %v454_v57 = vmul.f32 6.2831855, %v427_v18 }
 0x179   :  { %3174 = vpow2.f32 %v2051_v27  ;;  %v3169_v3 = vpop.eup %3168  ;;  %v455_v49 = vmul.f32 6.2831855, %v428_v13  ;;  %v737_v24 = vmul.f32 0.15915494, %v710_v45  ;;  %v2899_v53 = vtrunc.f32 %v736_v58 }
 0x17a   :  { %v1072_v25 = vsub.f32 %v3629_v7, %v3646_v31  ;;  %v1375_v6 = vmul.f32 %v3167_v55, %v1236_v60  ;;  %3176 = vpow2.f32 %v2053_v56  ;;  %v481_v4 = vsub.f32 %v3860_v15, %v454_v57 }
 0x17b   :  { %v1073_v21 = vsub.f32 %v3855_v42, %v3646_v31  ;;  %v482_v37 = vsub.f32 %v3865_v40, %v455_v49  ;;  %v2900_v17 = vcvt.f32.s32 %v2899_v53  ;;  %v2901_v16 = vtrunc.f32 %v737_v24 }
 0x17c   :  { %v1099_v39 = vmul.f32 0.15915494, %v1072_v25  ;;  %v1376_v2 = vmul.f32 %v3169_v3, %v1237_v44  ;;  %v1402_v41 = vsub.f32 %v3876_v63, %v1375_v6  ;;  %v539_v33 = vmul.f32 %v481_v4, %v481_v4 }
 0x17d   :  { %v1100_v52 = vmul.f32 0.15915494, %v1073_v21  ;;  %v540_v11 = vmul.f32 %v482_v37, %v482_v37  ;;  %v2902_v43 = vcvt.f32.s32 %v2901_v16  ;;  %v790_v61 = vcvt.s32.f32 %v2900_v17 }
 0x17e   :  { %v3899_v60 = vsub.f32 %v3629_v7, %v3649_v32  ;;  %v1403_v15 = vsub.f32 %v3883_v20, %v1376_v2  ;;  %v570_v22 = vmul.f32 %v3679_v19, %v539_v33  ;;  %v2953_v40 = vtrunc.f32 %v1099_v39 }
 0x17f   :  { %v2955_v48 = vtrunc.f32 %v1100_v52  ;;  %v3171_v38 = vpop.eup %3170  ;;  %v571_v44 = vmul.f32 %v3679_v19, %v540_v11  ;;  %v791_v47 = vcvt.s32.f32 %v2902_v43  ;;  %v817_v63 = vmul.f32 6.2831855, %v790_v61 }
 0x180   :  { %v3906_v0 = vsub.f32 %v3855_v42, %v3649_v32  ;;  %v1738_v27 = vmul.f32 %v3171_v38, %v1599_v5  ;;  %v603_v18 = vmul.f32 1.442695, %v570_v22  ;;  %v2954_v55 = vcvt.f32.s32 %v2953_v40 }
 0x181   :  { %v2956_v13 = vcvt.f32.s32 %v2955_v48  ;;  %v605_v56 = vmul.f32 1.442695, %v571_v44  ;;  %v818_v20 = vmul.f32 6.2831855, %v791_v47  ;;  %v844_v57 = vsub.f32 %v709_v10, %v817_v63 }
 0x182   :  { %v3173_v58 = vpop.eup %3172  ;;  %v1462_v3 = vmul.f32 0.15915494, %v3899_v60  ;;  %v1765_v53 = vsub.f32 %v1402_v41, %v1738_v27  ;;  %3178 = vpow2.f32 %v603_v18  ;;  %v1153_v6 = vcvt.s32.f32 %v2954_v55 }
 0x183   :  { %v3175_v49 = vpop.eup %3174  ;;  %v1739_v24 = vmul.f32 %v3173_v58, %v1600_v51  ;;  %3180 = vpow2.f32 %v605_v56  ;;  %v845_v16 = vsub.f32 %v710_v45, %v818_v20  ;;  %v1463_v39 = vmul.f32 0.15915494, %v3906_v0 }
 0x184   :  { %v2101_v17 = vmul.f32 %v3175_v49, %v1962_v26  ;;  %v3177_v5 = vpop.eup %3176  ;;  %v902_v33 = vmul.f32 %v844_v57, %v844_v57  ;;  %v1154_v52 = vcvt.s32.f32 %v2956_v13  ;;  %v1180_v11 = vmul.f32 6.2831855, %v1153_v6 }
 0x185   :  { %v1766_v2 = vsub.f32 %v1403_v15, %v1739_v24  ;;  %v2102_v43 = vmul.f32 %v3177_v5, %v1963_v62  ;;  %v512_v10 = vmul.f32 %v3651_v34, %v481_v4  ;;  %v903_v22 = vmul.f32 %v845_v16, %v845_v16 }
 0x186   :  { %v2128_v61 = vsub.f32 %v1765_v53, %v2101_v17  ;;  %v933_v51 = vmul.f32 %v3687_v28, %v902_v33  ;;  %v1181_v41 = vmul.f32 6.2831855, %v1154_v52  ;;  %v1207_v40 = vsub.f32 %v1072_v25, %v1180_v11  ;;  %v3931_v33 = vpop.permute.xlu1 %248 }
 0x187   :  { %v3007_v48 = vtrunc.f32 %v1462_v3  ;;  %v2129_v26 = vsub.f32 %v1766_v2, %v2102_v43  ;;  %v513_v45 = vmul.f32 %v3651_v34, %v482_v37  ;;  %v934_v38 = vmul.f32 %v3687_v28, %v903_v22 }
 0x188   :  { %v3009_v44 = vtrunc.f32 %v1463_v39  ;;  %v966_v15 = vmul.f32 1.442695, %v933_v51  ;;  %v1208_v47 = vsub.f32 %v1073_v21, %v1181_v41  ;;  %v1265_v63 = vmul.f32 %v1207_v40, %v1207_v40 }
 0x189   :  { %v3916_v62 = vsub.f32 %v3629_v7, %v3673_v50  ;;  %v2770_v4 = vpack.c.bf16 %v2129_v26, %v2128_v61  ;;  %v968_v27 = vmul.f32 1.442695, %v934_v38  ;;  %v3008_v18 = vcvt.f32.s32 %v3007_v48 }
 0x18a   :  { %v3010_v55 = vcvt.f32.s32 %v3009_v44  ;;  %v875_v25 = vmul.f32 %v3653_v35, %v844_v57  ;;  %3182 = vpow2.f32 %v966_v15  ;;  %v1266_v13 = vmul.f32 %v1208_v47, %v1208_v47 }
 0x18b   :  { %v1296_v37 = vmul.f32 %v3690_v54, %v1265_v63  ;;  %2771 = vmatpush1.bf16.msra.mxu0 %v2770_v4  ;;  %2821 = vmatpush1.bf16.msra.mxu1 %v2770_v4  ;;  %3184 = vpow2.f32 %v968_v27  ;;  %v1516_v58 = vcvt.s32.f32 %v3008_v18  ;;  %v1799_v56 = vsub.f32 %v3855_v42, %v3673_v50 }
 0x18c   :  { %v1517_v21 = vcvt.s32.f32 %v3010_v55  ;;  %v3179_v7 = vpop.eup %3178  ;;  %2772 = vmatprep.subr.bf16.mxu0 %v3443_v1  ;;  %2808 = vmatprep.subr.bf16.mxu1 %v3443_v1  ;;  %v876_v20 = vmul.f32 %v3653_v35, %v845_v16  ;;  %v1297_v57 = vmul.f32 %v3690_v54, %v1266_v13  ;;  %v1825_v49 = vmul.f32 0.15915494, %v3916_v62 }
 0x18d   :  { %v1329_v3 = vmul.f32 1.442695, %v1296_v37  ;;  %v3181_v24 = vpop.eup %3180  ;;  %v651_v53 = vmul.f32 %v3179_v7, %v512_v10  ;;  %v1543_v6 = vmul.f32 6.2831855, %v1516_v58  ;;  %v1826_v39 = vmul.f32 0.15915494, %v1799_v56 }
 0x18e   :  { %v1544_v17 = vmul.f32 6.2831855, %v1517_v21  ;;  %v1331_v5 = vmul.f32 1.442695, %v1297_v57  ;;  %v3061_v42 = vtrunc.f32 %v1825_v49  ;;  %v3929_v2 = vsub.f32 %v3631_v8, %v3641_v29 }
 0x18f   :  { %3186 = vpow2.f32 %v1329_v3  ;;  %v1238_v16 = vmul.f32 %v3656_v36, %v1207_v40  ;;  %v1570_v52 = vsub.f32 %v3899_v60, %v1543_v6  ;;  %v3063_v43 = vtrunc.f32 %v1826_v39 }
 0x190   :  { %v1571_v11 = vsub.f32 %v3906_v0, %v1544_v17  ;;  %v1239_v61 = vmul.f32 %v3656_v36, %v1208_v47  ;;  %3188 = vpow2.f32 %v1331_v5  ;;  %v3062_v10 = vcvt.f32.s32 %v3061_v42 }
 0x191   :  { %v349_v22 = vsub.f32 %v3931_v33, %v3641_v29  ;;  %v652_v51 = vmul.f32 %v3181_v24, %v513_v45  ;;  %v678_v41 = vsub.f32 0.0, %v651_v53  ;;  %v1628_v48 = vmul.f32 %v1570_v52, %v1570_v52 }
 0x192   :  { %v1629_v26 = vmul.f32 %v1571_v11, %v1571_v11  ;;  %v3064_v38 = vcvt.f32.s32 %v3063_v43  ;;  %v1879_v44 = vcvt.s32.f32 %v3062_v10  ;;  %v375_v40 = vmul.f32 0.15915494, %v3929_v2 }
 0x193   :  { %v376_v15 = vmul.f32 0.15915494, %v349_v22  ;;  %v1659_v60 = vmul.f32 %v3693_v23, %v1628_v48  ;;  %v3944_v47 = vsub.f32 %v3631_v8, %v3643_v30  ;;  %v3948_v63 = vsub.f32 %v3931_v33, %v3643_v30 }
 0x194   :  { %v1660_v0 = vmul.f32 %v3693_v23, %v1629_v26  ;;  %v3183_v45 = vpop.eup %3182  ;;  %v1880_v4 = vcvt.s32.f32 %v3064_v38  ;;  %v1906_v27 = vmul.f32 6.2831855, %v1879_v44  ;;  %v2849_v18 = vtrunc.f32 %v375_v40 }
 0x195   :  { %v2851_v55 = vtrunc.f32 %v376_v15  ;;  %v3185_v13 = vpop.eup %3184  ;;  %v679_v37 = vsub.f32 0.0, %v652_v51  ;;  %v1601_v58 = vmul.f32 %v3671_v46, %v1570_v52  ;;  %v1692_v21 = vmul.f32 1.442695, %v1659_v60 }
 0x196   :  { %v1694_v7 = vmul.f32 1.442695, %v1660_v0  ;;  %v1907_v57 = vmul.f32 6.2831855, %v1880_v4  ;;  %v1933_v3 = vsub.f32 %v3916_v62, %v1906_v27  ;;  %v2850_v49 = vcvt.f32.s32 %v2849_v18 }
 0x197   :  { %v738_v24 = vmul.f32 0.15915494, %v3944_v47  ;;  %v1014_v53 = vmul.f32 %v3183_v45, %v875_v25  ;;  %3190 = vpow2.f32 %v1692_v21  ;;  %v2852_v6 = vcvt.f32.s32 %v2851_v55 }
 0x198   :  { %v739_v17 = vmul.f32 0.15915494, %v3948_v63  ;;  %v1015_v5 = vmul.f32 %v3185_v13, %v876_v20  ;;  %v1602_v42 = vmul.f32 %v3671_v46, %v1571_v11  ;;  %3192 = vpow2.f32 %v1694_v7 }
 0x199   :  { %v3187_v39 = vpop.eup %3186  ;;  %v1934_v43 = vsub.f32 %v1799_v56, %v1907_v57  ;;  %v1041_v52 = vsub.f32 %v678_v41, %v1014_v53  ;;  %v1991_v10 = vmul.f32 %v1933_v3, %v1933_v3  ;;  %v429_v51 = vcvt.s32.f32 %v2850_v49 }
 0x19a   :  { %v430_v48 = vcvt.s32.f32 %v2852_v6  ;;  %v3189_v26 = vpop.eup %3188  ;;  %v1042_v62 = vsub.f32 %v679_v37, %v1015_v5  ;;  %v2903_v44 = vtrunc.f32 %v738_v24  ;;  %v2905_v40 = vtrunc.f32 %v739_v17 }
 0x19b   :  { %v1992_v38 = vmul.f32 %v1934_v43, %v1934_v43  ;;  %v1377_v25 = vmul.f32 %v3187_v39, %v1238_v16  ;;  %v3956_v15 = vmul.f32 %v3677_v14, %v1933_v3  ;;  %v2022_v60 = vmul.f32 %v3695_v59, %v1991_v10 }
 0x19c   :  { %v456_v20 = vmul.f32 6.2831855, %v429_v51  ;;  %v457_v0 = vmul.f32 6.2831855, %v430_v48  ;;  %v2904_v56 = vcvt.f32.s32 %v2903_v44  ;;  %v2906_v41 = vcvt.f32.s32 %v2905_v40 }
 0x19d   :  { %v2023_v11 = vmul.f32 %v3695_v59, %v1992_v38  ;;  %v1378_v45 = vmul.f32 %v3189_v26, %v1239_v61  ;;  %v2055_v4 = vmul.f32 1.442695, %v2022_v60  ;;  %v3963_v18 = vsub.f32 %v3631_v8, %v3646_v31 }
 0x19e   :  { %v483_v27 = vsub.f32 %v3929_v2, %v456_v20  ;;  %v3965_v55 = vsub.f32 %v349_v22, %v457_v0  ;;  %v792_v13 = vcvt.s32.f32 %v2904_v56  ;;  %v793_v37 = vcvt.s32.f32 %v2906_v41 }
 0x19f   :  { %v2057_v16 = vmul.f32 1.442695, %v2023_v11  ;;  %v1404_v21 = vsub.f32 %v1041_v52, %v1377_v25  ;;  %3194 = vpow2.f32 %v2055_v4  ;;  %v1075_v57 = vsub.f32 %v3931_v33, %v3646_v31 }
 0x1a0   :  { %v541_v7 = vmul.f32 %v483_v27, %v483_v27  ;;  %v1405_v3 = vsub.f32 %v1042_v62, %v1378_v45  ;;  %v542_v2 = vmul.f32 %v3965_v55, %v3965_v55  ;;  %v819_v61 = vmul.f32 6.2831855, %v792_v13 }
 0x1a1   :  { %3196 = vpow2.f32 %v2057_v16  ;;  %v3191_v49 = vpop.eup %3190  ;;  %v820_v53 = vmul.f32 6.2831855, %v793_v37  ;;  %v1101_v22 = vmul.f32 0.15915494, %v3963_v18  ;;  %v1102_v6 = vmul.f32 0.15915494, %v1075_v57 }
 0x1a2   :  { %v572_v24 = vmul.f32 %v3679_v19, %v541_v7  ;;  %v3193_v17 = vpop.eup %3192  ;;  %v1740_v39 = vmul.f32 %v3191_v49, %v1601_v58  ;;  %v573_v5 = vmul.f32 %v3679_v19, %v542_v2  ;;  %v846_v52 = vsub.f32 %v3944_v47, %v819_v61 }
 0x1a3   :  { %v3977_v10 = vsub.f32 %v3631_v8, %v3649_v32  ;;  %v1741_v51 = vmul.f32 %v3193_v17, %v1602_v42  ;;  %v3980_v26 = vsub.f32 %v3948_v63, %v820_v53  ;;  %v2957_v62 = vtrunc.f32 %v1101_v22 }
 0x1a4   :  { %v607_v48 = vmul.f32 1.442695, %v572_v24  ;;  %v1965_v38 = vmul.f32 %v3677_v14, %v1934_v43  ;;  %v514_v44 = vmul.f32 %v3651_v34, %v483_v27  ;;  %v609_v40 = vmul.f32 1.442695, %v573_v5 }
 0x1a5   :  { %v904_v58 = vmul.f32 %v846_v52, %v846_v52  ;;  %v1767_v25 = vsub.f32 %v1404_v21, %v1740_v39  ;;  %v1768_v60 = vsub.f32 %v1405_v3, %v1741_v51  ;;  %v905_v47 = vmul.f32 %v3980_v26, %v3980_v26 }
 0x1a6   :  { %3198 = vpow2.f32 %v607_v48  ;;  %v2958_v20 = vcvt.f32.s32 %v2957_v62  ;;  %v2959_v11 = vtrunc.f32 %v1102_v6  ;;  %v1438_v43 = vsub.f32 %v3931_v33, %v3649_v32 }
 0x1a7   :  { %3200 = vpow2.f32 %v609_v40  ;;  %v935_v42 = vmul.f32 %v3687_v28, %v904_v58  ;;  %v936_v63 = vmul.f32 %v3687_v28, %v905_v47  ;;  %v1464_v0 = vmul.f32 0.15915494, %v3977_v10 }
 0x1a8   :  { %v3993_v56 = vsub.f32 %v3631_v8, %v3673_v50  ;;  %v2960_v45 = vcvt.f32.s32 %v2959_v11  ;;  %v1155_v4 = vcvt.s32.f32 %v2958_v20  ;;  %v3997_v27 = vsub.f32 %v3931_v33, %v3673_v50 }
 0x1a9   :  { %v970_v41 = vmul.f32 1.442695, %v935_v42  ;;  %v3195_v16 = vpop.eup %3194  ;;  %v972_v13 = vmul.f32 1.442695, %v936_v63  ;;  %v1465_v37 = vmul.f32 0.15915494, %v1438_v43  ;;  %v3011_v21 = vtrunc.f32 %v1464_v0 }
 0x1aa   :  { %v1827_v7 = vmul.f32 0.15915494, %v3993_v56  ;;  %v2103_v2 = vmul.f32 %v3195_v16, %v3956_v15  ;;  %v1156_v61 = vcvt.s32.f32 %v2960_v45  ;;  %v1182_v8 = vmul.f32 6.2831855, %v1155_v4 }
 0x1ab   :  { %v3197_v3 = vpop.eup %3196  ;;  %3202 = vpow2.f32 %v970_v41  ;;  %v3012_v24 = vcvt.f32.s32 %v3011_v21  ;;  %v3013_v53 = vtrunc.f32 %v1465_v37  ;;  %v1828_v17 = vmul.f32 0.15915494, %v3997_v27 }
 0x1ac   :  { %v2104_v49 = vmul.f32 %v3197_v3, %v1965_v38  ;;  %3204 = vpow2.f32 %v972_v13  ;;  %v2130_v22 = vsub.f32 %v1767_v25, %v2103_v2  ;;  %v1183_v6 = vmul.f32 6.2831855, %v1156_v61 }
 0x1ad   :  { %v1209_v33 = vsub.f32 %v3963_v18, %v1182_v8  ;;  %v3014_v5 = vcvt.f32.s32 %v3013_v53  ;;  %v1518_v51 = vcvt.s32.f32 %v3012_v24  ;;  %v3065_v48 = vtrunc.f32 %v1827_v7 }
 0x1ae   :  { %v2131_v39 = vsub.f32 %v1768_v60, %v2104_v49  ;;  %v515_v15 = vmul.f32 %v3651_v34, %v3965_v55  ;;  %v1210_v62 = vsub.f32 %v1075_v57, %v1183_v6  ;;  %v3067_v58 = vtrunc.f32 %v1828_v17 }
 0x1af   :  { %v1267_v40 = vmul.f32 %v1209_v33, %v1209_v33  ;;  %v1519_v42 = vcvt.s32.f32 %v3014_v5  ;;  %v1545_v20 = vmul.f32 6.2831855, %v1518_v51  ;;  %v3066_v25 = vcvt.f32.s32 %v3065_v48  ;;  %v4026_v51 = vpop.permute.xlu1 %258 }
 0x1b0   :  { %v3199_v38 = vpop.eup %3198  ;;  %v2773_v47 = vpack.c.bf16 %v2131_v39, %v2130_v22  ;;  %v877_v18 = vmul.f32 %v3653_v35, %v846_v52  ;;  %v1268_v0 = vmul.f32 %v1210_v62, %v1210_v62  ;;  %v3068_v45 = vcvt.f32.s32 %v3067_v58 }
 0x1b1   :  { %v3201_v11 = vpop.eup %3200  ;;  %v653_v63 = vmul.f32 %v3199_v38, %v514_v44  ;;  %v1298_v60 = vmul.f32 %v3690_v54, %v1267_v40  ;;  %v1546_v55 = vmul.f32 6.2831855, %v1519_v42  ;;  %v1572_v57 = vsub.f32 %v3977_v10, %v1545_v20 }
 0x1b2   :  { %2774 = vmatpush1.bf16.msra.mxu0 %v2773_v47  ;;  %2822 = vmatpush1.bf16.msra.mxu1 %v2773_v47  ;;  %v4007_v41 = vmul.f32 %v3201_v11, %v515_v15  ;;  %v878_v44 = vmul.f32 %v3653_v35, %v3980_v26  ;;  %v1299_v52 = vmul.f32 %v3690_v54, %v1268_v0  ;;  %v1881_v16 = vcvt.s32.f32 %v3066_v25 }
 0x1b3   :  { %2775 = vmatprep.subr.bf16.mxu0 %v3443_v1  ;;  %2809 = vmatprep.subr.bf16.mxu1 %v3443_v1  ;;  %v1333_v4 = vmul.f32 1.442695, %v1298_v60  ;;  %v1240_v13 = vmul.f32 %v3656_v36, %v1209_v33  ;;  %v1241_v37 = vmul.f32 %v3656_v36, %v1210_v62  ;;  %v1573_v21 = vsub.f32 %v1438_v43, %v1546_v55 }
 0x1b4   :  { %v1630_v7 = vmul.f32 %v1572_v57, %v1572_v57  ;;  %v1335_v10 = vmul.f32 1.442695, %v1299_v52  ;;  %v1882_v2 = vcvt.s32.f32 %v3068_v45  ;;  %v1908_v61 = vmul.f32 6.2831855, %v1881_v16 }
 0x1b5   :  { %v3203_v3 = vpop.eup %3202  ;;  %3206 = vpow2.f32 %v1333_v4  ;;  %v680_v49 = vsub.f32 0.0, %v653_v63  ;;  %v681_v24 = vsub.f32 0.0, %v4007_v41  ;;  %v1631_v26 = vmul.f32 %v1573_v21, %v1573_v21 }
 0x1b6   :  { %v3205_v8 = vpop.eup %3204  ;;  %v1661_v53 = vmul.f32 %v3693_v23, %v1630_v7  ;;  %3208 = vpow2.f32 %v1335_v10  ;;  %v4020_v22 = vmul.f32 %v3671_v46, %v1572_v57  ;;  %v1909_v6 = vmul.f32 6.2831855, %v1882_v2 }
 0x1b7   :  { %v1935_v43 = vsub.f32 %v3993_v56, %v1908_v61  ;;  %v1016_v33 = vmul.f32 %v3203_v3, %v877_v18  ;;  %v1662_v17 = vmul.f32 %v3693_v23, %v1631_v26  ;;  %v350_v5 = vsub.f32 %v3633_v9, %v3641_v29 }
 0x1b8   :  { %v1696_v39 = vmul.f32 1.442695, %v1661_v53  ;;  %v1017_v48 = vmul.f32 %v3205_v8, %v878_v44  ;;  %v1604_v15 = vmul.f32 %v3671_v46, %v1573_v21  ;;  %v1936_v62 = vsub.f32 %v3997_v27, %v1909_v6 }
 0x1b9   :  { %v1993_v40 = vmul.f32 %v1935_v43, %v1935_v43  ;;  %v1698_v58 = vmul.f32 1.442695, %v1662_v17  ;;  %v351_v56 = vsub.f32 %v4026_v51, %v3641_v29  ;;  %v377_v38 = vmul.f32 0.15915494, %v350_v5 }
 0x1ba   :  { %3210 = vpow2.f32 %v1696_v39  ;;  %v1043_v47 = vsub.f32 %v680_v49, %v1016_v33  ;;  %v1994_v42 = vmul.f32 %v1936_v62, %v1936_v62  ;;  %v713_v25 = vsub.f32 %v3633_v9, %v3643_v30 }
 0x1bb   :  { %v2024_v20 = vmul.f32 %v3695_v59, %v1993_v40  ;;  %3212 = vpow2.f32 %v1698_v58  ;;  %v378_v11 = vmul.f32 0.15915494, %v351_v56  ;;  %v2853_v63 = vtrunc.f32 %v377_v38 }
 0x1bc   :  { %v714_v27 = vsub.f32 %v4026_v51, %v3643_v30  ;;  %v2025_v18 = vmul.f32 %v3695_v59, %v1994_v42  ;;  %v740_v60 = vmul.f32 0.15915494, %v713_v25  ;;  %v4040_v41 = vsub.f32 %v3633_v9, %v3646_v31 }
 0x1bd   :  { %v2059_v0 = vmul.f32 1.442695, %v2024_v20  ;;  %v2854_v55 = vcvt.f32.s32 %v2853_v63  ;;  %v2855_v57 = vtrunc.f32 %v378_v11  ;;  %v4044_v44 = vsub.f32 %v4026_v51, %v3646_v31 }
 0x1be   :  { %v741_v45 = vmul.f32 0.15915494, %v714_v27  ;;  %v2061_v4 = vmul.f32 1.442695, %v2025_v18  ;;  %v2907_v16 = vtrunc.f32 %v740_v60  ;;  %v1103_v21 = vmul.f32 0.15915494, %v4040_v41 }
 0x1bf   :  { %v3207_v52 = vpop.eup %3206  ;;  %3214 = vpow2.f32 %v2059_v0  ;;  %v1044_v7 = vsub.f32 %v681_v24, %v1017_v48  ;;  %v2856_v3 = vcvt.f32.s32 %v2855_v57  ;;  %v431_v10 = vcvt.s32.f32 %v2854_v55 }
 0x1c0   :  { %v2909_v2 = vtrunc.f32 %v741_v45  ;;  %v3209_v61 = vpop.eup %3208  ;;  %3216 = vpow2.f32 %v2061_v4  ;;  %v2908_v8 = vcvt.f32.s32 %v2907_v16  ;;  %v1104_v49 = vmul.f32 0.15915494, %v4044_v44 }
 0x1c1   :  { %v2961_v26 = vtrunc.f32 %v1103_v21  ;;  %v1379_v53 = vmul.f32 %v3207_v52, %v1240_v13  ;;  %v1380_v6 = vmul.f32 %v3209_v61, %v1241_v37  ;;  %v432_v33 = vcvt.s32.f32 %v2856_v3 }
 0x1c2   :  { %v458_v17 = vmul.f32 6.2831855, %v431_v10  ;;  %v2910_v39 = vcvt.f32.s32 %v2909_v2  ;;  %v794_v40 = vcvt.s32.f32 %v2908_v8  ;;  %v2963_v38 = vtrunc.f32 %v1104_v49 }
 0x1c3   :  { %v2962_v58 = vcvt.f32.s32 %v2961_v26  ;;  %v1406_v20 = vsub.f32 %v1043_v47, %v1379_v53  ;;  %v1966_v24 = vmul.f32 %v3677_v14, %v1935_v43  ;;  %v459_v48 = vmul.f32 6.2831855, %v432_v33 }
 0x1c4   :  { %v3211_v42 = vpop.eup %3210  ;;  %v485_v11 = vsub.f32 %v350_v5, %v458_v17  ;;  %v1407_v63 = vsub.f32 %v1044_v7, %v1380_v6  ;;  %v795_v18 = vcvt.s32.f32 %v2910_v39  ;;  %v821_v0 = vmul.f32 6.2831855, %v794_v40 }
 0x1c5   :  { %v2964_v60 = vcvt.f32.s32 %v2963_v38  ;;  %v3213_v55 = vpop.eup %3212  ;;  %v1742_v13 = vmul.f32 %v3211_v42, %v4020_v22  ;;  %v486_v37 = vsub.f32 %v351_v56, %v459_v48  ;;  %v1157_v45 = vcvt.s32.f32 %v2962_v58 }
 0x1c6   :  { %v543_v57 = vmul.f32 %v485_v11, %v485_v11  ;;  %v1743_v52 = vmul.f32 %v3213_v55, %v1604_v15  ;;  %v1967_v4 = vmul.f32 %v3677_v14, %v1936_v62  ;;  %v822_v16 = vmul.f32 6.2831855, %v795_v18 }
 0x1c7   :  { %v848_v21 = vsub.f32 %v713_v25, %v821_v0  ;;  %v1769_v47 = vsub.f32 %v1406_v20, %v1742_v13  ;;  %v544_v3 = vmul.f32 %v486_v37, %v486_v37  ;;  %v1158_v5 = vcvt.s32.f32 %v2964_v60 }
 0x1c8   :  { %v574_v43 = vmul.f32 %v3679_v19, %v543_v57  ;;  %v1770_v10 = vsub.f32 %v1407_v63, %v1743_v52  ;;  %v849_v2 = vsub.f32 %v714_v27, %v822_v16  ;;  %v4054_v22 = vsub.f32 %v3633_v9, %v3649_v32  ;;  %v4073_v57 = vpop.permute.xlu1 %268 }
 0x1c9   :  { %v3215_v7 = vpop.eup %3214  ;;  %v906_v61 = vmul.f32 %v848_v21, %v848_v21  ;;  %v575_v15 = vmul.f32 %v3679_v19, %v544_v3  ;;  %v1184_v62 = vmul.f32 6.2831855, %v1157_v45  ;;  %v516_v25 = vmul.f32 %v3651_v34, %v485_v11 }
 0x1ca   :  { %v2105_v56 = vmul.f32 %v3215_v7, %v1966_v24  ;;  %v611_v8 = vmul.f32 1.442695, %v574_v43  ;;  %v3217_v49 = vpop.eup %3216  ;;  %v907_v26 = vmul.f32 %v849_v2, %v849_v2  ;;  %v1185_v6 = vmul.f32 6.2831855, %v1158_v5 }
 0x1cb   :  { %v937_v53 = vmul.f32 %v3687_v28, %v906_v61  ;;  %v2106_v33 = vmul.f32 %v3217_v49, %v1967_v4  ;;  %v613_v27 = vmul.f32 1.442695, %v575_v15  ;;  %v1211_v58 = vsub.f32 %v4040_v41, %v1184_v62 }
 0x1cc   :  { %v2132_v17 = vsub.f32 %v1769_v47, %v2105_v56  ;;  %3218 = vpow2.f32 %v611_v8  ;;  %v938_v39 = vmul.f32 %v3687_v28, %v907_v26  ;;  %v1212_v38 = vsub.f32 %v4044_v44, %v1185_v6 }
 0x1cd   :  { %v974_v40 = vmul.f32 1.442695, %v937_v53  ;;  %v2133_v42 = vsub.f32 %v1770_v10, %v2106_v33  ;;  %3220 = vpow2.f32 %v613_v27  ;;  %v1440_v20 = vsub.f32 %v4026_v51, %v3649_v32 }
 0x1ce   :  { %v1466_v24 = vmul.f32 0.15915494, %v4054_v22  ;;  %v517_v48 = vmul.f32 %v3651_v34, %v486_v37  ;;  %v879_v11 = vmul.f32 %v3653_v35, %v848_v21  ;;  %v976_v63 = vmul.f32 1.442695, %v938_v39 }
 0x1cf   :  { %3222 = vpow2.f32 %v974_v40  ;;  %v2776_v18 = vpack.c.bf16 %v2133_v42, %v2132_v17  ;;  %v1269_v0 = vmul.f32 %v1211_v58, %v1211_v58  ;;  %v1270_v60 = vmul.f32 %v1212_v38, %v1212_v38 }
 0x1d0   :  { %v1467_v55 = vmul.f32 0.15915494, %v1440_v20  ;;  %3224 = vpow2.f32 %v976_v63  ;;  %v3015_v41 = vtrunc.f32 %v1466_v24  ;;  %v1802_v44 = vsub.f32 %v3633_v9, %v3673_v50 }
 0x1d1   :  { %v4071_v13 = vsub.f32 %v4026_v51, %v3673_v50  ;;  %2777 = vmatpush1.bf16.msra.mxu0 %v2776_v18  ;;  %2823 = vmatpush1.bf16.msra.mxu1 %v2776_v18  ;;  %v1300_v37 = vmul.f32 %v3690_v54, %v1269_v0  ;;  %v1301_v45 = vmul.f32 %v3690_v54, %v1270_v60 }
 0x1d2   :  { %v3017_v52 = vtrunc.f32 %v1467_v55  ;;  %v4079_v4 = vsub.f32 %v3635_v12, %v3641_v29  ;;  %2778 = vmatprep.subr.bf16.mxu0 %v3443_v1  ;;  %2810 = vmatprep.subr.bf16.mxu1 %v3443_v1  ;;  %v3016_v9 = vcvt.f32.s32 %v3015_v41  ;;  %v1829_v51 = vmul.f32 0.15915494, %v1802_v44 }
 0x1d3   :  { %v1830_v16 = vmul.f32 0.15915494, %v4071_v13  ;;  %v4086_v21 = vsub.f32 %v4073_v57, %v3641_v29  ;;  %v1337_v47 = vmul.f32 1.442695, %v1300_v37  ;;  %v1339_v3 = vmul.f32 1.442695, %v1301_v45 }
 0x1d4   :  { %v3018_v43 = vcvt.f32.s32 %v3017_v52  ;;  %v379_v5 = vmul.f32 0.15915494, %v4079_v4  ;;  %v1520_v7 = vcvt.s32.f32 %v3016_v9  ;;  %v3069_v10 = vtrunc.f32 %v1829_v51 }
 0x1d5   :  { %v3071_v61 = vtrunc.f32 %v1830_v16  ;;  %v380_v56 = vmul.f32 0.15915494, %v4086_v21  ;;  %v880_v8 = vmul.f32 %v3653_v35, %v849_v2  ;;  %3226 = vpow2.f32 %v1337_v47 }
 0x1d6   :  { %v3219_v15 = vpop.eup %3218  ;;  %v1521_v62 = vcvt.s32.f32 %v3018_v43  ;;  %v2857_v49 = vtrunc.f32 %v379_v5  ;;  %3228 = vpow2.f32 %v1339_v3  ;;  %v1547_v53 = vmul.f32 6.2831855, %v1520_v7 }
 0x1d7   :  { %v655_v26 = vmul.f32 %v3219_v15, %v516_v25  ;;  %v3070_v6 = vcvt.f32.s32 %v3069_v10  ;;  %v3221_v33 = vpop.eup %3220  ;;  %v1242_v17 = vmul.f32 %v3656_v36, %v1211_v58  ;;  %v3072_v39 = vcvt.f32.s32 %v3071_v61 }
 0x1d8   :  { %v1548_v27 = vmul.f32 6.2831855, %v1521_v62  ;;  %v2859_v40 = vtrunc.f32 %v380_v56  ;;  %v656_v24 = vmul.f32 %v3221_v33, %v517_v48  ;;  %v1574_v63 = vsub.f32 %v4054_v22, %v1547_v53 }
 0x1d9   :  { %v3223_v42 = vpop.eup %3222  ;;  %v1883_v18 = vcvt.s32.f32 %v3070_v6  ;;  %v2858_v0 = vcvt.f32.s32 %v2857_v49  ;;  %v682_v2 = vsub.f32 0.0, %v655_v26  ;;  %v1884_v55 = vcvt.s32.f32 %v3072_v39 }
 0x1da   :  { %v1575_v60 = vsub.f32 %v1440_v20, %v1548_v27  ;;  %v2860_v41 = vcvt.f32.s32 %v2859_v40  ;;  %v3225_v25 = vpop.eup %3224  ;;  %v1243_v37 = vmul.f32 %v3656_v36, %v1212_v38  ;;  %v1632_v45 = vmul.f32 %v1574_v63, %v1574_v63 }
 0x1db   :  { %v1910_v52 = vmul.f32 6.2831855, %v1883_v18  ;;  %v4096_v58 = vsub.f32 %v3635_v12, %v3643_v30  ;;  %v683_v9 = vsub.f32 0.0, %v656_v24  ;;  %v1018_v51 = vmul.f32 %v3223_v42, %v879_v11 }
 0x1dc   :  { %v4099_v48 = vmul.f32 %v3671_v46, %v1574_v63  ;;  %v1633_v22 = vmul.f32 %v1575_v60, %v1575_v60  ;;  %v1663_v16 = vmul.f32 %v3693_v23, %v1632_v45  ;;  %v1911_v20 = vmul.f32 6.2831855, %v1884_v55 }
 0x1dd   :  { %v1937_v47 = vsub.f32 %v1802_v44, %v1910_v52  ;;  %v433_v3 = vcvt.s32.f32 %v2858_v0  ;;  %v1019_v43 = vmul.f32 %v3225_v25, %v880_v8  ;;  %v4102_v5 = vsub.f32 %v682_v2, %v1018_v51 }
 0x1de   :  { %v1664_v38 = vmul.f32 %v3693_v23, %v1633_v22  ;;  %v434_v7 = vcvt.s32.f32 %v2860_v41  ;;  %v4106_v10 = vmul.f32 %v3671_v46, %v1575_v60  ;;  %v1700_v61 = vmul.f32 1.442695, %v1663_v16 }
 0x1df   :  { %v1938_v11 = vsub.f32 %v4071_v13, %v1911_v20  ;;  %v1995_v56 = vmul.f32 %v1937_v47, %v1937_v47  ;;  %v3227_v15 = vpop.eup %3226  ;;  %v4109_v62 = vsub.f32 %v683_v9, %v1019_v43  ;;  %v460_v26 = vmul.f32 6.2831855, %v433_v3 }
 0x1e0   :  { %v1702_v49 = vmul.f32 1.442695, %v1664_v38  ;;  %v461_v44 = vmul.f32 6.2831855, %v434_v7  ;;  %v3229_v53 = vpop.eup %3228  ;;  %3230 = vpow2.f32 %v1700_v61  ;;  %v4112_v8 = vmul.f32 %v3677_v14, %v1937_v47 }
 0x1e1   :  { %v1996_v6 = vmul.f32 %v1938_v11, %v1938_v11  ;;  %v716_v33 = vsub.f32 %v4073_v57, %v3643_v30  ;;  %v2026_v27 = vmul.f32 %v3695_v59, %v1995_v56  ;;  %v487_v13 = vsub.f32 %v4079_v4, %v460_v26 }
 0x1e2   :  { %3232 = vpow2.f32 %v1702_v49  ;;  %v4120_v39 = vsub.f32 %v3635_v12, %v3646_v31  ;;  %v1381_v40 = vmul.f32 %v3227_v15, %v1242_v17  ;;  %v4124_v24 = vsub.f32 %v4086_v21, %v461_v44 }
 0x1e3   :  { %v2027_v42 = vmul.f32 %v3695_v59, %v1996_v6  ;;  %v742_v63 = vmul.f32 0.15915494, %v4096_v58  ;;  %v1382_v18 = vmul.f32 %v3229_v53, %v1243_v37  ;;  %v1969_v0 = vmul.f32 %v3677_v14, %v1938_v11 }
 0x1e4   :  { %v2063_v2 = vmul.f32 1.442695, %v2026_v27  ;;  %v545_v60 = vmul.f32 %v487_v13, %v487_v13  ;;  %v1408_v55 = vsub.f32 %v4102_v5, %v1381_v40  ;;  %v546_v41 = vmul.f32 %v4124_v24, %v4124_v24 }
 0x1e5   :  { %v2065_v4 = vmul.f32 1.442695, %v2027_v42  ;;  %v743_v25 = vmul.f32 0.15915494, %v716_v33  ;;  %v2911_v45 = vtrunc.f32 %v742_v63  ;;  %v1079_v21 = vsub.f32 %v4073_v57, %v3646_v31 }
 0x1e6   :  { %3234 = vpow2.f32 %v2063_v2  ;;  %v576_v17 = vmul.f32 %v3679_v19, %v545_v60  ;;  %v577_v37 = vmul.f32 %v3679_v19, %v546_v41  ;;  %v1105_v9 = vmul.f32 0.15915494, %v4120_v39 }
 0x1e7   :  { %3236 = vpow2.f32 %v2065_v4  ;;  %v2913_v52 = vtrunc.f32 %v743_v25  ;;  %v2912_v22 = vcvt.f32.s32 %v2911_v45  ;;  %v1106_v16 = vmul.f32 0.15915494, %v1079_v21 }
 0x1e8   :  { %v615_v51 = vmul.f32 1.442695, %v576_v17  ;;  %v4138_v20 = vsub.f32 %v3635_v12, %v3649_v32  ;;  %v617_v47 = vmul.f32 1.442695, %v577_v37  ;;  %v2965_v43 = vtrunc.f32 %v1105_v9 }
 0x1e9   :  { %v2914_v3 = vcvt.f32.s32 %v2913_v52  ;;  %v4142_v5 = vsub.f32 %v4073_v57, %v3649_v32  ;;  %v796_v38 = vcvt.s32.f32 %v2912_v22  ;;  %v2967_v7 = vtrunc.f32 %v1106_v16 }
 0x1ea   :  { %3238 = vpow2.f32 %v615_v51  ;;  %v1468_v61 = vmul.f32 0.15915494, %v4138_v20  ;;  %v3231_v11 = vpop.eup %3230  ;;  %v2966_v15 = vcvt.f32.s32 %v2965_v43  ;;  %v1409_v44 = vsub.f32 %v4109_v62, %v1382_v18 }
 0x1eb   :  { %3240 = vpow2.f32 %v617_v47  ;;  %v797_v56 = vcvt.s32.f32 %v2914_v3  ;;  %v1469_v49 = vmul.f32 0.15915494, %v4142_v5  ;;  %v823_v53 = vmul.f32 6.2831855, %v796_v38 }
 0x1ec   :  { %v3233_v26 = vpop.eup %3232  ;;  %v2968_v6 = vcvt.f32.s32 %v2967_v7  ;;  %v3019_v27 = vtrunc.f32 %v1468_v61  ;;  %v1744_v40 = vmul.f32 %v3231_v11, %v4099_v48  ;;  %v1159_v63 = vcvt.s32.f32 %v2966_v15 }
 0x1ed   :  { %v824_v42 = vmul.f32 6.2831855, %v797_v56  ;;  %v3021_v2 = vtrunc.f32 %v1469_v49  ;;  %v1745_v60 = vmul.f32 %v3233_v26, %v4106_v10  ;;  %v850_v4 = vsub.f32 %v4096_v58, %v823_v53 }
 0x1ee   :  { %v1160_v41 = vcvt.s32.f32 %v2968_v6  ;;  %v3020_v25 = vcvt.f32.s32 %v3019_v27  ;;  %v1771_v17 = vsub.f32 %v1408_v55, %v1744_v40  ;;  %v1186_v37 = vmul.f32 6.2831855, %v1159_v63  ;;  %v4167_v63 = vpop.permute.xlu1 %273 }
 0x1ef   :  { %v851_v45 = vsub.f32 %v716_v33, %v824_v42  ;;  %v3022_v52 = vcvt.f32.s32 %v3021_v2  ;;  %v1772_v62 = vsub.f32 %v1409_v44, %v1745_v60  ;;  %v518_v18 = vmul.f32 %v3651_v34, %v487_v13 }
 0x1f0   :  { %v3235_v9 = vpop.eup %3234  ;;  %v908_v51 = vmul.f32 %v850_v4, %v850_v4  ;;  %v1187_v22 = vmul.f32 6.2831855, %v1160_v41  ;;  %v1213_v10 = vsub.f32 %v4120_v39, %v1186_v37  ;;  %v1522_v3 = vcvt.s32.f32 %v3020_v25  ;;  %v4180_v37 = vpop.permute.xlu0 %278 }
 0x1f1   :  { %v3237_v48 = vpop.eup %3236  ;;  %v2107_v16 = vmul.f32 %v3235_v9, %v4112_v8  ;;  %v909_v47 = vmul.f32 %v851_v45, %v851_v45  ;;  %v519_v55 = vmul.f32 %v3651_v34, %v4124_v24  ;;  %v1523_v61 = vcvt.s32.f32 %v3022_v52 }
 0x1f2   :  { %v2108_v58 = vmul.f32 %v3237_v48, %v1969_v0  ;;  %v939_v33 = vmul.f32 %v3687_v28, %v908_v51  ;;  %v4156_v43 = vsub.f32 %v1079_v21, %v1187_v22  ;;  %v1271_v7 = vmul.f32 %v1213_v10, %v1213_v10 }
 0x1f3   :  { %v2134_v38 = vsub.f32 %v1771_v17, %v2107_v16  ;;  %v940_v13 = vmul.f32 %v3687_v28, %v909_v47  ;;  %v881_v8 = vmul.f32 %v3653_v35, %v850_v4  ;;  %v882_v24 = vmul.f32 %v3653_v35, %v851_v45 }
 0x1f4   :  { %v3239_v11 = vpop.eup %3238  ;;  %v2135_v56 = vsub.f32 %v1772_v62, %v2108_v58  ;;  %v978_v15 = vmul.f32 1.442695, %v939_v33  ;;  %v1272_v39 = vmul.f32 %v4156_v43, %v4156_v43  ;;  %v1302_v21 = vmul.f32 %v3690_v54, %v1271_v7 }
 0x1f5   :  { %v3241_v0 = vpop.eup %3240  ;;  %v980_v49 = vmul.f32 1.442695, %v940_v13  ;;  %v1549_v26 = vmul.f32 6.2831855, %v1522_v3  ;;  %v657_v53 = vmul.f32 %v3239_v11, %v518_v18  ;;  %v1550_v42 = vmul.f32 6.2831855, %v1523_v61 }
 0x1f6   :  { %v2779_v44 = vpack.c.bf16 %v2135_v56, %v2134_v38  ;;  %3242 = vpow2.f32 %v978_v15  ;;  %v1303_v6 = vmul.f32 %v3690_v54, %v1272_v39  ;;  %v4165_v27 = vmul.f32 %v3241_v0, %v519_v55 }
 0x1f7   :  { %3244 = vpow2.f32 %v980_v49  ;;  %v1341_v40 = vmul.f32 1.442695, %v1302_v21  ;;  %v1244_v2 = vmul.f32 %v3656_v36, %v1213_v10  ;;  %v1576_v4 = vsub.f32 %v4138_v20, %v1549_v26 }
 0x1f8   :  { %2780 = vmatpush1.bf16.msra.mxu0 %v2779_v44  ;;  %2824 = vmatpush1.bf16.msra.mxu1 %v2779_v44  ;;  %v1343_v60 = vmul.f32 1.442695, %v1303_v6  ;;  %v1804_v41 = vsub.f32 %v3635_v12, %v3673_v50  ;;  %v1577_v25 = vsub.f32 %v4142_v5, %v1550_v42  ;;  %v1805_v17 = vsub.f32 %v4073_v57, %v3673_v50 }
 0x1f9   :  { %2781 = vmatprep.subr.bf16.mxu0 %v3443_v1  ;;  %2811 = vmatprep.subr.bf16.mxu1 %v3443_v1  ;;  %3246 = vpow2.f32 %v1341_v40  ;;  %v354_v45 = vsub.f32 %v4167_v63, %v3641_v29  ;;  %v684_v52 = vsub.f32 0.0, %v657_v53  ;;  %v1634_v20 = vmul.f32 %v1576_v4, %v1576_v4 }
 0x1fa   :  { %3248 = vpow2.f32 %v1343_v60  ;;  %v1831_v9 = vmul.f32 0.15915494, %v1804_v41  ;;  %v685_v12 = vsub.f32 0.0, %v4165_v27  ;;  %v1635_v62 = vmul.f32 %v1577_v25, %v1577_v25 }
 0x1fb   :  { %v1832_v18 = vmul.f32 0.15915494, %v1805_v17  ;;  %v355_v51 = vsub.f32 %v4180_v37, %v3641_v29  ;;  %v1665_v5 = vmul.f32 %v3693_v23, %v1634_v20  ;;  %v381_v57 = vmul.f32 0.15915494, %v354_v45 }
 0x1fc   :  { %v3073_v22 = vtrunc.f32 %v1831_v9  ;;  %v4188_v48 = vsub.f32 %v4167_v63, %v3643_v30  ;;  %v1666_v16 = vmul.f32 %v3693_v23, %v1635_v62  ;;  %v4193_v3 = vsub.f32 %v4180_v37, %v3643_v30 }
 0x1fd   :  { %v3075_v47 = vtrunc.f32 %v1832_v18  ;;  %v382_v10 = vmul.f32 0.15915494, %v355_v51  ;;  %v1704_v58 = vmul.f32 1.442695, %v1665_v5  ;;  %v2861_v33 = vtrunc.f32 %v381_v57 }
 0x1fe   :  { %v3074_v55 = vcvt.f32.s32 %v3073_v22  ;;  %v744_v38 = vmul.f32 0.15915494, %v4188_v48  ;;  %v1706_v13 = vmul.f32 1.442695, %v1666_v16  ;;  %v745_v11 = vmul.f32 0.15915494, %v4193_v3 }
 0x1ff   :  { %v3076_v7 = vcvt.f32.s32 %v3075_v47  ;;  %v2863_v61 = vtrunc.f32 %v382_v10  ;;  %3250 = vpow2.f32 %v1704_v58  ;;  %v2862_v39 = vcvt.f32.s32 %v2861_v33 }
 0x200   :  { %v3243_v56 = vpop.eup %3242  ;;  %v1885_v15 = vcvt.s32.f32 %v3074_v55  ;;  %v2915_v0 = vtrunc.f32 %v744_v38  ;;  %3252 = vpow2.f32 %v1706_v13  ;;  %v1245_v6 = vmul.f32 %v3656_v36, %v4156_v43 }
 0x201   :  { %v3245_v49 = vpop.eup %3244  ;;  %v1020_v21 = vmul.f32 %v3243_v56, %v881_v8  ;;  %v1886_v26 = vcvt.s32.f32 %v3076_v7  ;;  %v2864_v44 = vcvt.f32.s32 %v2863_v61  ;;  %v435_v40 = vcvt.s32.f32 %v2862_v39 }
 0x202   :  { %v1021_v53 = vmul.f32 %v3245_v49, %v882_v24  ;;  %v1912_v27 = vmul.f32 6.2831855, %v1885_v15  ;;  %v2917_v62 = vtrunc.f32 %v745_v11  ;;  %v2916_v8 = vcvt.f32.s32 %v2915_v0 }
 0x203   :  { %v3247_v42 = vpop.eup %3246  ;;  %v1047_v60 = vsub.f32 %v684_v52, %v1020_v21  ;;  %v1913_v20 = vmul.f32 6.2831855, %v1886_v26  ;;  %v436_v9 = vcvt.s32.f32 %v2864_v44  ;;  %v462_v57 = vmul.f32 6.2831855, %v435_v40 }
 0x204   :  { %v3249_v18 = vpop.eup %3248  ;;  %v4199_v5 = vsub.f32 %v685_v12, %v1021_v53  ;;  %v1939_v22 = vsub.f32 %v1804_v41, %v1912_v27  ;;  %v1383_v16 = vmul.f32 %v3247_v42, %v1244_v2  ;;  %v2918_v24 = vcvt.f32.s32 %v2917_v62 }
 0x205   :  { %v1940_v47 = vsub.f32 %v1805_v17, %v1913_v20  ;;  %v463_v10 = vmul.f32 6.2831855, %v436_v9  ;;  %v1607_v58 = vmul.f32 %v3671_v46, %v1576_v4  ;;  %v1608_v43 = vmul.f32 %v3671_v46, %v1577_v25 }
 0x206   :  { %v1997_v55 = vmul.f32 %v1939_v22, %v1939_v22  ;;  %v489_v33 = vsub.f32 %v354_v45, %v462_v57  ;;  %v4203_v52 = vmul.f32 %v3249_v18, %v1245_v6  ;;  %v1410_v38 = vsub.f32 %v1047_v60, %v1383_v16 }
 0x207   :  { %v1998_v13 = vmul.f32 %v1940_v47, %v1940_v47  ;;  %v490_v7 = vsub.f32 %v355_v51, %v463_v10  ;;  %v4206_v12 = vmul.f32 %v3677_v14, %v1939_v22  ;;  %v798_v17 = vcvt.s32.f32 %v2916_v8 }
 0x208   :  { %v2028_v41 = vmul.f32 %v3695_v59, %v1997_v55  ;;  %v547_v2 = vmul.f32 %v489_v33, %v489_v33  ;;  %v1411_v61 = vsub.f32 %v4199_v5, %v4203_v52  ;;  %v799_v11 = vcvt.s32.f32 %v2918_v24 }
 0x209   :  { %v2029_v4 = vmul.f32 %v3695_v59, %v1998_v13  ;;  %v548_v25 = vmul.f32 %v490_v7, %v490_v7  ;;  %v3251_v45 = vpop.eup %3250  ;;  %v1971_v56 = vmul.f32 %v3677_v14, %v1940_v47  ;;  %v825_v39 = vmul.f32 6.2831855, %v798_v17 }
 0x20a   :  { %v2067_v15 = vmul.f32 1.442695, %v2028_v41  ;;  %v578_v51 = vmul.f32 %v3679_v19, %v547_v2  ;;  %v3253_v0 = vpop.eup %3252  ;;  %v520_v21 = vmul.f32 %v3651_v34, %v489_v33  ;;  %v826_v44 = vmul.f32 6.2831855, %v799_v11 }
 0x20b   :  { %v2069_v49 = vmul.f32 1.442695, %v2029_v4  ;;  %v579_v26 = vmul.f32 %v3679_v19, %v548_v25  ;;  %v852_v6 = vsub.f32 %v4188_v48, %v825_v39  ;;  %v1080_v27 = vsub.f32 %v4167_v63, %v3646_v31 }
 0x20c   :  { %3254 = vpow2.f32 %v2067_v15  ;;  %v619_v53 = vmul.f32 1.442695, %v578_v51  ;;  %v1746_v40 = vmul.f32 %v3251_v45, %v1607_v58  ;;  %v4220_v60 = vsub.f32 %v4193_v3, %v826_v44 }
 0x20d   :  { %3256 = vpow2.f32 %v2069_v49  ;;  %v621_v42 = vmul.f32 1.442695, %v579_v26  ;;  %v1747_v20 = vmul.f32 %v3253_v0, %v1608_v43  ;;  %v521_v9 = vmul.f32 %v3651_v34, %v490_v7 }
 0x20e   :  { %3258 = vpow2.f32 %v619_v53  ;;  %v910_v62 = vmul.f32 %v852_v6, %v852_v6  ;;  %v1773_v18 = vsub.f32 %v1410_v38, %v1746_v40  ;;  %v911_v5 = vmul.f32 %v4220_v60, %v4220_v60 }
 0x20f   :  { %3260 = vpow2.f32 %v621_v42  ;;  %v1081_v48 = vsub.f32 %v4180_v37, %v3646_v31  ;;  %v1107_v57 = vmul.f32 0.15915494, %v1080_v27  ;;  %v1443_v3 = vsub.f32 %v4167_v63, %v3649_v32 }
 0x210   :  { %v941_v22 = vmul.f32 %v3687_v28, %v910_v62  ;;  %v1444_v8 = vsub.f32 %v4180_v37, %v3649_v32  ;;  %v942_v16 = vmul.f32 %v3687_v28, %v911_v5  ;;  %v4235_v10 = vsub.f32 %v4167_v63, %v3673_v50 }
 0x211   :  { %v1108_v47 = vmul.f32 0.15915494, %v1081_v48  ;;  %v4239_v24 = vsub.f32 %v4180_v37, %v3673_v50  ;;  %v2969_v43 = vtrunc.f32 %v1107_v57  ;;  %v1470_v55 = vmul.f32 0.15915494, %v1443_v3 }
 0x212   :  { %v982_v58 = vmul.f32 1.442695, %v941_v22  ;;  %v1471_v33 = vmul.f32 0.15915494, %v1444_v8  ;;  %v984_v52 = vmul.f32 1.442695, %v942_v16  ;;  %v1774_v11 = vsub.f32 %v1411_v61, %v1747_v20 }
 0x213   :  { %v2971_v38 = vtrunc.f32 %v1108_v47  ;;  %v1833_v13 = vmul.f32 0.15915494, %v4235_v10  ;;  %v1834_v7 = vmul.f32 0.15915494, %v4239_v24  ;;  %v2970_v41 = vcvt.f32.s32 %v2969_v43 }
 0x214   :  { %3262 = vpow2.f32 %v982_v58  ;;  %v3023_v2 = vtrunc.f32 %v1470_v55  ;;  %v3025_v17 = vtrunc.f32 %v1471_v33  ;;  %v883_v47 = vmul.f32 %v3653_v35, %v852_v6  ;;  %v4245_v33 = vpop.permute.xlu1 %283 }
 0x215   :  { %3264 = vpow2.f32 %v984_v52  ;;  %v2972_v63 = vcvt.f32.s32 %v2971_v38  ;;  %v3077_v4 = vtrunc.f32 %v1833_v13  ;;  %v3079_v25 = vtrunc.f32 %v1834_v7 }
 0x216   :  { %v3255_v37 = vpop.eup %3254  ;;  %v1161_v45 = vcvt.s32.f32 %v2970_v41  ;;  %v3024_v15 = vcvt.f32.s32 %v3023_v2  ;;  %v3026_v51 = vcvt.f32.s32 %v3025_v17  ;;  %v884_v7 = vmul.f32 %v3653_v35, %v4220_v60 }
 0x217   :  { %v3257_v39 = vpop.eup %3256  ;;  %v2109_v0 = vmul.f32 %v3255_v37, %v4206_v12  ;;  %v1162_v49 = vcvt.s32.f32 %v2972_v63  ;;  %v3078_v26 = vcvt.f32.s32 %v3077_v4  ;;  %v3080_v44 = vcvt.f32.s32 %v3079_v25  ;;  %v4255_v63 = vpop.permute.xlu0 %288 }
 0x218   :  { %v3259_v53 = vpop.eup %3258  ;;  %v2110_v40 = vmul.f32 %v3257_v39, %v1971_v56  ;;  %v1188_v42 = vmul.f32 6.2831855, %v1161_v45  ;;  %v1524_v62 = vcvt.s32.f32 %v3024_v15  ;;  %v1525_v5 = vcvt.s32.f32 %v3026_v51 }
 0x219   :  { %v3261_v22 = vpop.eup %3260  ;;  %v2136_v57 = vsub.f32 %v1773_v18, %v2109_v0  ;;  %v659_v16 = vmul.f32 %v3259_v53, %v520_v21  ;;  %v1189_v61 = vmul.f32 6.2831855, %v1162_v49  ;;  %v1887_v55 = vcvt.s32.f32 %v3078_v26 }
 0x21a   :  { %v2137_v20 = vsub.f32 %v1774_v11, %v2110_v40  ;;  %v1215_v58 = vsub.f32 %v1080_v27, %v1188_v42  ;;  %v1551_v43 = vmul.f32 6.2831855, %v1524_v62  ;;  %v4247_v12 = vmul.f32 %v3261_v22, %v521_v9 }
 0x21b   :  { %v1216_v52 = vsub.f32 %v1081_v48, %v1189_v61  ;;  %v1552_v38 = vmul.f32 6.2831855, %v1525_v5  ;;  %v1888_v56 = vcvt.s32.f32 %v3080_v44  ;;  %v4253_v21 = vsub.f32 %v4245_v33, %v3641_v29 }
 0x21c   :  { %v2782_v13 = vpack.c.bf16 %v2137_v20, %v2136_v57  ;;  %v1273_v18 = vmul.f32 %v1215_v58, %v1215_v58  ;;  %v686_v6 = vsub.f32 0.0, %v659_v16  ;;  %v1578_v41 = vsub.f32 %v1443_v3, %v1551_v43 }
 0x21d   :  { %v1274_v27 = vmul.f32 %v1216_v52, %v1216_v52  ;;  %v1579_v2 = vsub.f32 %v1444_v8, %v1552_v38  ;;  %v4258_v9 = vmul.f32 %v3656_v36, %v1215_v58  ;;  %v1914_v60 = vmul.f32 6.2831855, %v1887_v55 }
 0x21e   :  { %v3263_v17 = vpop.eup %3262  ;;  %2783 = vmatpush1.bf16.msra.mxu0 %v2782_v13  ;;  %2825 = vmatpush1.bf16.msra.mxu1 %v2782_v13  ;;  %v1304_v48 = vmul.f32 %v3690_v54, %v1273_v18  ;;  %v1915_v4 = vmul.f32 6.2831855, %v1888_v56  ;;  %v687_v3 = vsub.f32 0.0, %v4247_v12  ;;  %v1247_v8 = vmul.f32 %v3656_v36, %v1216_v52 }
 0x21f   :  { %v3265_v25 = vpop.eup %3264  ;;  %2784 = vmatprep.subr.bf16.mxu0 %v3443_v1  ;;  %2812 = vmatprep.subr.bf16.mxu1 %v3443_v1  ;;  %v1305_v37 = vmul.f32 %v3690_v54, %v1274_v27  ;;  %v357_v11 = vsub.f32 %v4255_v63, %v3641_v29  ;;  %v1022_v45 = vmul.f32 %v3263_v17, %v883_v47  ;;  %v383_v44 = vmul.f32 0.15915494, %v4253_v21 }
 0x220   :  { %v1345_v15 = vmul.f32 1.442695, %v1304_v48  ;;  %v4269_v51 = vmul.f32 %v3671_v46, %v1578_v41  ;;  %v1636_v39 = vmul.f32 %v1578_v41, %v1578_v41  ;;  %v1637_v49 = vmul.f32 %v1579_v2, %v1579_v2 }
 0x221   :  { %v1347_v0 = vmul.f32 1.442695, %v1305_v37  ;;  %v1941_v26 = vsub.f32 %v4235_v10, %v1914_v60  ;;  %v1023_v53 = vmul.f32 %v3265_v25, %v884_v7  ;;  %v1942_v42 = vsub.f32 %v4239_v24, %v1915_v4 }
 0x222   :  { %3266 = vpow2.f32 %v1345_v15  ;;  %v1667_v40 = vmul.f32 %v3693_v23, %v1636_v39  ;;  %v4276_v62 = vmul.f32 %v3671_v46, %v1579_v2  ;;  %v1668_v5 = vmul.f32 %v3693_v23, %v1637_v49 }
 0x223   :  { %3268 = vpow2.f32 %v1347_v0  ;;  %v1999_v22 = vmul.f32 %v1941_v26, %v1941_v26  ;;  %v4279_v57 = vsub.f32 %v686_v6, %v1022_v45  ;;  %v2000_v47 = vmul.f32 %v1942_v42, %v1942_v42 }
 0x224   :  { %v1708_v16 = vmul.f32 1.442695, %v1667_v40  ;;  %v384_v10 = vmul.f32 0.15915494, %v357_v11  ;;  %v1710_v61 = vmul.f32 1.442695, %v1668_v5  ;;  %v2865_v58 = vtrunc.f32 %v383_v44 }
 0x225   :  { %v2030_v20 = vmul.f32 %v3695_v59, %v1999_v22  ;;  %v719_v43 = vsub.f32 %v4245_v33, %v3643_v30  ;;  %v2031_v24 = vmul.f32 %v3695_v59, %v2000_v47  ;;  %v720_v12 = vsub.f32 %v4255_v63, %v3643_v30 }
 0x226   :  { %3270 = vpow2.f32 %v1708_v16  ;;  %v2867_v55 = vtrunc.f32 %v384_v10  ;;  %v2866_v38 = vcvt.f32.s32 %v2865_v58  ;;  %v4289_v6 = vsub.f32 %v4245_v33, %v3646_v31 }
 0x227   :  { %3272 = vpow2.f32 %v1710_v61  ;;  %v2071_v52 = vmul.f32 1.442695, %v2030_v20  ;;  %v746_v56 = vmul.f32 0.15915494, %v719_v43  ;;  %v2073_v13 = vmul.f32 1.442695, %v2031_v24 }
 0x228   :  { %v2868_v7 = vcvt.f32.s32 %v2867_v55  ;;  %v747_v18 = vmul.f32 0.15915494, %v720_v12  ;;  %v437_v27 = vcvt.s32.f32 %v2866_v38  ;;  %v4293_v2 = vsub.f32 %v4255_v63, %v3646_v31 }
 0x229   :  { %3274 = vpow2.f32 %v2071_v52  ;;  %v2919_v41 = vtrunc.f32 %v746_v56  ;;  %v1109_v60 = vmul.f32 0.15915494, %v4289_v6  ;;  %v1050_v4 = vsub.f32 %v687_v3, %v1023_v53 }
 0x22a   :  { %3276 = vpow2.f32 %v2073_v13  ;;  %v438_v17 = vcvt.s32.f32 %v2868_v7  ;;  %v2921_v48 = vtrunc.f32 %v747_v18  ;;  %v464_v25 = vmul.f32 6.2831855, %v437_v27 }
 0x22b   :  { %v2920_v37 = vcvt.f32.s32 %v2919_v41  ;;  %v1110_v45 = vmul.f32 0.15915494, %v4293_v2  ;;  %v1972_v39 = vmul.f32 %v3677_v14, %v1941_v26  ;;  %v2973_v44 = vtrunc.f32 %v1109_v60 }
 0x22c   :  { %v3267_v15 = vpop.eup %3266  ;;  %v465_v0 = vmul.f32 6.2831855, %v438_v17  ;;  %v2922_v49 = vcvt.f32.s32 %v2921_v48  ;;  %v491_v22 = vsub.f32 %v4253_v21, %v464_v25  ;;  %v1973_v58 = vmul.f32 %v3677_v14, %v1942_v42 }
 0x22d   :  { %v3269_v40 = vpop.eup %3268  ;;  %v1385_v5 = vmul.f32 %v3267_v15, %v4258_v9  ;;  %v800_v16 = vcvt.s32.f32 %v2920_v37  ;;  %v2975_v47 = vtrunc.f32 %v1110_v45  ;;  %v2974_v53 = vcvt.f32.s32 %v2973_v44 }
 0x22e   :  { %v1386_v10 = vmul.f32 %v3269_v40, %v1247_v8  ;;  %v492_v61 = vsub.f32 %v357_v11, %v465_v0  ;;  %v801_v3 = vcvt.s32.f32 %v2922_v49  ;;  %v549_v24 = vmul.f32 %v491_v22, %v491_v22 }
 0x22f   :  { %v1412_v20 = vsub.f32 %v4279_v57, %v1385_v5  ;;  %v827_v26 = vmul.f32 6.2831855, %v800_v16  ;;  %v4304_v9 = vsub.f32 %v4245_v33, %v3649_v32  ;;  %v2976_v7 = vcvt.f32.s32 %v2975_v47 }
 0x230   :  { %v3271_v55 = vpop.eup %3270  ;;  %v1413_v52 = vsub.f32 %v1050_v4, %v1386_v10  ;;  %v550_v38 = vmul.f32 %v492_v61, %v492_v61  ;;  %v828_v56 = vmul.f32 6.2831855, %v801_v3  ;;  %v580_v11 = vmul.f32 %v3679_v19, %v549_v24 }
 0x231   :  { %v3273_v21 = vpop.eup %3272  ;;  %v1748_v8 = vmul.f32 %v3271_v55, %v4269_v51  ;;  %v854_v13 = vsub.f32 %v719_v43, %v827_v26  ;;  %v1163_v27 = vcvt.s32.f32 %v2974_v53  ;;  %v4314_v4 = vsub.f32 %v4255_v63, %v3649_v32 }
 0x232   :  { %v1749_v57 = vmul.f32 %v3273_v21, %v4276_v62  ;;  %v581_v42 = vmul.f32 %v3679_v19, %v550_v38  ;;  %v4310_v18 = vsub.f32 %v720_v12, %v828_v56  ;;  %v623_v48 = vmul.f32 1.442695, %v580_v11  ;;  %v4333_v56 = vpop.permute.xlu1 %293  ;;  %v4339_v11 = vpop.permute.xlu0 %298 }
 0x233   :  { %v3275_v41 = vpop.eup %3274  ;;  %v1775_v17 = vsub.f32 %v1412_v20, %v1748_v8  ;;  %v912_v60 = vmul.f32 %v854_v13, %v854_v13  ;;  %v522_v43 = vmul.f32 %v3651_v34, %v491_v22  ;;  %v1164_v49 = vcvt.s32.f32 %v2976_v7 }
 0x234   :  { %v3277_v51 = vpop.eup %3276  ;;  %v1776_v25 = vsub.f32 %v1413_v52, %v1749_v57  ;;  %v2111_v37 = vmul.f32 %v3275_v41, %v1972_v39  ;;  %v625_v45 = vmul.f32 1.442695, %v581_v42  ;;  %3278 = vpow2.f32 %v623_v48 }
 0x235   :  { %v2112_v62 = vmul.f32 %v3277_v51, %v1973_v58  ;;  %v913_v12 = vmul.f32 %v4310_v18, %v4310_v18  ;;  %v943_v15 = vmul.f32 %v3687_v28, %v912_v60  ;;  %v1190_v44 = vmul.f32 6.2831855, %v1163_v27 }
 0x236   :  { %v2138_v0 = vsub.f32 %v1775_v17, %v2111_v37  ;;  %3280 = vpow2.f32 %v625_v45  ;;  %v1472_v39 = vmul.f32 0.15915494, %v4304_v9  ;;  %v1191_v47 = vmul.f32 6.2831855, %v1164_v49 }
 0x237   :  { %v2139_v40 = vsub.f32 %v1776_v25, %v2112_v62  ;;  %v944_v5 = vmul.f32 %v3687_v28, %v913_v12  ;;  %v986_v16 = vmul.f32 1.442695, %v943_v15  ;;  %v1217_v22 = vsub.f32 %v4289_v6, %v1190_v44 }
 0x238   :  { %v1473_v10 = vmul.f32 0.15915494, %v4314_v4  ;;  %v4326_v3 = vsub.f32 %v4245_v33, %v3673_v50  ;;  %v3027_v58 = vtrunc.f32 %v1472_v39  ;;  %v523_v24 = vmul.f32 %v3651_v34, %v492_v61 }
 0x239   :  { %v2785_v53 = vpack.c.bf16 %v2139_v40, %v2138_v0  ;;  %3282 = vpow2.f32 %v986_v16  ;;  %v988_v20 = vmul.f32 1.442695, %v944_v5  ;;  %v1218_v26 = vsub.f32 %v4293_v2, %v1191_v47 }
 0x23a   :  { %v1275_v55 = vmul.f32 %v1217_v22, %v1217_v22  ;;  %v3029_v52 = vtrunc.f32 %v1473_v10  ;;  %v3028_v6 = vcvt.f32.s32 %v3027_v58  ;;  %v1809_v38 = vsub.f32 %v4255_v63, %v3673_v50 }
 0x23b   :  { %2786 = vmatpush1.bf16.msra.mxu0 %v2785_v53  ;;  %2826 = vmatpush1.bf16.msra.mxu1 %v2785_v53  ;;  %3284 = vpow2.f32 %v988_v20  ;;  %v1835_v33 = vmul.f32 0.15915494, %v4326_v3  ;;  %v885_v61 = vmul.f32 %v3653_v35, %v854_v13  ;;  %v1276_v2 = vmul.f32 %v1218_v26, %v1218_v26 }
 0x23c   :  { %2787 = vmatprep.subr.bf16.mxu0 %v3443_v1  ;;  %2813 = vmatprep.subr.bf16.mxu1 %v3443_v1  ;;  %v1306_v21 = vmul.f32 %v3690_v54, %v1275_v55  ;;  %v3030_v8 = vcvt.f32.s32 %v3029_v52  ;;  %v1526_v7 = vcvt.s32.f32 %v3028_v6  ;;  %v1836_v57 = vmul.f32 0.15915494, %v1809_v38 }
 0x23d   :  { %v3081_v42 = vtrunc.f32 %v1835_v33  ;;  %v4343_v63 = vsub.f32 %v4333_v56, %v3641_v29  ;;  %v1307_v27 = vmul.f32 %v3690_v54, %v1276_v2  ;;  %v4348_v13 = vsub.f32 %v4339_v11, %v3641_v29 }
 0x23e   :  { %v1349_v41 = vmul.f32 1.442695, %v1306_v21  ;;  %v1527_v17 = vcvt.s32.f32 %v3030_v8  ;;  %v3279_v48 = vpop.eup %3278  ;;  %v1553_v60 = vmul.f32 6.2831855, %v1526_v7  ;;  %v3083_v25 = vtrunc.f32 %v1836_v57 }
 0x23f   :  { %v3082_v51 = vcvt.f32.s32 %v3081_v42  ;;  %v385_v37 = vmul.f32 0.15915494, %v4343_v63  ;;  %v661_v62 = vmul.f32 %v3279_v48, %v522_v43  ;;  %v1351_v12 = vmul.f32 1.442695, %v1307_v27 }
 0x240   :  { %v3281_v45 = vpop.eup %3280  ;;  %3286 = vpow2.f32 %v1349_v41  ;;  %v1554_v15 = vmul.f32 6.2831855, %v1527_v17  ;;  %v1580_v49 = vsub.f32 %v4304_v9, %v1553_v60  ;;  %v3084_v44 = vcvt.f32.s32 %v3083_v25 }
 0x241   :  { %v662_v0 = vmul.f32 %v3281_v45, %v523_v24  ;;  %v1889_v40 = vcvt.s32.f32 %v3082_v51  ;;  %v886_v5 = vmul.f32 %v3653_v35, %v4310_v18  ;;  %3288 = vpow2.f32 %v1351_v12 }
 0x242   :  { %v1581_v16 = vsub.f32 %v4314_v4, %v1554_v15  ;;  %v386_v39 = vmul.f32 0.15915494, %v4348_v13  ;;  %v1248_v10 = vmul.f32 %v3656_v36, %v1217_v22  ;;  %v1249_v43 = vmul.f32 %v3656_v36, %v1218_v26 }
 0x243   :  { %v3283_v47 = vpop.eup %3282  ;;  %v1638_v53 = vmul.f32 %v1580_v49, %v1580_v49  ;;  %v1890_v20 = vcvt.s32.f32 %v3084_v44  ;;  %v688_v58 = vsub.f32 0.0, %v661_v62  ;;  %v689_v24 = vsub.f32 0.0, %v662_v0 }
 0x244   :  { %v1639_v9 = vmul.f32 %v1581_v16, %v1581_v16  ;;  %v1916_v55 = vmul.f32 6.2831855, %v1889_v40  ;;  %v2869_v33 = vtrunc.f32 %v385_v37  ;;  %v2871_v2 = vtrunc.f32 %v386_v39 }
 0x245   :  { %v3285_v52 = vpop.eup %3284  ;;  %v1669_v6 = vmul.f32 %v3693_v23, %v1638_v53  ;;  %v1917_v18 = vmul.f32 6.2831855, %v1890_v20  ;;  %v1024_v4 = vmul.f32 %v3283_v47, %v885_v61  ;;  %v1611_v21 = vmul.f32 %v3671_v46, %v1580_v49 }
 0x246   :  { %v1670_v8 = vmul.f32 %v3693_v23, %v1639_v9  ;;  %v1943_v22 = vsub.f32 %v4326_v3, %v1916_v55  ;;  %v2870_v57 = vcvt.f32.s32 %v2869_v33  ;;  %v2872_v42 = vcvt.f32.s32 %v2871_v2 }
 0x247   :  { %v1712_v26 = vmul.f32 1.442695, %v1669_v6  ;;  %v1944_v7 = vsub.f32 %v1809_v38, %v1917_v18  ;;  %v1025_v27 = vmul.f32 %v3285_v52, %v886_v5  ;;  %v1612_v41 = vmul.f32 %v3671_v46, %v1581_v16 }
 0x248   :  { %v1714_v17 = vmul.f32 1.442695, %v1670_v8  ;;  %v2001_v48 = vmul.f32 %v1943_v22, %v1943_v22  ;;  %v1051_v60 = vsub.f32 %v688_v58, %v1024_v4  ;;  %v439_v25 = vcvt.s32.f32 %v2870_v57 }
 0x249   :  { %3290 = vpow2.f32 %v1712_v26  ;;  %v2002_v51 = vmul.f32 %v1944_v7, %v1944_v7  ;;  %v440_v45 = vcvt.s32.f32 %v2872_v42  ;;  %v721_v3 = vsub.f32 %v4333_v56, %v3643_v30 }
 0x24a   :  { %v3287_v61 = vpop.eup %3286  ;;  %3292 = vpow2.f32 %v1714_v17  ;;  %v2032_v37 = vmul.f32 %v3695_v59, %v2001_v48  ;;  %v1052_v38 = vsub.f32 %v689_v24, %v1025_v27  ;;  %v466_v12 = vmul.f32 6.2831855, %v439_v25 }
 0x24b   :  { %v2033_v62 = vmul.f32 %v3695_v59, %v2002_v51  ;;  %v722_v15 = vsub.f32 %v4339_v11, %v3643_v30  ;;  %v3289_v0 = vpop.eup %3288  ;;  %v1387_v49 = vmul.f32 %v3287_v61, %v1248_v10  ;;  %v467_v40 = vmul.f32 6.2831855, %v440_v45 }
 0x24c   :  { %v2075_v44 = vmul.f32 1.442695, %v2032_v37  ;;  %v748_v5 = vmul.f32 0.15915494, %v721_v3  ;;  %v1388_v16 = vmul.f32 %v3289_v0, %v1249_v43  ;;  %v4370_v47 = vsub.f32 %v4343_v63, %v466_v12 }
 0x24d   :  { %v2077_v39 = vmul.f32 1.442695, %v2033_v62  ;;  %v1084_v53 = vsub.f32 %v4333_v56, %v3646_v31  ;;  %v4375_v20 = vsub.f32 %v4348_v13, %v467_v40  ;;  %v749_v58 = vmul.f32 0.15915494, %v722_v15 }
 0x24e   :  { %3294 = vpow2.f32 %v2075_v44  ;;  %v2923_v24 = vtrunc.f32 %v748_v5  ;;  %v1414_v9 = vsub.f32 %v1051_v60, %v1387_v49  ;;  %v1974_v10 = vmul.f32 %v3677_v14, %v1943_v22 }
 0x24f   :  { %3296 = vpow2.f32 %v2077_v39  ;;  %v551_v43 = vmul.f32 %v4370_v47, %v4370_v47  ;;  %v1415_v55 = vsub.f32 %v1052_v38, %v1388_v16  ;;  %v552_v63 = vmul.f32 %v4375_v20, %v4375_v20 }
 0x250   :  { %v2924_v52 = vcvt.f32.s32 %v2923_v24  ;;  %v2925_v6 = vtrunc.f32 %v749_v58  ;;  %v1085_v13 = vsub.f32 %v4339_v11, %v3646_v31  ;;  %v1111_v33 = vmul.f32 0.15915494, %v1084_v53 }
 0x251   :  { %v582_v18 = vmul.f32 %v3679_v19, %v551_v43  ;;  %v4387_v2 = vsub.f32 %v4333_v56, %v3649_v32  ;;  %v583_v4 = vmul.f32 %v3679_v19, %v552_v63  ;;  %v4392_v26 = vsub.f32 %v4339_v11, %v3649_v32 }
 0x252   :  { %v2926_v8 = vcvt.f32.s32 %v2925_v6  ;;  %v802_v22 = vcvt.s32.f32 %v2924_v52  ;;  %v1112_v27 = vmul.f32 0.15915494, %v1085_v13  ;;  %v2977_v17 = vtrunc.f32 %v1111_v33 }
 0x253   :  { %v3291_v57 = vpop.eup %3290  ;;  %v627_v42 = vmul.f32 1.442695, %v582_v18  ;;  %v1474_v48 = vmul.f32 0.15915494, %v4387_v2  ;;  %v629_v25 = vmul.f32 1.442695, %v583_v4  ;;  %v1975_v38 = vmul.f32 %v3677_v14, %v1944_v7 }
 0x254   :  { %v3293_v60 = vpop.eup %3292  ;;  %v1750_v51 = vmul.f32 %v3291_v57, %v1611_v21  ;;  %v803_v61 = vcvt.s32.f32 %v2926_v8  ;;  %v829_v37 = vmul.f32 6.2831855, %v802_v22  ;;  %v2978_v62 = vcvt.f32.s32 %v2977_v17 }
 0x255   :  { %v1751_v45 = vmul.f32 %v3293_v60, %v1612_v41  ;;  %v2979_v12 = vtrunc.f32 %v1112_v27  ;;  %3298 = vpow2.f32 %v627_v42  ;;  %v1475_v16 = vmul.f32 0.15915494, %v4392_v26 }
 0x256   :  { %v1777_v0 = vsub.f32 %v1414_v9, %v1750_v51  ;;  %v830_v49 = vmul.f32 6.2831855, %v803_v61  ;;  %v856_v44 = vsub.f32 %v721_v3, %v829_v37  ;;  %3300 = vpow2.f32 %v629_v25 }
 0x257   :  { %v2980_v40 = vcvt.f32.s32 %v2979_v12  ;;  %v1165_v5 = vcvt.s32.f32 %v2978_v62  ;;  %v1778_v58 = vsub.f32 %v1415_v55, %v1751_v45  ;;  %v3031_v43 = vtrunc.f32 %v1474_v48 }
 0x258   :  { %v3295_v39 = vpop.eup %3294  ;;  %v857_v21 = vsub.f32 %v722_v15, %v830_v49  ;;  %v914_v24 = vmul.f32 %v856_v44, %v856_v44  ;;  %v3033_v6 = vtrunc.f32 %v1475_v16  ;;  %v524_v27 = vmul.f32 %v3651_v34, %v4370_v47 }
 0x259   :  { %v3297_v63 = vpop.eup %3296  ;;  %v2113_v41 = vmul.f32 %v3295_v39, %v1974_v10  ;;  %v1166_v52 = vcvt.s32.f32 %v2980_v40  ;;  %v1192_v7 = vmul.f32 6.2831855, %v1165_v5  ;;  %v3032_v22 = vcvt.f32.s32 %v3031_v43  ;;  %v4427_v43 = vpop.permute.xlu0 %308 }
 0x25a   :  { %v2114_v18 = vmul.f32 %v3297_v63, %v1975_v38  ;;  %v915_v9 = vmul.f32 %v857_v21, %v857_v21  ;;  %v945_v33 = vmul.f32 %v3687_v28, %v914_v24  ;;  %v3034_v15 = vcvt.f32.s32 %v3033_v6  ;;  %v4425_v24 = vpop.permute.xlu1 %303 }
 0x25b   :  { %v2140_v3 = vsub.f32 %v1777_v0, %v2113_v41  ;;  %v1193_v4 = vmul.f32 6.2831855, %v1166_v52  ;;  %v1219_v8 = vsub.f32 %v1084_v53, %v1192_v7  ;;  %v1528_v48 = vcvt.s32.f32 %v3032_v22 }
 0x25c   :  { %v2141_v57 = vsub.f32 %v1778_v58, %v2114_v18  ;;  %v946_v42 = vmul.f32 %v3687_v28, %v915_v9  ;;  %v990_v55 = vmul.f32 1.442695, %v945_v33  ;;  %v525_v51 = vmul.f32 %v3651_v34, %v4375_v20 }
 0x25d   :  { %v1220_v10 = vsub.f32 %v1085_v13, %v1193_v4  ;;  %v1277_v17 = vmul.f32 %v1219_v8, %v1219_v8  ;;  %v1529_v61 = vcvt.s32.f32 %v3034_v15  ;;  %v4404_v53 = vmul.f32 %v3653_v35, %v856_v44 }
 0x25e   :  { %v2788_v60 = vpack.c.bf16 %v2141_v57, %v2140_v3  ;;  %v992_v25 = vmul.f32 1.442695, %v946_v42  ;;  %v1555_v38 = vmul.f32 6.2831855, %v1528_v48  ;;  %v4408_v47 = vmul.f32 %v3653_v35, %v857_v21 }
 0x25f   :  { %v1278_v37 = vmul.f32 %v1220_v10, %v1220_v10  ;;  %v1308_v45 = vmul.f32 %v3690_v54, %v1277_v17  ;;  %v3299_v62 = vpop.eup %3298  ;;  %3302 = vpow2.f32 %v990_v55  ;;  %v1556_v13 = vmul.f32 6.2831855, %v1529_v61 }
 0x260   :  { %2789 = vmatpush1.bf16.msra.mxu0 %v2788_v60  ;;  %2827 = vmatpush1.bf16.msra.mxu1 %v2788_v60  ;;  %v1810_v20 = vsub.f32 %v4333_v56, %v3673_v50  ;;  %v3301_v12 = vpop.eup %3300  ;;  %3304 = vpow2.f32 %v992_v25  ;;  %v1582_v44 = vsub.f32 %v4387_v2, %v1555_v38  ;;  %v4417_v40 = vmul.f32 %v3656_v36, %v1219_v8 }
 0x261   :  { %2790 = vmatprep.subr.bf16.mxu0 %v3443_v1  ;;  %2814 = vmatprep.subr.bf16.mxu1 %v3443_v1  ;;  %v1309_v0 = vmul.f32 %v3690_v54, %v1278_v37  ;;  %v1353_v49 = vmul.f32 1.442695, %v1308_v45  ;;  %v1583_v5 = vsub.f32 %v4392_v26, %v1556_v13  ;;  %v1811_v16 = vsub.f32 %v4339_v11, %v3673_v50 }
 0x262   :  { %v1837_v56 = vmul.f32 0.15915494, %v1810_v20  ;;  %v663_v39 = vmul.f32 %v3299_v62, %v524_v27  ;;  %v4423_v58 = vmul.f32 %v3656_v36, %v1220_v10  ;;  %v664_v2 = vmul.f32 %v3301_v12, %v525_v51 }
 0x263   :  { %3306 = vpow2.f32 %v1353_v49  ;;  %v1355_v21 = vmul.f32 1.442695, %v1309_v0  ;;  %v1640_v63 = vmul.f32 %v1582_v44, %v1582_v44  ;;  %v1641_v41 = vmul.f32 %v1583_v5, %v1583_v5 }
 0x264   :  { %v1838_v52 = vmul.f32 0.15915494, %v1811_v16  ;;  %v3085_v26 = vtrunc.f32 %v1837_v56  ;;  %v360_v11 = vsub.f32 %v4425_v24, %v3641_v29  ;;  %v361_v7 = vsub.f32 %v4427_v43, %v3641_v29 }
 0x265   :  { %3308 = vpow2.f32 %v1355_v21  ;;  %v1671_v6 = vmul.f32 %v3693_v23, %v1640_v63  ;;  %v1672_v18 = vmul.f32 %v3693_v23, %v1641_v41  ;;  %v723_v33 = vsub.f32 %v4425_v24, %v3643_v30 }
 0x266   :  { %v3087_v9 = vtrunc.f32 %v1838_v52  ;;  %v3086_v3 = vcvt.f32.s32 %v3085_v26  ;;  %v387_v4 = vmul.f32 0.15915494, %v360_v11  ;;  %v388_v8 = vmul.f32 0.15915494, %v361_v7 }
 0x267   :  { %v4439_v22 = vsub.f32 %v4427_v43, %v3643_v30  ;;  %v1716_v57 = vmul.f32 1.442695, %v1671_v6  ;;  %v1718_v42 = vmul.f32 1.442695, %v1672_v18  ;;  %v750_v15 = vmul.f32 0.15915494, %v723_v33 }
 0x268   :  { %v3088_v55 = vcvt.f32.s32 %v3087_v9  ;;  %v690_v27 = vsub.f32 0.0, %v663_v39  ;;  %v1891_v10 = vcvt.s32.f32 %v3086_v3  ;;  %v2873_v17 = vtrunc.f32 %v387_v4 }
 0x269   :  { %v2875_v48 = vtrunc.f32 %v388_v8  ;;  %v3303_v60 = vpop.eup %3302  ;;  %3310 = vpow2.f32 %v1716_v57  ;;  %v751_v25 = vmul.f32 0.15915494, %v4439_v22  ;;  %v2927_v61 = vtrunc.f32 %v750_v15 }
 0x26a   :  { %v1892_v51 = vcvt.s32.f32 %v3088_v55  ;;  %v3305_v37 = vpop.eup %3304  ;;  %v691_v45 = vsub.f32 0.0, %v664_v2  ;;  %v1613_v38 = vmul.f32 %v3671_v46, %v1582_v44  ;;  %3312 = vpow2.f32 %v1718_v42 }
 0x26b   :  { %v1918_v62 = vmul.f32 6.2831855, %v1891_v10  ;;  %v2874_v12 = vcvt.f32.s32 %v2873_v17  ;;  %v2876_v0 = vcvt.f32.s32 %v2875_v48  ;;  %v2928_v49 = vcvt.f32.s32 %v2927_v61 }
 0x26c   :  { %v1919_v13 = vmul.f32 6.2831855, %v1892_v51  ;;  %v1026_v39 = vmul.f32 %v3303_v60, %v4404_v53  ;;  %v1614_v21 = vmul.f32 %v3671_v46, %v1583_v5  ;;  %v2929_v41 = vtrunc.f32 %v751_v25 }
 0x26d   :  { %v3307_v56 = vpop.eup %3306  ;;  %v1945_v63 = vsub.f32 %v1810_v20, %v1918_v62  ;;  %v1027_v52 = vmul.f32 %v3305_v37, %v4408_v47  ;;  %v441_v6 = vcvt.s32.f32 %v2874_v12  ;;  %v442_v2 = vcvt.s32.f32 %v2876_v0 }
 0x26e   :  { %v1946_v26 = vsub.f32 %v1811_v16, %v1919_v13  ;;  %v1053_v44 = vsub.f32 %v690_v27, %v1026_v39  ;;  %v2930_v3 = vcvt.f32.s32 %v2929_v41  ;;  %v804_v4 = vcvt.s32.f32 %v2928_v49 }
 0x26f   :  { %v3309_v18 = vpop.eup %3308  ;;  %v2003_v9 = vmul.f32 %v1945_v63, %v1945_v63  ;;  %v1054_v8 = vsub.f32 %v691_v45, %v1027_v52  ;;  %v1389_v57 = vmul.f32 %v3307_v56, %v4417_v40  ;;  %v4449_v53 = vsub.f32 %v4425_v24, %v3646_v31 }
 0x270   :  { %v2004_v42 = vmul.f32 %v1946_v26, %v1946_v26  ;;  %v468_v5 = vmul.f32 6.2831855, %v441_v6  ;;  %v469_v47 = vmul.f32 6.2831855, %v442_v2  ;;  %v805_v16 = vcvt.s32.f32 %v2930_v3 }
 0x271   :  { %v2034_v20 = vmul.f32 %v3695_v59, %v2003_v9  ;;  %v1976_v55 = vmul.f32 %v3677_v14, %v1945_v63  ;;  %v831_v27 = vmul.f32 6.2831855, %v804_v4  ;;  %v1087_v10 = vsub.f32 %v4427_v43, %v3646_v31 }
 0x272   :  { %v2035_v15 = vmul.f32 %v3695_v59, %v2004_v42  ;;  %v495_v40 = vsub.f32 %v360_v11, %v468_v5  ;;  %v4456_v48 = vsub.f32 %v361_v7, %v469_v47  ;;  %v832_v60 = vmul.f32 6.2831855, %v805_v16 }
 0x273   :  { %v2079_v17 = vmul.f32 1.442695, %v2034_v20  ;;  %v3311_v51 = vpop.eup %3310  ;;  %v1390_v25 = vmul.f32 %v3309_v18, %v4423_v58  ;;  %v858_v37 = vsub.f32 %v723_v33, %v831_v27  ;;  %v1113_v45 = vmul.f32 0.15915494, %v4449_v53 }
 0x274   :  { %v2081_v61 = vmul.f32 1.442695, %v2035_v15  ;;  %v3313_v62 = vpop.eup %3312  ;;  %v1416_v13 = vsub.f32 %v1053_v44, %v1389_v57  ;;  %v1977_v12 = vmul.f32 %v3677_v14, %v1946_v26  ;;  %v1114_v0 = vmul.f32 0.15915494, %v1087_v10 }
 0x275   :  { %3314 = vpow2.f32 %v2079_v17  ;;  %v1417_v49 = vsub.f32 %v1054_v8, %v1390_v25  ;;  %v553_v56 = vmul.f32 %v495_v40, %v495_v40  ;;  %v554_v11 = vmul.f32 %v4456_v48, %v4456_v48 }
 0x276   :  { %3316 = vpow2.f32 %v2081_v61  ;;  %v1752_v7 = vmul.f32 %v3311_v51, %v1613_v38  ;;  %v4464_v39 = vmul.f32 %v3651_v34, %v495_v40  ;;  %v4467_v58 = vsub.f32 %v4439_v22, %v832_v60 }
 0x277   :  { %v916_v33 = vmul.f32 %v858_v37, %v858_v37  ;;  %v1753_v63 = vmul.f32 %v3313_v62, %v1614_v21  ;;  %v584_v41 = vmul.f32 %v3679_v19, %v553_v56  ;;  %v585_v52 = vmul.f32 %v3679_v19, %v554_v11 }
 0x278   :  { %v2981_v26 = vtrunc.f32 %v1113_v45  ;;  %v1779_v6 = vsub.f32 %v1416_v13, %v1752_v7  ;;  %v917_v2 = vmul.f32 %v4467_v58, %v4467_v58  ;;  %v2983_v38 = vtrunc.f32 %v1114_v0 }
 0x279   :  { %v947_v18 = vmul.f32 %v3687_v28, %v916_v33  ;;  %v631_v44 = vmul.f32 1.442695, %v584_v41  ;;  %v633_v9 = vmul.f32 1.442695, %v585_v52  ;;  %v1449_v22 = vsub.f32 %v4425_v24, %v3649_v32 }
 0x27a   :  { %v2982_v3 = vcvt.f32.s32 %v2981_v26  ;;  %v948_v21 = vmul.f32 %v3687_v28, %v917_v2  ;;  %v2984_v8 = vcvt.f32.s32 %v2983_v38  ;;  %v1450_v57 = vsub.f32 %v4427_v43, %v3649_v32 }
 0x27b   :  { %v994_v4 = vmul.f32 1.442695, %v947_v18  ;;  %3318 = vpow2.f32 %v631_v44  ;;  %v1476_v20 = vmul.f32 0.15915494, %v1449_v22  ;;  %v4481_v5 = vsub.f32 %v4425_v24, %v3673_v50 }
 0x27c   :  { %v1167_v42 = vcvt.s32.f32 %v2982_v3  ;;  %v1780_v47 = vsub.f32 %v1417_v49, %v1753_v63  ;;  %3320 = vpow2.f32 %v633_v9  ;;  %v1168_v16 = vcvt.s32.f32 %v2984_v8 }
 0x27d   :  { %v1477_v15 = vmul.f32 0.15915494, %v1450_v57  ;;  %v996_v27 = vmul.f32 1.442695, %v948_v21  ;;  %v3035_v40 = vtrunc.f32 %v1476_v20  ;;  %v4485_v60 = vsub.f32 %v4427_v43, %v3673_v50  ;;  %v4501_v20 = vpop.permute.xlu0 %318 }
 0x27e   :  { %v1194_v17 = vmul.f32 6.2831855, %v1167_v42  ;;  %3322 = vpow2.f32 %v994_v4  ;;  %v1195_v25 = vmul.f32 6.2831855, %v1168_v16  ;;  %v1839_v45 = vmul.f32 0.15915494, %v4481_v5 }
 0x27f   :  { %v3315_v51 = vpop.eup %3314  ;;  %v3037_v61 = vtrunc.f32 %v1477_v15  ;;  %v3036_v0 = vcvt.f32.s32 %v3035_v40  ;;  %v1840_v49 = vmul.f32 0.15915494, %v4485_v60  ;;  %v527_v43 = vmul.f32 %v3651_v34, %v4456_v48 }
 0x280   :  { %v3317_v62 = vpop.eup %3316  ;;  %v2115_v24 = vmul.f32 %v3315_v51, %v1976_v55  ;;  %v1221_v13 = vsub.f32 %v4449_v53, %v1194_v17  ;;  %v1222_v11 = vsub.f32 %v1087_v10, %v1195_v25  ;;  %v3089_v33 = vtrunc.f32 %v1839_v45 }
 0x281   :  { %v2116_v56 = vmul.f32 %v3317_v62, %v1977_v12  ;;  %v3038_v7 = vcvt.f32.s32 %v3037_v61  ;;  %v1530_v52 = vcvt.s32.f32 %v3036_v0  ;;  %v889_v2 = vmul.f32 %v3653_v35, %v858_v37  ;;  %v4494_v12 = vpop.permute.xlu1 %313 }
 0x282   :  { %v2142_v63 = vsub.f32 %v1779_v6, %v2115_v24  ;;  %v1279_v41 = vmul.f32 %v1221_v13, %v1221_v13  ;;  %v1280_v18 = vmul.f32 %v1222_v11, %v1222_v11  ;;  %v3090_v44 = vcvt.f32.s32 %v3089_v33 }
 0x283   :  { %v2143_v26 = vsub.f32 %v1780_v47, %v2116_v56  ;;  %v1531_v55 = vcvt.s32.f32 %v3038_v7  ;;  %v1557_v38 = vmul.f32 6.2831855, %v1530_v52  ;;  %v3091_v9 = vtrunc.f32 %v1840_v49 }
 0x284   :  { %v1310_v53 = vmul.f32 %v3690_v54, %v1279_v41  ;;  %3324 = vpow2.f32 %v996_v27  ;;  %v1311_v6 = vmul.f32 %v3690_v54, %v1280_v18  ;;  %v4499_v37 = vsub.f32 %v4494_v12, %v3641_v29 }
 0x285   :  { %v2791_v10 = vpack.c.bf16 %v2143_v26, %v2142_v63  ;;  %v1558_v3 = vmul.f32 6.2831855, %v1531_v55  ;;  %v3319_v48 = vpop.eup %3318  ;;  %v1584_v4 = vsub.f32 %v1449_v22, %v1557_v38  ;;  %v3092_v8 = vcvt.f32.s32 %v3091_v9 }
 0x286   :  { %v1357_v21 = vmul.f32 1.442695, %v1310_v53  ;;  %v3321_v42 = vpop.eup %3320  ;;  %v665_v47 = vmul.f32 %v3319_v48, %v4464_v39  ;;  %v1359_v16 = vmul.f32 1.442695, %v1311_v6  ;;  %v1893_v27 = vcvt.s32.f32 %v3090_v44 }
 0x287   :  { %2792 = vmatpush1.bf16.msra.mxu0 %v2791_v10  ;;  %2828 = vmatpush1.bf16.msra.mxu1 %v2791_v10  ;;  %v1585_v15 = vsub.f32 %v1450_v57, %v1558_v3  ;;  %v890_v22 = vmul.f32 %v3653_v35, %v4467_v58  ;;  %v1642_v17 = vmul.f32 %v1584_v4, %v1584_v4  ;;  %v1894_v58 = vcvt.s32.f32 %v3092_v8 }
 0x288   :  { %2793 = vmatprep.subr.bf16.mxu0 %v3443_v1  ;;  %2815 = vmatprep.subr.bf16.mxu1 %v3443_v1  ;;  %v363_v40 = vsub.f32 %v4501_v20, %v3641_v29  ;;  %v3323_v51 = vpop.eup %3322  ;;  %v666_v25 = vmul.f32 %v3321_v42, %v527_v43  ;;  %v1252_v61 = vmul.f32 %v3656_v36, %v1221_v13  ;;  %3326 = vpow2.f32 %v1357_v21 }
 0x289   :  { %v1253_v39 = vmul.f32 %v3656_v36, %v1222_v11  ;;  %3328 = vpow2.f32 %v1359_v16  ;;  %v4513_v57 = vmul.f32 %v3671_v46, %v1584_v4  ;;  %v1643_v45 = vmul.f32 %v1585_v15, %v1585_v15 }
 0x28a   :  { %v1673_v62 = vmul.f32 %v3693_v23, %v1642_v17  ;;  %v692_v24 = vsub.f32 0.0, %v665_v47  ;;  %v1920_v0 = vmul.f32 6.2831855, %v1893_v27  ;;  %v389_v49 = vmul.f32 0.15915494, %v4499_v37 }
 0x28b   :  { %v1028_v56 = vmul.f32 %v3323_v51, %v889_v2  ;;  %v1674_v7 = vmul.f32 %v3693_v23, %v1643_v45  ;;  %v390_v13 = vmul.f32 0.15915494, %v363_v40  ;;  %v1921_v63 = vmul.f32 6.2831855, %v1894_v58 }
 0x28c   :  { %v1720_v33 = vmul.f32 1.442695, %v1673_v62  ;;  %v1947_v11 = vsub.f32 %v4481_v5, %v1920_v0  ;;  %v2877_v43 = vtrunc.f32 %v389_v49  ;;  %v725_v41 = vsub.f32 %v4494_v12, %v3643_v30 }
 0x28d   :  { %v1722_v52 = vmul.f32 1.442695, %v1674_v7  ;;  %v2879_v26 = vtrunc.f32 %v390_v13  ;;  %v726_v18 = vsub.f32 %v4501_v20, %v3643_v30  ;;  %v693_v53 = vsub.f32 0.0, %v666_v25 }
 0x28e   :  { %3330 = vpow2.f32 %v1720_v33  ;;  %v3325_v55 = vpop.eup %3324  ;;  %v1948_v2 = vsub.f32 %v4485_v60, %v1921_v63  ;;  %v2005_v38 = vmul.f32 %v1947_v11, %v1947_v11  ;;  %v2878_v44 = vcvt.f32.s32 %v2877_v43 }
 0x28f   :  { %3332 = vpow2.f32 %v1722_v52  ;;  %v2880_v9 = vcvt.f32.s32 %v2879_v26  ;;  %v752_v10 = vmul.f32 0.15915494, %v725_v41  ;;  %v753_v5 = vmul.f32 0.15915494, %v726_v18 }
 0x290   :  { %v1616_v6 = vmul.f32 %v3671_v46, %v1585_v15  ;;  %v2006_v3 = vmul.f32 %v1948_v2, %v1948_v2  ;;  %v2036_v48 = vmul.f32 %v3695_v59, %v2005_v38  ;;  %v443_v21 = vcvt.s32.f32 %v2878_v44 }
 0x291   :  { %v1029_v4 = vmul.f32 %v3325_v55, %v890_v22  ;;  %v444_v8 = vcvt.s32.f32 %v2880_v9  ;;  %v2931_v42 = vtrunc.f32 %v752_v10  ;;  %v2933_v47 = vtrunc.f32 %v753_v5 }
 0x292   :  { %v3327_v16 = vpop.eup %3326  ;;  %v1055_v27 = vsub.f32 %v692_v24, %v1028_v56  ;;  %v2037_v60 = vmul.f32 %v3695_v59, %v2006_v3  ;;  %v2083_v17 = vmul.f32 1.442695, %v2036_v48  ;;  %v470_v51 = vmul.f32 6.2831855, %v443_v21 }
 0x293   :  { %v3329_v25 = vpop.eup %3328  ;;  %v1056_v45 = vsub.f32 %v693_v53, %v1029_v4  ;;  %v471_v62 = vmul.f32 6.2831855, %v444_v8  ;;  %v2932_v58 = vcvt.f32.s32 %v2931_v42  ;;  %v2934_v0 = vcvt.f32.s32 %v2933_v47 }
 0x294   :  { %3334 = vpow2.f32 %v2083_v17  ;;  %v2085_v15 = vmul.f32 1.442695, %v2037_v60  ;;  %v497_v49 = vsub.f32 %v4499_v37, %v470_v51  ;;  %v1088_v22 = vsub.f32 %v4494_v12, %v3646_v31 }
 0x295   :  { %v1391_v7 = vmul.f32 %v3327_v16, %v1252_v61  ;;  %v4530_v33 = vsub.f32 %v363_v40, %v471_v62  ;;  %v806_v24 = vcvt.s32.f32 %v2932_v58  ;;  %v807_v56 = vcvt.s32.f32 %v2934_v0 }
 0x296   :  { %v1392_v13 = vmul.f32 %v3329_v25, %v1253_v39  ;;  %3336 = vpow2.f32 %v2085_v15  ;;  %v555_v63 = vmul.f32 %v497_v49, %v497_v49  ;;  %v1089_v43 = vsub.f32 %v4501_v20, %v3646_v31 }
 0x297   :  { %v1978_v26 = vmul.f32 %v3677_v14, %v1947_v11  ;;  %v556_v37 = vmul.f32 %v4530_v33, %v4530_v33  ;;  %v833_v55 = vmul.f32 6.2831855, %v806_v24  ;;  %v834_v53 = vmul.f32 6.2831855, %v807_v56 }
 0x298   :  { %v3331_v52 = vpop.eup %3330  ;;  %v1418_v38 = vsub.f32 %v1055_v27, %v1391_v7  ;;  %v1419_v61 = vsub.f32 %v1056_v45, %v1392_v13  ;;  %v586_v40 = vmul.f32 %v3679_v19, %v555_v63  ;;  %v1115_v44 = vmul.f32 0.15915494, %v1088_v22 }
 0x299   :  { %v3333_v9 = vpop.eup %3332  ;;  %v587_v39 = vmul.f32 %v3679_v19, %v556_v37  ;;  %v860_v10 = vsub.f32 %v725_v41, %v833_v55  ;;  %v861_v5 = vsub.f32 %v726_v18, %v834_v53  ;;  %v1116_v3 = vmul.f32 0.15915494, %v1089_v43 }
 0x29a   :  { %v1754_v48 = vmul.f32 %v3331_v52, %v4513_v57  ;;  %v635_v21 = vmul.f32 1.442695, %v586_v40  ;;  %v2985_v11 = vtrunc.f32 %v1115_v44  ;;  %v4542_v4 = vsub.f32 %v4494_v12, %v3649_v32 }
 0x29b   :  { %v1755_v8 = vmul.f32 %v3333_v9, %v1616_v6  ;;  %v1979_v42 = vmul.f32 %v3677_v14, %v1948_v2  ;;  %v637_v47 = vmul.f32 1.442695, %v587_v39  ;;  %v918_v16 = vmul.f32 %v860_v10, %v860_v10 }
 0x29c   :  { %v1781_v27 = vsub.f32 %v1418_v38, %v1754_v48  ;;  %3338 = vpow2.f32 %v635_v21  ;;  %v919_v60 = vmul.f32 %v861_v5, %v861_v5  ;;  %v2986_v17 = vcvt.f32.s32 %v2985_v11 }
 0x29d   :  { %3340 = vpow2.f32 %v637_v47  ;;  %v949_v41 = vmul.f32 %v3687_v28, %v918_v16  ;;  %v2987_v18 = vtrunc.f32 %v1116_v3  ;;  %v1452_v57 = vsub.f32 %v4501_v20, %v3649_v32 }
 0x29e   :  { %v3335_v51 = vpop.eup %3334  ;;  %v1782_v25 = vsub.f32 %v1419_v61, %v1755_v8  ;;  %v1169_v45 = vcvt.s32.f32 %v2986_v17  ;;  %v1478_v6 = vmul.f32 0.15915494, %v4542_v4  ;;  %v4551_v2 = vsub.f32 %v4494_v12, %v3673_v50 }
 0x29f   :  { %v2117_v62 = vmul.f32 %v3335_v51, %v1978_v26  ;;  %v998_v58 = vmul.f32 1.442695, %v949_v41  ;;  %v2988_v0 = vcvt.f32.s32 %v2987_v18  ;;  %v1479_v15 = vmul.f32 0.15915494, %v1452_v57 }
 0x2a0   :  { %v3337_v7 = vpop.eup %3336  ;;  %v950_v24 = vmul.f32 %v3687_v28, %v919_v60  ;;  %v1196_v56 = vmul.f32 6.2831855, %v1169_v45  ;;  %v3039_v13 = vtrunc.f32 %v1478_v6  ;;  %v4556_v63 = vsub.f32 %v4501_v20, %v3673_v50  ;;  %v4569_v45 = vpop.permute.xlu1 %323 }
 0x2a1   :  { %v2118_v52 = vmul.f32 %v3337_v7, %v1979_v42  ;;  %v2144_v37 = vsub.f32 %v1781_v27, %v2117_v62  ;;  %v528_v55 = vmul.f32 %v3651_v34, %v497_v49  ;;  %v1170_v53 = vcvt.s32.f32 %v2988_v0 }
 0x2a2   :  { %3342 = vpow2.f32 %v998_v58  ;;  %v1223_v12 = vsub.f32 %v1088_v22, %v1196_v56  ;;  %v3040_v26 = vcvt.f32.s32 %v3039_v13  ;;  %v3041_v38 = vtrunc.f32 %v1479_v15 }
 0x2a3   :  { %v2145_v61 = vsub.f32 %v1782_v25, %v2118_v52  ;;  %v1197_v40 = vmul.f32 6.2831855, %v1170_v53  ;;  %v1841_v44 = vmul.f32 0.15915494, %v4551_v2  ;;  %v1842_v9 = vmul.f32 0.15915494, %v4556_v63 }
 0x2a4   :  { %v1000_v39 = vmul.f32 1.442695, %v950_v24  ;;  %v1281_v3 = vmul.f32 %v1223_v12, %v1223_v12  ;;  %v3042_v48 = vcvt.f32.s32 %v3041_v38  ;;  %v1532_v20 = vcvt.s32.f32 %v3040_v26  ;;  %v4577_v24 = vpop.permute.xlu0 %328 }
 0x2a5   :  { %v2794_v21 = vpack.c.bf16 %v2145_v61, %v2144_v37  ;;  %v1224_v11 = vsub.f32 %v1089_v43, %v1197_v40  ;;  %v3093_v8 = vtrunc.f32 %v1841_v44  ;;  %v3095_v42 = vtrunc.f32 %v1842_v9 }
 0x2a6   :  { %v3339_v49 = vpop.eup %3338  ;;  %v529_v22 = vmul.f32 %v3651_v34, %v4530_v33  ;;  %v1312_v47 = vmul.f32 %v3690_v54, %v1281_v3  ;;  %v1533_v16 = vcvt.s32.f32 %v3042_v48  ;;  %v1559_v27 = vmul.f32 6.2831855, %v1532_v20 }
 0x2a7   :  { %v3341_v60 = vpop.eup %3340  ;;  %2795 = vmatpush1.bf16.msra.mxu0 %v2794_v21  ;;  %2829 = vmatpush1.bf16.msra.mxu1 %v2794_v21  ;;  %v891_v17 = vmul.f32 %v3653_v35, %v860_v10  ;;  %v892_v41 = vmul.f32 %v3653_v35, %v861_v5  ;;  %v1282_v18 = vmul.f32 %v1224_v11, %v1224_v11  ;;  %v3094_v51 = vcvt.f32.s32 %v3093_v8 }
 0x2a8   :  { %2796 = vmatprep.subr.bf16.mxu0 %v3443_v1  ;;  %2816 = vmatprep.subr.bf16.mxu1 %v3443_v1  ;;  %3344 = vpow2.f32 %v1000_v39  ;;  %v1361_v43 = vmul.f32 1.442695, %v1312_v47  ;;  %v1560_v33 = vmul.f32 6.2831855, %v1533_v16  ;;  %v1586_v25 = vsub.f32 %v4542_v4, %v1559_v27 }
 0x2a9   :  { %v667_v6 = vmul.f32 %v3339_v49, %v528_v55  ;;  %v1313_v62 = vmul.f32 %v3690_v54, %v1282_v18  ;;  %v3096_v58 = vcvt.f32.s32 %v3095_v42  ;;  %v1895_v10 = vcvt.s32.f32 %v3094_v51 }
 0x2aa   :  { %v668_v0 = vmul.f32 %v3341_v60, %v529_v22  ;;  %v4573_v5 = vmul.f32 %v3656_v36, %v1223_v12  ;;  %v1587_v15 = vsub.f32 %v1452_v57, %v1560_v33  ;;  %v364_v7 = vsub.f32 %v4569_v45, %v3641_v29 }
 0x2ab   :  { %v1363_v56 = vmul.f32 1.442695, %v1313_v62  ;;  %v1644_v13 = vmul.f32 %v1586_v25, %v1586_v25  ;;  %v1896_v4 = vcvt.s32.f32 %v3096_v58  ;;  %v1922_v52 = vmul.f32 6.2831855, %v1895_v10 }
 0x2ac   :  { %v3343_v37 = vpop.eup %3342  ;;  %v1255_v55 = vmul.f32 %v3656_v36, %v1224_v11  ;;  %3346 = vpow2.f32 %v1361_v43  ;;  %v1645_v53 = vmul.f32 %v1587_v15, %v1587_v15  ;;  %v365_v26 = vsub.f32 %v4577_v24, %v3641_v29 }
 0x2ad   :  { %v694_v12 = vsub.f32 0.0, %v667_v6  ;;  %3348 = vpow2.f32 %v1363_v56  ;;  %v1675_v57 = vmul.f32 %v3693_v23, %v1644_v13  ;;  %v1923_v38 = vmul.f32 6.2831855, %v1896_v4 }
 0x2ae   :  { %v695_v61 = vsub.f32 0.0, %v668_v0  ;;  %v1676_v40 = vmul.f32 %v3693_v23, %v1645_v53  ;;  %v1949_v44 = vsub.f32 %v4551_v2, %v1922_v52  ;;  %v391_v9 = vmul.f32 0.15915494, %v364_v7 }
 0x2af   :  { %v1617_v39 = vmul.f32 %v3671_v46, %v1586_v25  ;;  %v1724_v3 = vmul.f32 1.442695, %v1675_v57  ;;  %v1950_v48 = vsub.f32 %v4556_v63, %v1923_v38  ;;  %v392_v20 = vmul.f32 0.15915494, %v365_v26 }
 0x2b0   :  { %v1030_v21 = vmul.f32 %v3343_v37, %v891_v17  ;;  %v1726_v11 = vmul.f32 1.442695, %v1676_v40  ;;  %v2007_v8 = vmul.f32 %v1949_v44, %v1949_v44  ;;  %v2881_v42 = vtrunc.f32 %v391_v9 }
 0x2b1   :  { %v1618_v49 = vmul.f32 %v3671_v46, %v1587_v15  ;;  %3350 = vpow2.f32 %v1724_v3  ;;  %v2008_v22 = vmul.f32 %v1950_v48, %v1950_v48  ;;  %v2883_v47 = vtrunc.f32 %v392_v20 }
 0x2b2   :  { %v3345_v16 = vpop.eup %3344  ;;  %3352 = vpow2.f32 %v1726_v11  ;;  %v2038_v2 = vmul.f32 %v3695_v59, %v2007_v8  ;;  %v2882_v27 = vcvt.f32.s32 %v2881_v42  ;;  %v727_v60 = vsub.f32 %v4569_v45, %v3643_v30 }
 0x2b3   :  { %v2039_v63 = vmul.f32 %v3695_v59, %v2008_v22  ;;  %v2884_v18 = vcvt.f32.s32 %v2883_v47  ;;  %v728_v17 = vsub.f32 %v4577_v24, %v3643_v30  ;;  %v4596_v51 = vsub.f32 %v4569_v45, %v3646_v31 }
 0x2b4   :  { %v2087_v43 = vmul.f32 1.442695, %v2038_v2  ;;  %v445_v33 = vcvt.s32.f32 %v2882_v27  ;;  %v754_v25 = vmul.f32 0.15915494, %v727_v60  ;;  %v4600_v6 = vsub.f32 %v4577_v24, %v3646_v31 }
 0x2b5   :  { %v1031_v62 = vmul.f32 %v3345_v16, %v892_v41  ;;  %v2089_v58 = vmul.f32 1.442695, %v2039_v63  ;;  %v446_v10 = vcvt.s32.f32 %v2884_v18  ;;  %v755_v0 = vmul.f32 0.15915494, %v728_v17 }
 0x2b6   :  { %v3347_v15 = vpop.eup %3346  ;;  %3354 = vpow2.f32 %v2087_v43  ;;  %v472_v56 = vmul.f32 6.2831855, %v445_v33  ;;  %v2935_v13 = vtrunc.f32 %v754_v25  ;;  %v1117_v4 = vmul.f32 0.15915494, %v4596_v51 }
 0x2b7   :  { %v3349_v52 = vpop.eup %3348  ;;  %v1057_v37 = vsub.f32 %v694_v12, %v1030_v21  ;;  %3356 = vpow2.f32 %v2089_v58  ;;  %v473_v53 = vmul.f32 6.2831855, %v446_v10  ;;  %v2937_v57 = vtrunc.f32 %v755_v0 }
 0x2b8   :  { %v1058_v38 = vsub.f32 %v695_v61, %v1031_v62  ;;  %v4603_v40 = vsub.f32 %v364_v7, %v472_v56  ;;  %v2936_v9 = vcvt.f32.s32 %v2935_v13  ;;  %v1118_v41 = vmul.f32 0.15915494, %v4600_v6 }
 0x2b9   :  { %v1393_v3 = vmul.f32 %v3347_v15, %v4573_v5  ;;  %v4607_v20 = vsub.f32 %v365_v26, %v473_v53  ;;  %v2938_v11 = vcvt.f32.s32 %v2937_v57  ;;  %v2989_v8 = vtrunc.f32 %v1117_v4 }
 0x2ba   :  { %v1394_v42 = vmul.f32 %v3349_v52, %v1255_v55  ;;  %v1980_v22 = vmul.f32 %v3677_v14, %v1949_v44  ;;  %v557_v12 = vmul.f32 %v4603_v40, %v4603_v40  ;;  %v808_v21 = vcvt.s32.f32 %v2936_v9 }
 0x2bb   :  { %v3351_v47 = vpop.eup %3350  ;;  %v1420_v61 = vsub.f32 %v1057_v37, %v1393_v3  ;;  %v558_v7 = vmul.f32 %v4607_v20, %v4607_v20  ;;  %v809_v16 = vcvt.s32.f32 %v2938_v11  ;;  %v2990_v2 = vcvt.f32.s32 %v2989_v8 }
 0x2bc   :  { %v3353_v27 = vpop.eup %3352  ;;  %v1421_v5 = vsub.f32 %v1058_v38, %v1394_v42  ;;  %v588_v26 = vmul.f32 %v3679_v19, %v557_v12  ;;  %v835_v63 = vmul.f32 6.2831855, %v808_v21  ;;  %v2991_v18 = vtrunc.f32 %v1118_v41 }
 0x2bd   :  { %v1756_v55 = vmul.f32 %v3351_v47, %v1617_v39  ;;  %v1981_v44 = vmul.f32 %v3677_v14, %v1950_v48  ;;  %v836_v43 = vmul.f32 6.2831855, %v809_v16  ;;  %v1171_v33 = vcvt.s32.f32 %v2990_v2 }
 0x2be   :  { %v1757_v25 = vmul.f32 %v3353_v27, %v1618_v49  ;;  %v4616_v62 = vsub.f32 %v727_v60, %v835_v63  ;;  %v2992_v58 = vcvt.f32.s32 %v2991_v18  ;;  %v4620_v10 = vsub.f32 %v4569_v45, %v3649_v32  ;;  %v2180_v27 = vld [vmem:[#allocation4 + $0x8] sm:$0xff] }
 0x2bf   :  { %v1783_v0 = vsub.f32 %v1420_v61, %v1756_v55  ;;  %v589_v15 = vmul.f32 %v3679_v19, %v558_v7  ;;  %v4623_v56 = vsub.f32 %v728_v17, %v836_v43  ;;  %v1198_v13 = vmul.f32 6.2831855, %v1171_v33  ;;  %2714 = vmatprep.mubr.msk.f32.mxu0 %vm2233_vm5, %v2180_v27 }
 0x2c0   :  { %v3355_v4 = vpop.eup %3354  ;;  %v1784_v39 = vsub.f32 %v1421_v5, %v1757_v25  ;;  %v639_v52 = vmul.f32 1.442695, %v588_v26  ;;  %v920_v48 = vmul.f32 %v4616_v62, %v4616_v62  ;;  %v1172_v49 = vcvt.s32.f32 %v2992_v58  ;;  %v2206_v5 = vld [vmem:[#allocation4 + $0xd8] sm:$0xff]  ;;  %v4644_v26 = vpop.permute.xlu1 %333 }
 0x2c1   :  { %v3357_v60 = vpop.eup %3356  ;;  %v2119_v37 = vmul.f32 %v3355_v4, %v1980_v22  ;;  %v921_v53 = vmul.f32 %v4623_v56, %v4623_v56  ;;  %v4630_v9 = vsub.f32 %v4596_v51, %v1198_v13  ;;  %v641_v41 = vmul.f32 1.442695, %v589_v15  ;;  %2727 = vmatprep.mubr.msk.f32.mxu1 %vm2233_vm5, %v2206_v5 }
 0x2c2   :  { %v2120_v57 = vmul.f32 %v3357_v60, %v1981_v44  ;;  %v1199_v38 = vmul.f32 6.2831855, %v1172_v49  ;;  %v1454_v3 = vsub.f32 %v4577_v24, %v3649_v32  ;;  %v1480_v11 = vmul.f32 0.15915494, %v4620_v10 }
 0x2c3   :  { %v2146_v17 = vsub.f32 %v1783_v0, %v2119_v37  ;;  %3358 = vpow2.f32 %v639_v52  ;;  %v951_v42 = vmul.f32 %v3687_v28, %v920_v48  ;;  %v952_v12 = vmul.f32 %v3687_v28, %v921_v53 }
 0x2c4   :  { %v2147_v8 = vsub.f32 %v1784_v39, %v2120_v57  ;;  %v4637_v22 = vsub.f32 %v4600_v6, %v1199_v38  ;;  %v1481_v21 = vmul.f32 0.15915494, %v1454_v3  ;;  %v3043_v47 = vtrunc.f32 %v1480_v11 }
 0x2c5   :  { %v1283_v61 = vmul.f32 %v4630_v9, %v4630_v9  ;;  %3360 = vpow2.f32 %v641_v41  ;;  %v1002_v6 = vmul.f32 1.442695, %v951_v42  ;;  %v1816_v63 = vsub.f32 %v4569_v45, %v3673_v50 }
 0x2c6   :  { %v2797_v51 = vpack.c.bf16 %v2147_v8, %v2146_v17  ;;  %v1284_v7 = vmul.f32 %v4637_v22, %v4637_v22  ;;  %v3044_v16 = vcvt.f32.s32 %v3043_v47  ;;  %v3045_v2 = vtrunc.f32 %v1481_v21 }
 0x2c7   :  { %v1817_v18 = vsub.f32 %v4577_v24, %v3673_v50  ;;  %v1004_v55 = vmul.f32 1.442695, %v952_v12  ;;  %v4654_v33 = vsub.f32 %v4644_v26, %v3641_v29  ;;  %v1314_v25 = vmul.f32 %v3690_v54, %v1283_v61 }
 0x2c8   :  { %2798 = vmatpush1.bf16.msra.mxu0 %v2797_v51  ;;  %2830 = vmatpush1.bf16.msra.mxu1 %v2797_v51  ;;  %v3046_v44 = vcvt.f32.s32 %v3045_v2  ;;  %v1534_v43 = vcvt.s32.f32 %v3044_v16  ;;  %v1843_v58 = vmul.f32 0.15915494, %v1816_v63  ;;  %v4659_v45 = vsub.f32 %v4644_v26, %v3643_v30 }
 0x2c9   :  { %2799 = vmatprep.subr.bf16.mxu0 %v3443_v1  ;;  %2817 = vmatprep.subr.bf16.mxu1 %v3443_v1  ;;  %v1844_v0 = vmul.f32 0.15915494, %v1817_v18  ;;  %v1315_v24 = vmul.f32 %v3690_v54, %v1284_v7  ;;  %v530_v29 = vmul.f32 %v3651_v34, %v4603_v40  ;;  %3362 = vpow2.f32 %v1002_v6 }
 0x2ca   :  { %v1535_v15 = vcvt.s32.f32 %v3046_v44  ;;  %v1561_v13 = vmul.f32 6.2831855, %v1534_v43  ;;  %v3097_v4 = vtrunc.f32 %v1843_v58  ;;  %3364 = vpow2.f32 %v1004_v55 }
 0x2cb   :  { %v3099_v39 = vtrunc.f32 %v1844_v0  ;;  %v393_v30 = vmul.f32 0.15915494, %v4654_v33  ;;  %v1365_v60 = vmul.f32 1.442695, %v1314_v25  ;;  %v756_v57 = vmul.f32 0.15915494, %v4659_v45 }
 0x2cc   :  { %v1562_v52 = vmul.f32 6.2831855, %v1535_v15  ;;  %v4667_v48 = vsub.f32 %v4620_v10, %v1561_v13  ;;  %v3098_v37 = vcvt.f32.s32 %v3097_v4  ;;  %v1367_v38 = vmul.f32 1.442695, %v1315_v24 }
 0x2cd   :  { %v3359_v49 = vpop.eup %3358  ;;  %v3100_v53 = vcvt.f32.s32 %v3099_v39  ;;  %v2885_v41 = vtrunc.f32 %v393_v30  ;;  %v531_v11 = vmul.f32 %v3651_v34, %v4607_v20  ;;  %v2939_v42 = vtrunc.f32 %v756_v57 }
 0x2ce   :  { %v4671_v17 = vsub.f32 %v1454_v3, %v1562_v52  ;;  %v1646_v40 = vmul.f32 %v4667_v48, %v4667_v48  ;;  %v1897_v10 = vcvt.s32.f32 %v3098_v37  ;;  %v669_v21 = vmul.f32 %v3359_v49, %v530_v29 }
 0x2cf   :  { %v1898_v8 = vcvt.s32.f32 %v3100_v53  ;;  %v3361_v12 = vpop.eup %3360  ;;  %v4682_v3 = vsub.f32 %v4644_v26, %v3646_v31  ;;  %3366 = vpow2.f32 %v1365_v60  ;;  %v2886_v16 = vcvt.f32.s32 %v2885_v41 }
 0x2d0   :  { %v1647_v47 = vmul.f32 %v4671_v17, %v4671_v17  ;;  %v1677_v51 = vmul.f32 %v3693_v23, %v1646_v40  ;;  %v1924_v61 = vmul.f32 6.2831855, %v1897_v10  ;;  %3368 = vpow2.f32 %v1367_v38 }
 0x2d1   :  { %v1925_v7 = vmul.f32 6.2831855, %v1898_v8  ;;  %v2940_v27 = vcvt.f32.s32 %v2939_v42  ;;  %v670_v5 = vmul.f32 %v3361_v12, %v531_v11  ;;  %v447_v44 = vcvt.s32.f32 %v2886_v16 }
 0x2d2   :  { %v1678_v20 = vmul.f32 %v3693_v23, %v1647_v47  ;;  %v1728_v2 = vmul.f32 1.442695, %v1677_v51  ;;  %v4685_v6 = vsub.f32 %v1816_v63, %v1924_v61  ;;  %v1119_v31 = vmul.f32 0.15915494, %v4682_v3 }
 0x2d3   :  { %v4687_v55 = vsub.f32 %v1817_v18, %v1925_v7  ;;  %v810_v25 = vcvt.s32.f32 %v2940_v27  ;;  %v3363_v58 = vpop.eup %3362  ;;  %v893_v0 = vmul.f32 %v3653_v35, %v4616_v62  ;;  %v894_v24 = vmul.f32 %v3653_v35, %v4623_v56 }
 0x2d4   :  { %3370 = vpow2.f32 %v1728_v2  ;;  %v1730_v43 = vmul.f32 1.442695, %v1678_v20  ;;  %v1256_v15 = vmul.f32 %v3656_v36, %v4630_v9  ;;  %v2009_v63 = vmul.f32 %v4685_v6, %v4685_v6  ;;  %v3365_v18 = vpop.eup %3364 }
 0x2d5   :  { %v696_v13 = vsub.f32 0.0, %v669_v21  ;;  %v2010_v29 = vmul.f32 %v4687_v55, %v4687_v55  ;;  %v474_v4 = vmul.f32 6.2831855, %v447_v44  ;;  %v697_v39 = vsub.f32 0.0, %v670_v5 }
 0x2d6   :  { %3372 = vpow2.f32 %v1730_v43  ;;  %v2040_v52 = vmul.f32 %v3695_v59, %v2009_v63  ;;  %v837_v62 = vmul.f32 6.2831855, %v810_v25  ;;  %v2993_v30 = vtrunc.f32 %v1119_v31 }
 0x2d7   :  { %v1032_v49 = vmul.f32 %v3363_v58, %v893_v0  ;;  %v2041_v56 = vmul.f32 %v3695_v59, %v2010_v29  ;;  %v4703_v9 = vsub.f32 %v4654_v33, %v474_v4  ;;  %v1455_v60 = vsub.f32 %v4644_v26, %v3649_v32 }
 0x2d8   :  { %v2091_v37 = vmul.f32 1.442695, %v2040_v52  ;;  %v4708_v53 = vsub.f32 %v4659_v45, %v837_v62  ;;  %v2994_v57 = vcvt.f32.s32 %v2993_v30  ;;  %v1818_v38 = vsub.f32 %v4644_v26, %v3673_v50 }
 0x2d9   :  { %v1033_v40 = vmul.f32 %v3365_v18, %v894_v24  ;;  %v2093_v41 = vmul.f32 1.442695, %v2041_v56  ;;  %v559_v11 = vmul.f32 %v4703_v9, %v4703_v9  ;;  %v1482_v10 = vmul.f32 0.15915494, %v1455_v60  ;;  %v3367_v8 = vpop.eup %3366 }
 0x2da   :  { %v1059_v33 = vsub.f32 %v696_v13, %v1032_v49  ;;  %3374 = vpow2.f32 %v2091_v37  ;;  %v922_v32 = vmul.f32 %v4708_v53, %v4708_v53  ;;  %v1173_v42 = vcvt.s32.f32 %v2994_v57  ;;  %v3369_v12 = vpop.eup %3368 }
 0x2db   :  { %3376 = vpow2.f32 %v2093_v41  ;;  %v590_v45 = vmul.f32 %v3679_v19, %v559_v11  ;;  %v3047_v21 = vtrunc.f32 %v1482_v10  ;;  %v1845_v47 = vmul.f32 0.15915494, %v1818_v38 }
 0x2dc   :  { %v1060_v50 = vsub.f32 %v697_v39, %v1033_v40  ;;  %v1257_v26 = vmul.f32 %v3656_v36, %v4637_v22  ;;  %v953_v51 = vmul.f32 %v3687_v28, %v922_v32  ;;  %v1200_v61 = vmul.f32 6.2831855, %v1173_v42 }
 0x2dd   :  { %v1395_v16 = vmul.f32 %v3367_v8, %v1256_v15  ;;  %v643_v20 = vmul.f32 1.442695, %v590_v45  ;;  %v3048_v2 = vcvt.f32.s32 %v3047_v21  ;;  %v3101_v27 = vtrunc.f32 %v1845_v47 }
 0x2de   :  { %v3371_v7 = vpop.eup %3370  ;;  %v1396_v5 = vmul.f32 %v3369_v12, %v1257_v26  ;;  %v1619_v44 = vmul.f32 %v3671_v46, %v4667_v48  ;;  %v1006_v43 = vmul.f32 1.442695, %v953_v51  ;;  %v1227_v19 = vsub.f32 %v4682_v3, %v1200_v61 }
 0x2df   :  { %v1422_v31 = vsub.f32 %v1059_v33, %v1395_v16  ;;  %3378 = vpow2.f32 %v643_v20  ;;  %v1536_v58 = vcvt.s32.f32 %v3048_v2  ;;  %v3102_v22 = vcvt.f32.s32 %v3101_v27  ;;  %v2205_v2 = vld [vmem:[#allocation4 + $0xd0] sm:$0xff]  ;;  %v2182_v27 = vld [vmem:[#allocation4 + $0x18] sm:$0xff] }
 0x2e0   :  { %v3373_v25 = vpop.eup %3372  ;;  %v1423_v0 = vsub.f32 %v1060_v50, %v1396_v5  ;;  %v1620_v28 = vmul.f32 %v3671_v46, %v4671_v17  ;;  %v1758_v24 = vmul.f32 %v3371_v7, %v1619_v44  ;;  %3380 = vpow2.f32 %v1006_v43  ;;  %v2208_v5 = vld [vmem:[#allocation4 + $0xe8] sm:$0xff]  ;;  %v2210_v43 = vld [vmem:[#allocation4 + $0xf8] sm:$0xff] }
 0x2e1   :  { %v1285_v15 = vmul.f32 %v1227_v19, %v1227_v19  ;;  %v1563_v63 = vmul.f32 6.2831855, %v1536_v58  ;;  %v1899_v18 = vcvt.s32.f32 %v3102_v22  ;;  %v1982_v48 = vmul.f32 %v3677_v14, %v4685_v6  ;;  %v2184_v44 = vld [vmem:[#allocation4 + $0x28] sm:$0xff]  ;;  %v2185_v22 = vld [vmem:[#allocation4 + $0x30] sm:$0xff] }
 0x2e2   :  { %v1759_v13 = vmul.f32 %v3373_v25, %v1620_v28  ;;  %v1785_v29 = vsub.f32 %v1422_v31, %v1758_v24  ;;  %v1983_v30 = vmul.f32 %v3677_v14, %v4687_v55  ;;  %v895_v12 = vmul.f32 %v3653_v35, %v4708_v53  ;;  %v2209_v25 = vld [vmem:[#allocation4 + $0xf0] sm:$0xff]  ;;  %v2186_v31 = vld [vmem:[#allocation4 + $0x38] sm:$0xff]  ;;  %v2212_v58 = vld [vmem:[#allocation4 + $0x108] sm:$0xff] }
 0x2e3   :  { %v1316_v3 = vmul.f32 %v3690_v54, %v1285_v15  ;;  %v1590_v4 = vsub.f32 %v1455_v60, %v1563_v63  ;;  %v1926_v39 = vmul.f32 6.2831855, %v1899_v18  ;;  %v532_v54 = vmul.f32 %v3651_v34, %v4703_v9  ;;  %v2188_v28 = vld [vmem:[#allocation4 + $0x48] sm:$0xff]  ;;  %v2214_v24 = vld [vmem:[#allocation4 + $0x118] sm:$0xff]  ;;  %v2187_v15 = vld [vmem:[#allocation4 + $0x40] sm:$0xff] }
 0x2e4   :  { %v3375_v52 = vpop.eup %3374  ;;  %v1786_v62 = vsub.f32 %v1423_v0, %v1759_v13  ;;  %v1258_v45 = vmul.f32 %v3656_v36, %v1227_v19  ;;  %v2179_v36 = vld [vmem:[#allocation4] sm:$0xff]  ;;  %v2213_v63 = vld [vmem:[#allocation4 + $0x110] sm:$0xff]  ;;  %v2190_v18 = vld [vmem:[#allocation4 + $0x58] sm:$0xff] }
 0x2e5   :  { %v3377_v17 = vpop.eup %3376  ;;  %v2121_v49 = vmul.f32 %v3375_v52, %v1982_v48  ;;  %v1369_v56 = vmul.f32 1.442695, %v1316_v3  ;;  %v1648_v37 = vmul.f32 %v1590_v4, %v1590_v4  ;;  %v1953_v40 = vsub.f32 %v1818_v38, %v1926_v39  ;;  %v2183_v19 = vld [vmem:[#allocation4 + $0x20] sm:$0xff]  ;;  %v2216_v13 = vld [vmem:[#allocation4 + $0x128] sm:$0xff]  ;;  %v2189_v48 = vld [vmem:[#allocation4 + $0x50] sm:$0xff] }
 0x2e6   :  { %v2122_v57 = vmul.f32 %v3377_v17, %v1983_v30  ;;  %v1621_v50 = vmul.f32 %v3671_v46, %v1590_v4  ;;  %v2181_v46 = vld [vmem:[#allocation4 + $0x10] sm:$0xff]  ;;  %v2211_v0 = vld [vmem:[#allocation4 + $0x100] sm:$0xff]  ;;  %v2192_v3 = vld [vmem:[#allocation4 + $0x68] sm:$0xff] }
 0x2e7   :  { %v2148_v41 = vsub.f32 %v1785_v29, %v2121_v49  ;;  %3382 = vpow2.f32 %v1369_v56  ;;  %v1679_v6 = vmul.f32 %v3693_v23, %v1648_v37  ;;  %v2011_v60 = vmul.f32 %v1953_v40, %v1953_v40  ;;  %v2215_v29 = vld [vmem:[#allocation4 + $0x120] sm:$0xff]  ;;  %v2218_v4 = vld [vmem:[#allocation4 + $0x138] sm:$0xff]  ;;  %v2217_v52 = vld [vmem:[#allocation4 + $0x130] sm:$0xff] }
 0x2e8   :  { %v2149_v11 = vsub.f32 %v1786_v62, %v2122_v57  ;;  %v1984_v61 = vmul.f32 %v3677_v14, %v1953_v40  ;;  %v2207_v14 = vld [vmem:[#allocation4 + $0xe0] sm:$0xff]  ;;  %v2194_v62 = vld [vmem:[#allocation4 + $0x78] sm:$0xff]  ;;  %v2220_v30 = vld [vmem:[#allocation4 + $0x148] sm:$0xff] }
 0x2e9   :  { %v3379_v10 = vpop.eup %3378  ;;  %v1732_v8 = vmul.f32 1.442695, %v1679_v6  ;;  %v2042_v55 = vmul.f32 %v3695_v59, %v2011_v60  ;;  %v2191_v39 = vld [vmem:[#allocation4 + $0x60] sm:$0xff]  ;;  %v2193_v17 = vld [vmem:[#allocation4 + $0x70] sm:$0xff]  ;;  %v2196_v56 = vld [vmem:[#allocation4 + $0x88] sm:$0xff] }
 0x2ea   :  { %v2800_v33 = vpack.c.bf16 %v2149_v11, %v2148_v41  ;;  %v671_v32 = vmul.f32 %v3379_v10, %v532_v54  ;;  %v3381_v42 = vpop.eup %3380  ;;  %v2219_v49 = vld [vmem:[#allocation4 + $0x140] sm:$0xff]  ;;  %v2222_v37 = vld [vmem:[#allocation4 + $0x158] sm:$0xff]  ;;  %v2221_v40 = vld [vmem:[#allocation4 + $0x150] sm:$0xff] }
 0x2eb   :  { %3384 = vpow2.f32 %v1732_v8  ;;  %v2095_v23 = vmul.f32 1.442695, %v2042_v55  ;;  %v1034_v34 = vmul.f32 %v3381_v42, %v895_v12  ;;  %v2195_v57 = vld [vmem:[#allocation4 + $0x80] sm:$0xff]  ;;  %v2198_v41 = vld [vmem:[#allocation4 + $0x98] sm:$0xff]  ;;  %v2224_v6 = vld [vmem:[#allocation4 + $0x168] sm:$0xff] }
 0x2ec   :  { %2801 = vmatpush1.bf16.msra.mxu0 %v2800_v33  ;;  %2831 = vmatpush1.bf16.msra.mxu1 %v2800_v33  ;;  %v698_v38 = vsub.f32 0.0, %v671_v32  ;;  %v2197_v11 = vld [vmem:[#allocation4 + $0x90] sm:$0xff]  ;;  %v2223_v54 = vld [vmem:[#allocation4 + $0x160] sm:$0xff]  ;;  %v2200_v60 = vld [vmem:[#allocation4 + $0xa8] sm:$0xff] }
 0x2ed   :  { %2802 = vmatprep.subr.bf16.mxu0 %v3443_v1  ;;  %2818 = vmatprep.subr.bf16.mxu1 %v3443_v1  ;;  %3386 = vpow2.f32 %v2095_v23  ;;  %v2151_v1 = vld [vmem:[%s4877_s6] sm:$0xff]  ;;  %v2226_v10 = vld [vmem:[#allocation4 + $0x178] sm:$0xff]  ;;  %v2199_v8 = vld [vmem:[#allocation4 + $0xa0] sm:$0xff] }
 0x2ee   :  { %v1061_v9 = vsub.f32 %v698_v38, %v1034_v34  ;;  %v2225_v33 = vld [vmem:[#allocation4 + $0x170] sm:$0xff]  ;;  %v2202_v32 = vld [vmem:[#allocation4 + $0xb8] sm:$0xff]  ;;  %v2228_v55 = vld [vmem:[#allocation4 + $0x188] sm:$0xff] }
 0x2ef   :  { %v2201_v42 = vld [vmem:[#allocation4 + $0xb0] sm:$0xff]  ;;  %v2227_v38 = vld [vmem:[#allocation4 + $0x180] sm:$0xff]  ;;  %v2204_v12 = vld [vmem:[#allocation4 + $0xc8] sm:$0xff] }
 0x2f0   :  { %v2230_v23 = vld [vmem:[#allocation4 + $0x198] sm:$0xff]  ;;  %v2203_v34 = vld [vmem:[#allocation4 + $0xc0] sm:$0xff] }
 0x2f1   :  { %v3383_v21 = vpop.eup %3382 }
 0x2f2   :  { %v1397_v59 = vmul.f32 %v3383_v21, %v1258_v45  ;;  %v2232_v45 = vld [vmem:[#allocation4 + $0x1a8] sm:$0xff]  ;;  %v2231_v21 = vld [vmem:[#allocation4 + $0x1a0] sm:$0xff] }
 0x2f4   :  { %v1424_v47 = vsub.f32 %v1061_v9, %v1397_v59  ;;  %v2229_v9 = vld [vmem:[#allocation4 + $0x190] sm:$0xff]  ;;  %v2518_v59 = vpop.permute.xlu0 %2517 }
 0x2f5   :  { %v3385_v26 = vpop.eup %3384 }
 0x2f6   :  { %v1760_v51 = vmul.f32 %v3385_v26, %v1621_v50 }
 0x2f7   :  { %v3387_v35 = vpop.eup %3386 }
 0x2f8   :  { %v1787_v53 = vsub.f32 %v1424_v47, %v1760_v51  ;;  %v2123_v7 = vmul.f32 %v3387_v35, %v1984_v61  ;;  %v2523_v47 = vpop.permute.xlu1 %2522  ;;  %v2528_v50 = vpop.permute.xlu0 %2527 }
 0x2fa   :  { %v2150_v16 = vsub.f32 %v1787_v53, %v2123_v7 }
 0x2fc   :  { %v2803_v20 = vpack.c.bf16 %v2151_v1, %v2150_v16  ;;  %v2533_v26 = vpop.permute.xlu1 %2532  ;;  %v2538_v51 = vpop.permute.xlu0 %2537 }
 0x2fe   :  { %2804 = vmatpush1.bf16.msra.mxu0 %v2803_v20  ;;  %2832 = vmatpush1.bf16.msra.mxu1 %v2803_v20 }
 0x300   :  { %v2543_v61 = vpop.permute.xlu1 %2542  ;;  %v4769_v35 = vpop.permute.xlu0 %2547 }
 0x301   :  { %2380 = vmatmul.mubr.f32.vlgmr.msra.gmra.mrb[6].mxu0 %v2179_v36  ;;  %2445 = vmatmul.mubr.f32.vlgmr.msra.gmra.mrb[0].mxu1 %v2205_v2 }
 0x302   :  { %2715 = vmatprep.mubr.msk.f32.mxu0 %vm2233_vm5, %v2182_v27  ;;  %2728 = vmatprep.mubr.msk.f32.mxu1 %vm2233_vm5, %v2208_v5 }
 0x304   :  { %v4771_v53 = vpop.permute.xlu1 %2552  ;;  %v4773_v7 = vpop.permute.xlu0 %2557 }
 0x305   :  { %2385 = vmatmul.mubr.f32.gmra.mrb[8].mxu0 %v2181_v46  ;;  %2450 = vmatmul.mubr.f32.gmra.mrb[2].mxu1 %v2207_v14 }
 0x306   :  { %2716 = vmatprep.mubr.msk.f32.mxu0 %vm2233_vm5, %v2184_v44  ;;  %2729 = vmatprep.mubr.msk.f32.mxu1 %vm2233_vm5, %v2210_v43 }
 0x308   :  { %v4775_v1 = vpop.permute.xlu1 %2562  ;;  %v4777_v16 = vpop.permute.xlu0 %2567 }
 0x309   :  { %2390 = vmatmul.mubr.f32.gmra.mrb[10].mxu0 %v2183_v19  ;;  %2455 = vmatmul.mubr.f32.gmra.mrb[4].mxu1 %v2209_v25 }
 0x30a   :  { %2717 = vmatprep.mubr.msk.f32.mxu0 %vm2233_vm5, %v2186_v31  ;;  %2730 = vmatprep.mubr.msk.f32.mxu1 %vm2233_vm5, %v2212_v58 }
 0x30c   :  { %v4779_v20 = vpop.permute.xlu1 %2572  ;;  %v4781_v36 = vpop.permute.xlu0 %2577 }
 0x30d   :  { %2395 = vmatmul.mubr.f32.gmra.mrb[12].mxu0 %v2185_v22  ;;  %2460 = vmatmul.mubr.f32.gmra.mrb[6].mxu1 %v2211_v0 }
 0x30e   :  { %2718 = vmatprep.mubr.msk.f32.mxu0 %vm2233_vm5, %v2188_v28  ;;  %2731 = vmatprep.mubr.msk.f32.mxu1 %vm2233_vm5, %v2214_v24 }
 0x310   :  { %v2583_v2 = vpop.permute.xlu1 %2582  ;;  %v2588_v19 = vpop.permute.xlu0 %2587 }
 0x311   :  { %2400 = vmatmul.mubr.f32.gmra.mrb[14].mxu0 %v2187_v15  ;;  %2465 = vmatmul.mubr.f32.gmra.mrb[8].mxu1 %v2213_v63 }
 0x312   :  { %2719 = vmatprep.mubr.msk.f32.mxu0 %vm2233_vm5, %v2190_v18  ;;  %2732 = vmatprep.mubr.msk.f32.mxu1 %vm2233_vm5, %v2216_v13 }
 0x314   :  { %v2593_v24 = vpop.permute.xlu1 %2592 }
 0x315   :  { %2405 = vmatmul.mubr.f32.gmra.mrb[16].mxu0 %v2189_v48  ;;  %2470 = vmatmul.mubr.f32.gmra.mrb[10].mxu1 %v2215_v29 }
 0x316   :  { %2720 = vmatprep.mubr.msk.f32.mxu0 %vm2233_vm5, %v2192_v3  ;;  %2733 = vmatprep.mubr.msk.f32.mxu1 %vm2233_vm5, %v2218_v4  ;;  %v2598_v3 = vpop.permute.xlu0 %2597 }
 0x319   :  { %2410 = vmatmul.mubr.f32.gmra.mrb[18].mxu0 %v2191_v39  ;;  %2475 = vmatmul.mubr.f32.gmra.mrb[12].mxu1 %v2217_v52 }
 0x31a   :  { %2721 = vmatprep.mubr.msk.f32.mxu0 %vm2233_vm5, %v2194_v62  ;;  %2734 = vmatprep.mubr.msk.f32.mxu1 %vm2233_vm5, %v2220_v30 }
 0x31d   :  { %2415 = vmatmul.mubr.f32.gmra.mrb[20].mxu0 %v2193_v17  ;;  %2480 = vmatmul.mubr.f32.gmra.mrb[14].mxu1 %v2219_v49  ;;  %v2603_v49 = vpop.permute.xlu1 %2602 }
 0x31e   :  { %2722 = vmatprep.mubr.msk.f32.mxu0 %vm2233_vm5, %v2196_v56  ;;  %2735 = vmatprep.mubr.msk.f32.mxu1 %vm2233_vm5, %v2222_v37 }
 0x321   :  { %2420 = vmatmul.mubr.f32.gmra.mrb[22].mxu0 %v2195_v57  ;;  %2485 = vmatmul.mubr.f32.gmra.mrb[16].mxu1 %v2221_v40 }
 0x322   :  { %2723 = vmatprep.mubr.msk.f32.mxu0 %vm2233_vm5, %v2198_v41  ;;  %2736 = vmatprep.mubr.msk.f32.mxu1 %vm2233_vm5, %v2224_v6 }
 0x325   :  { %2425 = vmatmul.mubr.f32.gmra.mrb[24].mxu0 %v2197_v11  ;;  %2490 = vmatmul.mubr.f32.gmra.mrb[18].mxu1 %v2223_v54  ;;  %v2608_v11 = vpop.permute.xlu0 %2607 }
 0x326   :  { %2724 = vmatprep.mubr.msk.f32.mxu0 %vm2233_vm5, %v2200_v60  ;;  %2737 = vmatprep.mubr.msk.f32.mxu1 %vm2233_vm5, %v2226_v10 }
 0x329   :  { %2430 = vmatmul.mubr.f32.gmra.mrb[26].mxu0 %v2199_v8  ;;  %2495 = vmatmul.mubr.f32.gmra.mrb[20].mxu1 %v2225_v33 }
 0x32a   :  { %2725 = vmatprep.mubr.msk.f32.mxu0 %vm2233_vm5, %v2202_v32  ;;  %2738 = vmatprep.mubr.msk.f32.mxu1 %vm2233_vm5, %v2228_v55  ;;  %v2613_v55 = vpop.permute.xlu1 %2612 }
 0x32d   :  { %2435 = vmatmul.mubr.f32.gmra.mrb[28].mxu0 %v2201_v42  ;;  %2500 = vmatmul.mubr.f32.gmra.mrb[22].mxu1 %v2227_v38 }
 0x32e   :  { %2726 = vmatprep.mubr.msk.f32.mxu0 %vm2233_vm5, %v2204_v12  ;;  %2739 = vmatprep.mubr.msk.f32.mxu1 %vm2233_vm5, %v2230_v23 }
 0x331   :  { %2440 = vmatmul.mubr.f32.gmra.mrb[30].mxu0 %v2203_v34  ;;  %2505 = vmatmul.mubr.f32.gmra.mrb[24].mxu1 %v2229_v9 }
 0x332   :  { %2740 = vmatprep.mubr.msk.f32.mxu1 %vm2233_vm5, %v2232_v45  ;;  %v2618_v45 = vpop.permute.xlu0 %2617 }
 0x335   :  { %2510 = vmatmul.mubr.f32.gmra.mrb[26].mxu1 %v2231_v21 }
 0x3d4   :  { %v2381_v27 = vpop.f32.mrb[6].mxu0  ;;  %v2446_v5 = vpop.f32.mrb[0].mxu1 }
 0x3d5   :  { %v2650_v46 = vadd.f32 %v2518_v59, %v2381_v27  ;;  %v2663_v14 = vadd.f32 %v2583_v2, %v2446_v5  ;;  %v2448_v44 = vpop.f32.mrb[1].mxu1  ;;  %v2383_v43 = vpop.f32.mrb[7].mxu0 }
 0x3d7   :  { %2677 = vst [vmem:[%s4878_s7] sm:$0xff] %v2650_v46  ;;  %2690 = vst [vmem:[%s4878_s7 + $0x68] sm:$0xff] %v2663_v14 }
 0x3d8   :  { %v2386_v25 = vpop.f32.mrb[8].mxu0  ;;  %v2451_v31 = vpop.f32.mrb[2].mxu1 }
 0x3d9   :  { %v2651_v58 = vadd.f32 %v2523_v47, %v2386_v25  ;;  %v2664_v22 = vadd.f32 %v2588_v19, %v2451_v31  ;;  %v2453_v0 = vpop.f32.mrb[3].mxu1  ;;  %v2388_v28 = vpop.f32.mrb[9].mxu0 }
 0x3db   :  { %2678 = vst [vmem:[%s4878_s7 + $0x8] sm:$0xff] %v2651_v58  ;;  %2691 = vst [vmem:[%s4878_s7 + $0x70] sm:$0xff] %v2664_v22 }
 0x3dc   :  { %v2391_v15 = vpop.f32.mrb[10].mxu0  ;;  %v2456_v63 = vpop.f32.mrb[4].mxu1 }
 0x3dd   :  { %v2652_v18 = vadd.f32 %v2528_v50, %v2391_v15  ;;  %v2665_v13 = vadd.f32 %v2593_v24, %v2456_v63  ;;  %v2458_v48 = vpop.f32.mrb[5].mxu1  ;;  %v2393_v29 = vpop.f32.mrb[11].mxu0 }
 0x3df   :  { %2679 = vst [vmem:[%s4878_s7 + $0x10] sm:$0xff] %v2652_v18  ;;  %2692 = vst [vmem:[%s4878_s7 + $0x78] sm:$0xff] %v2665_v13 }
 0x3e0   :  { %v2396_v4 = vpop.f32.mrb[12].mxu0  ;;  %v2461_v39 = vpop.f32.mrb[6].mxu1 }
 0x3e1   :  { %v2653_v52 = vadd.f32 %v2533_v26, %v2396_v4  ;;  %v2666_v62 = vadd.f32 %v2598_v3, %v2461_v39  ;;  %v2463_v30 = vpop.f32.mrb[7].mxu1  ;;  %v2398_v17 = vpop.f32.mrb[13].mxu0 }
 0x3e3   :  { %2680 = vst [vmem:[%s4878_s7 + $0x18] sm:$0xff] %v2653_v52  ;;  %2693 = vst [vmem:[%s4878_s7 + $0x80] sm:$0xff] %v2666_v62 }
 0x3e4   :  { %v2401_v56 = vpop.f32.mrb[14].mxu0  ;;  %v2466_v37 = vpop.f32.mrb[8].mxu1 }
 0x3e5   :  { %v2654_v57 = vadd.f32 %v2538_v51, %v2401_v56  ;;  %v2667_v40 = vadd.f32 %v2603_v49, %v2466_v37  ;;  %v2468_v41 = vpop.f32.mrb[9].mxu1  ;;  %v2403_v6 = vpop.f32.mrb[15].mxu0 }
 0x3e7   :  { %2681 = vst [vmem:[%s4878_s7 + $0x20] sm:$0xff] %v2654_v57  ;;  %2694 = vst [vmem:[%s4878_s7 + $0x88] sm:$0xff] %v2667_v40 }
 0x3e8   :  { %v2406_v54 = vpop.f32.mrb[16].mxu0  ;;  %v2471_v60 = vpop.f32.mrb[10].mxu1 }
 0x3e9   :  { %v2655_v10 = vadd.f32 %v2543_v61, %v2406_v54  ;;  %v2668_v8 = vadd.f32 %v2608_v11, %v2471_v60  ;;  %v2473_v33 = vpop.f32.mrb[11].mxu1  ;;  %v2408_v32 = vpop.f32.mrb[17].mxu0 }
 0x3ea   :  { %v2623_v61 = vpop.permute.xlu1 %2622 }
 0x3eb   :  { %2682 = vst [vmem:[%s4878_s7 + $0x28] sm:$0xff] %v2655_v10  ;;  %2695 = vst [vmem:[%s4878_s7 + $0x90] sm:$0xff] %v2668_v8 }
 0x3ec   :  { %v2411_v42 = vpop.f32.mrb[18].mxu0  ;;  %v2476_v38 = vpop.f32.mrb[12].mxu1 }
 0x3ed   :  { %v2656_v12 = vadd.f32 %v4769_v35, %v2411_v42  ;;  %v2669_v23 = vadd.f32 %v2613_v55, %v2476_v38  ;;  %v2478_v34 = vpop.f32.mrb[13].mxu1  ;;  %v2413_v9 = vpop.f32.mrb[19].mxu0 }
 0x3ef   :  { %2683 = vst [vmem:[%s4878_s7 + $0x30] sm:$0xff] %v2656_v12  ;;  %2696 = vst [vmem:[%s4878_s7 + $0x98] sm:$0xff] %v2669_v23 }
 0x3f0   :  { %v2416_v21 = vpop.f32.mrb[20].mxu0  ;;  %v2481_v59 = vpop.f32.mrb[14].mxu1 }
 0x3f1   :  { %v2657_v47 = vadd.f32 %v4771_v53, %v2416_v21  ;;  %v2670_v50 = vadd.f32 %v2618_v45, %v2481_v59  ;;  %v2483_v26 = vpop.f32.mrb[15].mxu1  ;;  %v2418_v51 = vpop.f32.mrb[21].mxu0 }
 0x3f2   :  { %v2628_v53 = vpop.permute.xlu0 %2627 }
 0x3f3   :  { %2684 = vst [vmem:[%s4878_s7 + $0x38] sm:$0xff] %v2657_v47  ;;  %2697 = vst [vmem:[%s4878_s7 + $0xa0] sm:$0xff] %v2670_v50 }
 0x3f4   :  { %v2421_v35 = vpop.f32.mrb[22].mxu0  ;;  %v2486_v2 = vpop.f32.mrb[16].mxu1 }
 0x3f5   :  { %v2658_v27 = vadd.f32 %v4773_v7, %v2421_v35  ;;  %v2671_v5 = vadd.f32 %v2623_v61, %v2486_v2  ;;  %v2488_v46 = vpop.f32.mrb[17].mxu1  ;;  %v2423_v14 = vpop.f32.mrb[23].mxu0 }
 0x3f6   :  { %v2633_v7 = vpop.permute.xlu1 %2632 }
 0x3f7   :  { %2685 = vst [vmem:[%s4878_s7 + $0x40] sm:$0xff] %v2658_v27  ;;  %2698 = vst [vmem:[%s4878_s7 + $0xa8] sm:$0xff] %v2671_v5 }
 0x3f8   :  { %v2426_v44 = vpop.f32.mrb[24].mxu0  ;;  %v2491_v43 = vpop.f32.mrb[18].mxu1 }
 0x3f9   :  { %v2659_v19 = vadd.f32 %v4775_v1, %v2426_v44  ;;  %v2672_v25 = vadd.f32 %v2628_v53, %v2491_v43  ;;  %v2493_v31 = vpop.f32.mrb[19].mxu1  ;;  %v2428_v58 = vpop.f32.mrb[25].mxu0 }
 0x3fa   :  { %v2638_v1 = vpop.permute.xlu0 %2637 }
 0x3fb   :  { %2686 = vst [vmem:[%s4878_s7 + $0x48] sm:$0xff] %v2659_v19  ;;  %2699 = vst [vmem:[%s4878_s7 + $0xb0] sm:$0xff] %v2672_v25 }
 0x3fc   :  { %v2431_v22 = vpop.f32.mrb[26].mxu0  ;;  %v2496_v0 = vpop.f32.mrb[20].mxu1 }
 0x3fd   :  { %v2660_v28 = vadd.f32 %v4777_v16, %v2431_v22  ;;  %v2673_v24 = vadd.f32 %v2633_v7, %v2496_v0  ;;  %v2498_v15 = vpop.f32.mrb[21].mxu1  ;;  %v2433_v63 = vpop.f32.mrb[27].mxu0 }
 0x3fe   :  { %v2643_v16 = vpop.permute.xlu1 %2642 }
 0x3ff   :  { %2687 = vst [vmem:[%s4878_s7 + $0x50] sm:$0xff] %v2660_v28  ;;  %2700 = vst [vmem:[%s4878_s7 + $0xb8] sm:$0xff] %v2673_v24 }
 0x400   :  { %v2436_v18 = vpop.f32.mrb[28].mxu0  ;;  %v2501_v13 = vpop.f32.mrb[22].mxu1 }
 0x401   :  { %v2661_v48 = vadd.f32 %v4779_v20, %v2436_v18  ;;  %v2674_v29 = vadd.f32 %v2638_v1, %v2501_v13  ;;  %v2503_v3 = vpop.f32.mrb[23].mxu1  ;;  %v2438_v4 = vpop.f32.mrb[29].mxu0 }
 0x402   :  { %v2648_v20 = vpop.permute.xlu0 %2647 }
 0x403   :  { %2688 = vst [vmem:[%s4878_s7 + $0x58] sm:$0xff] %v2661_v48  ;;  %2701 = vst [vmem:[%s4878_s7 + $0xc0] sm:$0xff] %v2674_v29 }
 0x404   :  { %v2441_v39 = vpop.f32.mrb[30].mxu0  ;;  %v2506_v52 = vpop.f32.mrb[24].mxu1 }
 0x405   :  { %v2662_v62 = vadd.f32 %v4781_v36, %v2441_v39  ;;  %v2675_v30 = vadd.f32 %v2643_v16, %v2506_v52  ;;  %v2508_v17 = vpop.f32.mrb[25].mxu1  ;;  %v2443_v49 = vpop.f32.mrb[31].mxu0 }
 0x407   :  { %2689 = vst [vmem:[%s4878_s7 + $0x60] sm:$0xff] %v2662_v62  ;;  %2702 = vst [vmem:[%s4878_s7 + $0xc8] sm:$0xff] %v2675_v30 }
 0x408   :  { %v2511_v56 = vpop.f32.mrb[26].mxu1 }
 0x409   :  { %v2676_v37 = vadd.f32 %v2648_v20, %v2511_v56  ;;  %v2513_v57 = vpop.f32.mrb[27].mxu1 }
 0x40b   :  { %2703 = vst [vmem:[%s4878_s7 + $0xd0] sm:$0xff] %v2676_v37 }
 0x40c   :  { %2708 = vsyncpa [#allocation3], 1 }
 0x40d   :  { %2709 = vsyncpa [#allocation5], 1 }

</bundles_post_ra>
